<compile_context>
chip_gen: v6e
topology: v6e:2x2x1
jax: 0.10.0
libtpu: 0.0.40
codegen_flags: <defaults>
</compile_context>

<pallas_src>
import functools

import jax
import jax.numpy as jnp
from jax import lax
from jax.experimental import pallas as pl
from jax.experimental.pallas import tpu as pltpu

LANE = 128


def _round_up(n, m):
    return (n + m - 1) // m * m


def _pick_strip_rows(H, cap=32):
    """Largest multiple-of-8 divisor of H that is <= cap and yields >= 2 strips."""
    divs = [d for d in range(8, H, 8) if H % d == 0 and d <= cap]
    return max(divs) if divs else H


def _conv3x3_rowgrouped(get_tap, w_ref, rows, cols, Cp):
    """3x3 conv as 3 row-grouped matmuls: (rows*cols, 3*Cp) @ (3*Cp, Cp), f32 acc.

    get_tap(dy, dx) -> (rows, cols, Cp) bf16 input slice for kernel tap (dy, dx).
    w_ref has shape (3, 3*Cp, Cp) with w_ref[dy][dx*Cp + cin, cout] == w[dy, dx, cin, cout].
    """
    acc = None
    for dy in range(3):
        taps = jnp.concatenate([get_tap(dy, dx) for dx in range(3)], axis=-1)
        part = jnp.dot(taps.reshape(rows * cols, 3 * Cp), w_ref[dy],
                       preferred_element_type=jnp.float32)
        acc = part if acc is None else acc + part
    return acc.reshape(rows, cols, Cp)


def resblock_kernel(x_hbm, w1_ref, b1_ref, w2_ref, b2_ref, o_ref,
                    xbuf, copy_sem, *, res_scale):
    # x_hbm   : (B, H+4, W+4, Cp) f32   spatially (2,2)-padded input, stays in HBM
    # w*_ref  : (3, 3*Cp, Cp)     bf16  row-grouped conv weights (VMEM resident)
    # b*_ref  : (1, Cp)           f32
    # o_ref   : (1, TH, W, Cp)          current output row-strip
    # xbuf    : (2, TH+4, W+4, Cp) f32  double-buffered halo'd input strip
    # copy_sem: (2,) DMA semaphores, one per buffer slot
    _, TH, W, Cp = o_ref.shape
    b = pl.program_id(0)
    r = pl.program_id(1)
    n_strips = pl.num_programs(1)
    H = TH * n_strips
    R1, C1 = TH + 2, W + 2          # extended conv1 domain (1 halo row/col each side)

    def strip_copy(s, slot):
        # padded rows [s*TH, s*TH + TH + 4) == image rows [s*TH - 2, s*TH + TH + 2)
        return pltpu.make_async_copy(
            x_hbm.at[b, pl.ds(s * TH, TH + 4)],
            xbuf.at[slot],
            copy_sem.at[slot],
        )

    slot = r % 2

    @pl.when(r == 0)                 # first strip of this image: nothing prefetched yet
    def _():
        strip_copy(0, 0).start()

    strip_copy(r, slot).wait()

    @pl.when(r + 1 < n_strips)       # prefetch next strip into the other slot
    def _():
        strip_copy(r + 1, 1 - slot).start()

    xs = xbuf[slot]                  # (TH+4, W+4, Cp) f32
    xsb = xs.astype(jnp.bfloat16)

    # ---- conv1 + bias + ReLU on the extended (TH+2, W+2) domain --------------
    h1 = _conv3x3_rowgrouped(
        lambda dy, dx: xsb[dy:dy + R1, dx:dx + C1, :], w1_ref, R1, C1, Cp)
    h1 = jnp.maximum(h1 + b1_ref[...].reshape(1, 1, Cp), 0.0)

    # Zero positions outside the image: realizes conv2's zero padding with a
    # cheap VPU select instead of a padded scratch / offset-1 masked stores.
    row_id = lax.broadcasted_iota(jnp.int32, (R1, C1, Cp), 0)
    col_id = lax.broadcasted_iota(jnp.int32, (R1, C1, Cp), 1)
    img_row = row_id + (r * TH - 1)                 # image row of extended row i
    valid = (img_row >= 0) & (img_row < H) & (col_id >= 1) & (col_id <= W)
    h1 = jnp.where(valid, h1, 0.0).astype(jnp.bfloat16)

    # ---- conv2 + bias on the (TH, W) output strip -----------------------------
    h2 = _conv3x3_rowgrouped(
        lambda dy, dx: h1[dy:dy + TH, dx:dx + W, :], w2_ref, TH, W, Cp)
    h2 = h2 + b2_ref[...].reshape(1, 1, Cp)

    # ---- residual --------------------------------------------------------------
    identity = xs[2:2 + TH, 2:2 + W, :]             # f32 identity path
    o_ref[0] = (identity + h2 * res_scale).astype(o_ref.dtype)


def residual_block_nobn(x_nhwc, w1, b1, w2, b2, *, res_scale=1.0):
    """x_nhwc: (B, H, W, C); w*: (3, 3, C, C) HWIO; b*: (C,)."""
    B, H, W, C = x_nhwc.shape
    Cp = _round_up(C, LANE)
    cpad = Cp - C
    TH = _pick_strip_rows(H)
    n_strips = H // TH

    # Wrapper-side padding: 2-px spatial halo (covers both stacked 3x3 convs) +
    # lane-dense channels.  When stacking many ResidualBlockNoBN blocks, keep the
    # (B, H, W, Cp) padded layout between blocks and slice [..., :C] only at the
    # chain boundary to avoid per-block pad/slice HBM round trips.
    xp = jnp.pad(x_nhwc, ((0, 0), (2, 2), (2, 2), (0, cpad)))

    def prep_w(w):
        # (3, 3, C, C) HWIO -> row-grouped (3, 3*Cp, Cp) bf16
        wp = jnp.pad(w, ((0, 0), (0, 0), (0, cpad), (0, cpad)))
        return wp.reshape(3, 3 * Cp, Cp).astype(jnp.bfloat16)

    w1p, w2p = prep_w(w1), prep_w(w2)
    b1p = jnp.pad(b1, (0, cpad)).reshape(1, Cp).astype(jnp.float32)
    b2p = jnp.pad(b2, (0, cpad)).reshape(1, Cp).astype(jnp.float32)

    kernel = functools.partial(resblock_kernel, res_scale=float(res_scale))

    m1 = (TH + 2) * (W + 2)
    m2 = TH * W
    cost = pl.CostEstimate(
        flops=B * n_strips * 2 * 9 * Cp * Cp * (m1 + m2),
        transcendentals=0,
        bytes_accessed=(B * n_strips * (TH + 4) * (W + 4) * Cp * 4   # input strips
                        + B * H * W * Cp * 4                         # output
                        + w1p.size * 2 + w2p.size * 2
                        + b1p.size * 4 + b2p.size * 4),
    )

    # TODO(synk): for C << 128 (e.g. this C=16 test) the matmul K is zero-padded
    # from 9*C to 9*Cp; a layout folding a factor of W into the lane dim would
    # remove that waste (matters most on v5e's 128-wide MXU).
    out = pl.pallas_call(
        kernel,
        out_shape=jax.ShapeDtypeStruct((B, H, W, Cp), x_nhwc.dtype),
        grid_spec=pltpu.PrefetchScalarGridSpec(
            num_scalar_prefetch=0,
            grid=(B, n_strips),
            in_specs=[
                pl.BlockSpec(memory_space=pl.ANY),                       # x (HBM, manual DMA)
                pl.BlockSpec((3, 3 * Cp, Cp), lambda b, r: (0, 0, 0)),   # w1 (resident)
                pl.BlockSpec((1, Cp), lambda b, r: (0, 0)),              # b1
                pl.BlockSpec((3, 3 * Cp, Cp), lambda b, r: (0, 0, 0)),   # w2 (resident)
                pl.BlockSpec((1, Cp), lambda b, r: (0, 0)),              # b2
            ],
            out_specs=pl.BlockSpec((1, TH, W, Cp), lambda b, r: (b, r, 0, 0)),
            scratch_shapes=[
                pltpu.VMEM((2, TH + 4, W + 4, Cp), jnp.float32),  # double-buffered x strips
                pltpu.SemaphoreType.DMA((2,)),
            ],
        ),
        compiler_params=pltpu.CompilerParams(
            dimension_semantics=("parallel", "arbitrary"),
            vmem_limit_bytes=48 * 1024 * 1024,
        ),
        cost_estimate=cost,
    )(xp, w1p, b1p, w2p, b2p)

    return out[..., :C]


def _init_weights(key, num_feat, scale=0.1):
    """kaiming_normal_ (fan_in, gain=sqrt(2)) * scale, bias = 0 — matches
    default_init_weights([conv1, conv2], 0.1)."""
    k1, k2 = jax.random.split(key)
    fan_in = num_feat * 3 * 3
    std = (2.0 / fan_in) ** 0.5
    # PyTorch layout (Cout, Cin, Kh, Kw) -> kernel layout (Kh, Kw, Cin, Cout)
    w1_pt = jax.random.normal(k1, (num_feat, num_feat, 3, 3), jnp.float32) * std * scale
    w2_pt = jax.random.normal(k2, (num_feat, num_feat, 3, 3), jnp.float32) * std * scale
    w1 = jnp.transpose(w1_pt, (2, 3, 1, 0))
    w2 = jnp.transpose(w2_pt, (2, 3, 1, 0))
    b1 = jnp.zeros((num_feat,), jnp.float32)
    b2 = jnp.zeros((num_feat,), jnp.float32)
    return w1, b1, w2, b2


def _reference(x_nhwc, w1, b1, w2, b2, res_scale):
    """Pure-JAX f32 reference (same NHWC/HWIO convention)."""
    dn = jax.lax.conv_dimension_numbers(x_nhwc.shape, w1.shape,
                                        ("NHWC", "HWIO", "NHWC"))
    h = jax.lax.conv_general_dilated(x_nhwc, w1, (1, 1), "SAME",
                                     dimension_numbers=dn) + b1
    h = jnp.maximum(h, 0.0)
    h = jax.lax.conv_general_dilated(h, w2, (1, 1), "SAME",
                                     dimension_numbers=dn) + b2
    return x_nhwc + h * res_scale


if __name__ == "__main__":
    key = jax.random.PRNGKey(0)
    k_x, k_w = jax.random.split(key)

    B, C, H, W = 2, 16, 16, 16        # NCHW shape implied by the module
    res_scale = 1.0

    x_nchw = jax.random.normal(k_x, (B, C, H, W), jnp.float32)
    x_nhwc = jnp.transpose(x_nchw, (0, 2, 3, 1))   # kernel layout: NHWC

    w1, b1, w2, b2 = _init_weights(k_w, C, scale=0.1)

    out_nhwc = residual_block_nobn(x_nhwc, w1, b1, w2, b2, res_scale=res_scale)
    out_nhwc = jax.block_until_ready(out_nhwc)

    ref = _reference(x_nhwc, w1, b1, w2, b2, res_scale)
    assert out_nhwc.shape == (B, H, W, C)
    max_err = float(jnp.max(jnp.abs(out_nhwc - ref)))
    assert max_err < 2e-3, f"mismatch vs reference: max abs err {max_err}"

    # back to NCHW to match PyTorch output convention
    out_nchw = jnp.transpose(out_nhwc, (0, 3, 1, 2))
    jax.block_until_ready(out_nchw)

    print("KERNEL_OK")
</pallas_src>

<mosaic_0001>
module attributes {stable_mosaic.version = 11 : i64} {
  func.func @resblock_kernel(%arg0: i32, %arg1: i32, %arg2: memref<2x20x20x128xf32, #tpu.memory_space<any>>, %arg3: memref<3x384x128xbf16, #tpu.memory_space<vmem>>, %arg4: memref<1x128xf32, #tpu.memory_space<vmem>>, %arg5: memref<3x384x128xbf16, #tpu.memory_space<vmem>>, %arg6: memref<1x128xf32, #tpu.memory_space<vmem>>, %arg7: memref<1x8x16x128xf32, #tpu.memory_space<vmem>>, %arg8: memref<2x12x20x128xf32, #tpu.memory_space<vmem>>, %arg9: memref<2x!tpu.dma_semaphore, #tpu.memory_space<semaphore_mem>>) attributes {dimension_semantics = [#tpu.dimension_semantics<parallel>, #tpu.dimension_semantics<arbitrary>], iteration_bounds = array<i64: 2, 2>, scalar_prefetch = 0 : i64, scratch_operands = 2 : i64, tpu.core_type = #tpu.core_type<tc>, window_params = [{}, {pipeline_mode = #tpu.pipeline_mode<synchronous>, transform_indices = @transform_1, window_bounds = array<i64: 3, 384, 128>}, {pipeline_mode = #tpu.pipeline_mode<synchronous>, transform_indices = @transform_2, window_bounds = array<i64: 1, 128>}, {pipeline_mode = #tpu.pipeline_mode<synchronous>, transform_indices = @transform_3, window_bounds = array<i64: 3, 384, 128>}, {pipeline_mode = #tpu.pipeline_mode<synchronous>, transform_indices = @transform_4, window_bounds = array<i64: 1, 128>}, {transform_indices = @transform_5, window_bounds = array<i64: 1, 8, 16, 128>}]} {
    %c2_i32 = arith.constant 2 : i32
    %c0_i32 = arith.constant 0 : i32
    %0 = arith.cmpi eq, %c2_i32, %c0_i32 : i32
    %c1_i32 = arith.constant 1 : i32
    %1 = arith.select %0, %c1_i32, %c2_i32 : i32
    %2 = arith.remsi %arg1, %1 : i32
    %c0_i32_0 = arith.constant 0 : i32
    %3 = arith.cmpi ne, %2, %c0_i32_0 : i32
    %c0_i32_1 = arith.constant 0 : i32
    %4 = arith.cmpi slt, %2, %c0_i32_1 : i32
    %c0_i32_2 = arith.constant 0 : i32
    %5 = arith.cmpi slt, %1, %c0_i32_2 : i32
    %6 = arith.xori %4, %5 : i1
    %7 = arith.andi %6, %3 : i1
    %8 = arith.addi %2, %1 : i32
    %9 = arith.select %7, %8, %2 : i32
    %c0_i32_3 = arith.constant 0 : i32
    %10 = arith.cmpi eq, %arg1, %c0_i32_3 : i32
    %11 = arith.extui %10 : i1 to i32
    %c0_i32_4 = arith.constant 0 : i32
    %12 = arith.cmpi ne, %11, %c0_i32_4 : i32
    scf.if %12 {
      %c0_i32_52 = arith.constant 0 : i32
      %c0_i32_53 = arith.constant 0 : i32
      %c0_i32_54 = arith.constant 0 : i32
      %c0_i32_55 = arith.constant 0 : i32
      %c0_i32_56 = arith.constant 0 : i32
      %119 = tpu.memref_slice %arg2[%arg0, %c0_i32_54, %c0_i32_55, %c0_i32_56] : memref<2x20x20x128xf32, #tpu.memory_space<any>> -> memref<1x12x20x128xf32, #tpu.memory_space<any>>
      %120 = tpu.memref_squeeze %119 : memref<1x12x20x128xf32, #tpu.memory_space<any>> -> memref<12x20x128xf32, #tpu.memory_space<any>>
      %c0_i32_57 = arith.constant 0 : i32
      %c0_i32_58 = arith.constant 0 : i32
      %c0_i32_59 = arith.constant 0 : i32
      %121 = tpu.memref_slice %arg8[%c0_i32_52, %c0_i32_57, %c0_i32_58, %c0_i32_59] : memref<2x12x20x128xf32, #tpu.memory_space<vmem>> -> memref<1x12x20x128xf32, #tpu.memory_space<vmem>>
      %122 = tpu.memref_squeeze %121 : memref<1x12x20x128xf32, #tpu.memory_space<vmem>> -> memref<12x20x128xf32, #tpu.memory_space<vmem>>
      %123 = tpu.memref_slice %arg9[%c0_i32_53] : memref<2x!tpu.dma_semaphore, #tpu.memory_space<semaphore_mem>> -> memref<1x!tpu.dma_semaphore, #tpu.memory_space<semaphore_mem>>
      %124 = tpu.memref_squeeze %123 : memref<1x!tpu.dma_semaphore, #tpu.memory_space<semaphore_mem>> -> memref<!tpu.dma_semaphore, #tpu.memory_space<semaphore_mem>>
      tpu.enqueue_dma source(%120 : memref<12x20x128xf32, #tpu.memory_space<any>>) target(%122 : memref<12x20x128xf32, #tpu.memory_space<vmem>>) target_semaphore(%124 : memref<!tpu.dma_semaphore, #tpu.memory_space<semaphore_mem>>)
    } else {
    }
    %c8_i32 = arith.constant 8 : i32
    %13 = arith.muli %arg1, %c8_i32 : i32
    %c0_i32_5 = arith.constant 0 : i32
    %c0_i32_6 = arith.constant 0 : i32
    %14 = tpu.memref_slice %arg2[%arg0, %13, %c0_i32_5, %c0_i32_6] : memref<2x20x20x128xf32, #tpu.memory_space<any>> -> memref<1x12x20x128xf32, #tpu.memory_space<any>>
    %15 = tpu.memref_squeeze %14 : memref<1x12x20x128xf32, #tpu.memory_space<any>> -> memref<12x20x128xf32, #tpu.memory_space<any>>
    %c0_i32_7 = arith.constant 0 : i32
    %c0_i32_8 = arith.constant 0 : i32
    %c0_i32_9 = arith.constant 0 : i32
    %16 = tpu.memref_slice %arg8[%9, %c0_i32_7, %c0_i32_8, %c0_i32_9] : memref<2x12x20x128xf32, #tpu.memory_space<vmem>> -> memref<1x12x20x128xf32, #tpu.memory_space<vmem>>
    %17 = tpu.memref_squeeze %16 : memref<1x12x20x128xf32, #tpu.memory_space<vmem>> -> memref<12x20x128xf32, #tpu.memory_space<vmem>>
    %18 = tpu.memref_slice %arg9[%9] : memref<2x!tpu.dma_semaphore, #tpu.memory_space<semaphore_mem>> -> memref<1x!tpu.dma_semaphore, #tpu.memory_space<semaphore_mem>>
    %19 = tpu.memref_squeeze %18 : memref<1x!tpu.dma_semaphore, #tpu.memory_space<semaphore_mem>> -> memref<!tpu.dma_semaphore, #tpu.memory_space<semaphore_mem>>
    tpu.wait_dma2 semaphore(%19 : memref<!tpu.dma_semaphore, #tpu.memory_space<semaphore_mem>>) src(%15 : memref<12x20x128xf32, #tpu.memory_space<any>>) dst(%17 : memref<12x20x128xf32, #tpu.memory_space<vmem>>)
    %c1_i32_10 = arith.constant 1 : i32
    %20 = arith.addi %arg1, %c1_i32_10 : i32
    %c2_i32_11 = arith.constant 2 : i32
    %21 = arith.cmpi slt, %20, %c2_i32_11 : i32
    %22 = arith.extui %21 : i1 to i32
    %c0_i32_12 = arith.constant 0 : i32
    %23 = arith.cmpi ne, %22, %c0_i32_12 : i32
    scf.if %23 {
      %c1_i32_52 = arith.constant 1 : i32
      %119 = arith.addi %arg1, %c1_i32_52 : i32
      %c1_i32_53 = arith.constant 1 : i32
      %120 = arith.subi %c1_i32_53, %9 : i32
      %c8_i32_54 = arith.constant 8 : i32
      %121 = arith.muli %119, %c8_i32_54 : i32
      %c0_i32_55 = arith.constant 0 : i32
      %c0_i32_56 = arith.constant 0 : i32
      %122 = tpu.memref_slice %arg2[%arg0, %121, %c0_i32_55, %c0_i32_56] : memref<2x20x20x128xf32, #tpu.memory_space<any>> -> memref<1x12x20x128xf32, #tpu.memory_space<any>>
      %123 = tpu.memref_squeeze %122 : memref<1x12x20x128xf32, #tpu.memory_space<any>> -> memref<12x20x128xf32, #tpu.memory_space<any>>
      %c0_i32_57 = arith.constant 0 : i32
      %c0_i32_58 = arith.constant 0 : i32
      %c0_i32_59 = arith.constant 0 : i32
      %124 = tpu.memref_slice %arg8[%120, %c0_i32_57, %c0_i32_58, %c0_i32_59] : memref<2x12x20x128xf32, #tpu.memory_space<vmem>> -> memref<1x12x20x128xf32, #tpu.memory_space<vmem>>
      %125 = tpu.memref_squeeze %124 : memref<1x12x20x128xf32, #tpu.memory_space<vmem>> -> memref<12x20x128xf32, #tpu.memory_space<vmem>>
      %126 = tpu.memref_slice %arg9[%120] : memref<2x!tpu.dma_semaphore, #tpu.memory_space<semaphore_mem>> -> memref<1x!tpu.dma_semaphore, #tpu.memory_space<semaphore_mem>>
      %127 = tpu.memref_squeeze %126 : memref<1x!tpu.dma_semaphore, #tpu.memory_space<semaphore_mem>> -> memref<!tpu.dma_semaphore, #tpu.memory_space<semaphore_mem>>
      tpu.enqueue_dma source(%123 : memref<12x20x128xf32, #tpu.memory_space<any>>) target(%125 : memref<12x20x128xf32, #tpu.memory_space<vmem>>) target_semaphore(%127 : memref<!tpu.dma_semaphore, #tpu.memory_space<semaphore_mem>>)
    } else {
    }
    %24 = arith.index_cast %9 : i32 to index
    %c0 = arith.constant 0 : index
    %c0_13 = arith.constant 0 : index
    %c0_14 = arith.constant 0 : index
    %25 = vector.load %arg8[%24, %c0, %c0_13, %c0_14] : memref<2x12x20x128xf32, #tpu.memory_space<vmem>>, vector<1x12x20x128xf32>
    %26 = vector.shape_cast %25 : vector<1x12x20x128xf32> to vector<12x20x128xf32>
    %27 = arith.truncf %26 : vector<12x20x128xf32> to vector<12x20x128xbf16>
    %28 = vector.extract_strided_slice %27 {offsets = [0, 0, 0], sizes = [10, 18, 128], strides = [1, 1, 1]} : vector<12x20x128xbf16> to vector<10x18x128xbf16>
    %29 = vector.extract_strided_slice %27 {offsets = [0, 1, 0], sizes = [10, 18, 128], strides = [1, 1, 1]} : vector<12x20x128xbf16> to vector<10x18x128xbf16>
    %30 = vector.extract_strided_slice %27 {offsets = [0, 2, 0], sizes = [10, 18, 128], strides = [1, 1, 1]} : vector<12x20x128xbf16> to vector<10x18x128xbf16>
    %31 = tpu.concatenate %28, %29, %30 in 2 : vector<10x18x128xbf16>, vector<10x18x128xbf16>, vector<10x18x128xbf16> -> vector<10x18x384xbf16>
    %32 = vector.shape_cast %31 : vector<10x18x384xbf16> to vector<180x384xbf16>
    %c0_15 = arith.constant 0 : index
    %c0_16 = arith.constant 0 : index
    %c0_17 = arith.constant 0 : index
    %33 = vector.load %arg3[%c0_15, %c0_16, %c0_17] : memref<3x384x128xbf16, #tpu.memory_space<vmem>>, vector<1x384x128xbf16>
    %34 = vector.shape_cast %33 : vector<1x384x128xbf16> to vector<384x128xbf16>
    %cst = arith.constant dense<0.000000e+00> : vector<180x128xf32>
    %35 = tpu.matmul %32, %34, %cst {dimension_numbers = #tpu.dot_dimension_numbers<[1], [0], [0], [1], [0, 0, 1, 1], [], []>} : vector<180x384xbf16>, vector<384x128xbf16>, vector<180x128xf32> -> vector<180x128xf32>
    %36 = vector.extract_strided_slice %27 {offsets = [1, 0, 0], sizes = [10, 18, 128], strides = [1, 1, 1]} : vector<12x20x128xbf16> to vector<10x18x128xbf16>
    %37 = vector.extract_strided_slice %27 {offsets = [1, 1, 0], sizes = [10, 18, 128], strides = [1, 1, 1]} : vector<12x20x128xbf16> to vector<10x18x128xbf16>
    %38 = vector.extract_strided_slice %27 {offsets = [1, 2, 0], sizes = [10, 18, 128], strides = [1, 1, 1]} : vector<12x20x128xbf16> to vector<10x18x128xbf16>
    %39 = tpu.concatenate %36, %37, %38 in 2 : vector<10x18x128xbf16>, vector<10x18x128xbf16>, vector<10x18x128xbf16> -> vector<10x18x384xbf16>
    %40 = vector.shape_cast %39 : vector<10x18x384xbf16> to vector<180x384xbf16>
    %c1 = arith.constant 1 : index
    %c0_18 = arith.constant 0 : index
    %c0_19 = arith.constant 0 : index
    %41 = vector.load %arg3[%c1, %c0_18, %c0_19] : memref<3x384x128xbf16, #tpu.memory_space<vmem>>, vector<1x384x128xbf16>
    %42 = vector.shape_cast %41 : vector<1x384x128xbf16> to vector<384x128xbf16>
    %cst_20 = arith.constant dense<0.000000e+00> : vector<180x128xf32>
    %43 = tpu.matmul %40, %42, %cst_20 {dimension_numbers = #tpu.dot_dimension_numbers<[1], [0], [0], [1], [0, 0, 1, 1], [], []>} : vector<180x384xbf16>, vector<384x128xbf16>, vector<180x128xf32> -> vector<180x128xf32>
    %44 = arith.addf %35, %43 : vector<180x128xf32>
    %45 = vector.extract_strided_slice %27 {offsets = [2, 0, 0], sizes = [10, 18, 128], strides = [1, 1, 1]} : vector<12x20x128xbf16> to vector<10x18x128xbf16>
    %46 = vector.extract_strided_slice %27 {offsets = [2, 1, 0], sizes = [10, 18, 128], strides = [1, 1, 1]} : vector<12x20x128xbf16> to vector<10x18x128xbf16>
    %47 = vector.extract_strided_slice %27 {offsets = [2, 2, 0], sizes = [10, 18, 128], strides = [1, 1, 1]} : vector<12x20x128xbf16> to vector<10x18x128xbf16>
    %48 = tpu.concatenate %45, %46, %47 in 2 : vector<10x18x128xbf16>, vector<10x18x128xbf16>, vector<10x18x128xbf16> -> vector<10x18x384xbf16>
    %49 = vector.shape_cast %48 : vector<10x18x384xbf16> to vector<180x384xbf16>
    %c2 = arith.constant 2 : index
    %c0_21 = arith.constant 0 : index
    %c0_22 = arith.constant 0 : index
    %50 = vector.load %arg3[%c2, %c0_21, %c0_22] : memref<3x384x128xbf16, #tpu.memory_space<vmem>>, vector<1x384x128xbf16>
    %51 = vector.shape_cast %50 : vector<1x384x128xbf16> to vector<384x128xbf16>
    %cst_23 = arith.constant dense<0.000000e+00> : vector<180x128xf32>
    %52 = tpu.matmul %49, %51, %cst_23 {dimension_numbers = #tpu.dot_dimension_numbers<[1], [0], [0], [1], [0, 0, 1, 1], [], []>} : vector<180x384xbf16>, vector<384x128xbf16>, vector<180x128xf32> -> vector<180x128xf32>
    %53 = arith.addf %44, %52 : vector<180x128xf32>
    %54 = vector.shape_cast %53 : vector<180x128xf32> to vector<10x18x128xf32>
    %c0_24 = arith.constant 0 : index
    %c0_25 = arith.constant 0 : index
    %55 = vector.load %arg4[%c0_24, %c0_25] : memref<1x128xf32, #tpu.memory_space<vmem>>, vector<1x128xf32>
    %56 = vector.shape_cast %55 : vector<1x128xf32> to vector<1x1x128xf32>
    %57 = vector.broadcast %56 : vector<1x1x128xf32> to vector<10x18x128xf32>
    %58 = arith.addf %54, %57 : vector<10x18x128xf32>
    %cst_26 = arith.constant 0.000000e+00 : f32
    %59 = vector.broadcast %cst_26 : f32 to vector<10x18x128xf32>
    %60 = arith.maximumf %58, %59 : vector<10x18x128xf32>
    %61 = tpu.iota {dimensions = array<i32: 0>} : vector<10x18x128xi32>
    %62 = tpu.iota {dimensions = array<i32: 1>} : vector<10x18x128xi32>
    %c8_i32_27 = arith.constant 8 : i32
    %63 = arith.muli %arg1, %c8_i32_27 : i32
    %c1_i32_28 = arith.constant 1 : i32
    %64 = arith.subi %63, %c1_i32_28 : i32
    %65 = vector.broadcast %64 : i32 to vector<10x18x128xi32>
    %66 = arith.addi %61, %65 : vector<10x18x128xi32>
    %c0_i32_29 = arith.constant 0 : i32
    %67 = vector.broadcast %c0_i32_29 : i32 to vector<10x18x128xi32>
    %68 = arith.cmpi sge, %66, %67 : vector<10x18x128xi32>
    %c16_i32 = arith.constant 16 : i32
    %69 = vector.broadcast %c16_i32 : i32 to vector<10x18x128xi32>
    %70 = arith.cmpi slt, %66, %69 : vector<10x18x128xi32>
    %71 = arith.andi %68, %70 : vector<10x18x128xi1>
    %c1_i32_30 = arith.constant 1 : i32
    %72 = vector.broadcast %c1_i32_30 : i32 to vector<10x18x128xi32>
    %73 = arith.cmpi sge, %62, %72 : vector<10x18x128xi32>
    %74 = arith.andi %71, %73 : vector<10x18x128xi1>
    %c16_i32_31 = arith.constant 16 : i32
    %75 = vector.broadcast %c16_i32_31 : i32 to vector<10x18x128xi32>
    %76 = arith.cmpi sle, %62, %75 : vector<10x18x128xi32>
    %77 = arith.andi %74, %76 : vector<10x18x128xi1>
    %cst_32 = arith.constant 0.000000e+00 : f32
    %78 = vector.broadcast %cst_32 : f32 to vector<10x18x128xf32>
    %79 = arith.select %77, %60, %78 : vector<10x18x128xi1>, vector<10x18x128xf32>
    %80 = arith.truncf %79 : vector<10x18x128xf32> to vector<10x18x128xbf16>
    %81 = vector.extract_strided_slice %80 {offsets = [0, 0, 0], sizes = [8, 16, 128], strides = [1, 1, 1]} : vector<10x18x128xbf16> to vector<8x16x128xbf16>
    %82 = vector.extract_strided_slice %80 {offsets = [0, 1, 0], sizes = [8, 16, 128], strides = [1, 1, 1]} : vector<10x18x128xbf16> to vector<8x16x128xbf16>
    %83 = vector.extract_strided_slice %80 {offsets = [0, 2, 0], sizes = [8, 16, 128], strides = [1, 1, 1]} : vector<10x18x128xbf16> to vector<8x16x128xbf16>
    %84 = tpu.concatenate %81, %82, %83 in 2 : vector<8x16x128xbf16>, vector<8x16x128xbf16>, vector<8x16x128xbf16> -> vector<8x16x384xbf16>
    %85 = vector.shape_cast %84 : vector<8x16x384xbf16> to vector<128x384xbf16>
    %c0_33 = arith.constant 0 : index
    %c0_34 = arith.constant 0 : index
    %c0_35 = arith.constant 0 : index
    %86 = vector.load %arg5[%c0_33, %c0_34, %c0_35] : memref<3x384x128xbf16, #tpu.memory_space<vmem>>, vector<1x384x128xbf16>
    %87 = vector.shape_cast %86 : vector<1x384x128xbf16> to vector<384x128xbf16>
    %cst_36 = arith.constant dense<0.000000e+00> : vector<128x128xf32>
    %88 = tpu.matmul %85, %87, %cst_36 {dimension_numbers = #tpu.dot_dimension_numbers<[1], [0], [0], [1], [0, 0, 1, 1], [], []>} : vector<128x384xbf16>, vector<384x128xbf16>, vector<128x128xf32> -> vector<128x128xf32>
    %89 = vector.extract_strided_slice %80 {offsets = [1, 0, 0], sizes = [8, 16, 128], strides = [1, 1, 1]} : vector<10x18x128xbf16> to vector<8x16x128xbf16>
    %90 = vector.extract_strided_slice %80 {offsets = [1, 1, 0], sizes = [8, 16, 128], strides = [1, 1, 1]} : vector<10x18x128xbf16> to vector<8x16x128xbf16>
    %91 = vector.extract_strided_slice %80 {offsets = [1, 2, 0], sizes = [8, 16, 128], strides = [1, 1, 1]} : vector<10x18x128xbf16> to vector<8x16x128xbf16>
    %92 = tpu.concatenate %89, %90, %91 in 2 : vector<8x16x128xbf16>, vector<8x16x128xbf16>, vector<8x16x128xbf16> -> vector<8x16x384xbf16>
    %93 = vector.shape_cast %92 : vector<8x16x384xbf16> to vector<128x384xbf16>
    %c1_37 = arith.constant 1 : index
    %c0_38 = arith.constant 0 : index
    %c0_39 = arith.constant 0 : index
    %94 = vector.load %arg5[%c1_37, %c0_38, %c0_39] : memref<3x384x128xbf16, #tpu.memory_space<vmem>>, vector<1x384x128xbf16>
    %95 = vector.shape_cast %94 : vector<1x384x128xbf16> to vector<384x128xbf16>
    %cst_40 = arith.constant dense<0.000000e+00> : vector<128x128xf32>
    %96 = tpu.matmul %93, %95, %cst_40 {dimension_numbers = #tpu.dot_dimension_numbers<[1], [0], [0], [1], [0, 0, 1, 1], [], []>} : vector<128x384xbf16>, vector<384x128xbf16>, vector<128x128xf32> -> vector<128x128xf32>
    %97 = arith.addf %88, %96 : vector<128x128xf32>
    %98 = vector.extract_strided_slice %80 {offsets = [2, 0, 0], sizes = [8, 16, 128], strides = [1, 1, 1]} : vector<10x18x128xbf16> to vector<8x16x128xbf16>
    %99 = vector.extract_strided_slice %80 {offsets = [2, 1, 0], sizes = [8, 16, 128], strides = [1, 1, 1]} : vector<10x18x128xbf16> to vector<8x16x128xbf16>
    %100 = vector.extract_strided_slice %80 {offsets = [2, 2, 0], sizes = [8, 16, 128], strides = [1, 1, 1]} : vector<10x18x128xbf16> to vector<8x16x128xbf16>
    %101 = tpu.concatenate %98, %99, %100 in 2 : vector<8x16x128xbf16>, vector<8x16x128xbf16>, vector<8x16x128xbf16> -> vector<8x16x384xbf16>
    %102 = vector.shape_cast %101 : vector<8x16x384xbf16> to vector<128x384xbf16>
    %c2_41 = arith.constant 2 : index
    %c0_42 = arith.constant 0 : index
    %c0_43 = arith.constant 0 : index
    %103 = vector.load %arg5[%c2_41, %c0_42, %c0_43] : memref<3x384x128xbf16, #tpu.memory_space<vmem>>, vector<1x384x128xbf16>
    %104 = vector.shape_cast %103 : vector<1x384x128xbf16> to vector<384x128xbf16>
    %cst_44 = arith.constant dense<0.000000e+00> : vector<128x128xf32>
    %105 = tpu.matmul %102, %104, %cst_44 {dimension_numbers = #tpu.dot_dimension_numbers<[1], [0], [0], [1], [0, 0, 1, 1], [], []>} : vector<128x384xbf16>, vector<384x128xbf16>, vector<128x128xf32> -> vector<128x128xf32>
    %106 = arith.addf %97, %105 : vector<128x128xf32>
    %107 = vector.shape_cast %106 : vector<128x128xf32> to vector<8x16x128xf32>
    %c0_45 = arith.constant 0 : index
    %c0_46 = arith.constant 0 : index
    %108 = vector.load %arg6[%c0_45, %c0_46] : memref<1x128xf32, #tpu.memory_space<vmem>>, vector<1x128xf32>
    %109 = vector.shape_cast %108 : vector<1x128xf32> to vector<1x1x128xf32>
    %110 = vector.broadcast %109 : vector<1x1x128xf32> to vector<8x16x128xf32>
    %111 = arith.addf %107, %110 : vector<8x16x128xf32>
    %112 = vector.extract_strided_slice %26 {offsets = [2, 2, 0], sizes = [8, 16, 128], strides = [1, 1, 1]} : vector<12x20x128xf32> to vector<8x16x128xf32>
    %cst_47 = arith.constant 1.000000e+00 : f32
    %113 = vector.broadcast %cst_47 : f32 to vector<8x16x128xf32>
    %114 = arith.mulf %111, %113 : vector<8x16x128xf32>
    %115 = arith.addf %112, %114 : vector<8x16x128xf32>
    %c0_48 = arith.constant 0 : index
    %c0_49 = arith.constant 0 : index
    %c0_50 = arith.constant 0 : index
    %c0_51 = arith.constant 0 : index
    %116 = vector.load %arg7[%c0_48, %c0_49, %c0_50, %c0_51] : memref<1x8x16x128xf32, #tpu.memory_space<vmem>>, vector<1x8x16x128xf32>
    %117 = vector.shape_cast %116 : vector<1x8x16x128xf32> to vector<8x16x128xf32>
    %118 = vector.shape_cast %115 : vector<8x16x128xf32> to vector<1x8x16x128xf32>
    tpu.vector_store %arg7[%c0_48, %c0_49, %c0_50, %c0_51], %118 {strides = array<i32>} : memref<1x8x16x128xf32, #tpu.memory_space<vmem>>, vector<1x8x16x128xf32>,
    return
  }
  func.func @transform_1(%arg0: i32, %arg1: i32) -> (i32, i32, i32) {
    %c0_i32 = arith.constant 0 : i32
    %c0_i32_0 = arith.constant 0 : i32
    %c0_i32_1 = arith.constant 0 : i32
    %c0_i32_2 = arith.constant 0 : i32
    return %c0_i32, %c0_i32_0, %c0_i32_1 : i32, i32, i32
  }
  func.func @transform_2(%arg0: i32, %arg1: i32) -> (i32, i32) {
    %c0_i32 = arith.constant 0 : i32
    %c0_i32_0 = arith.constant 0 : i32
    %c0_i32_1 = arith.constant 0 : i32
    return %c0_i32, %c0_i32_0 : i32, i32
  }
  func.func @transform_3(%arg0: i32, %arg1: i32) -> (i32, i32, i32) {
    %c0_i32 = arith.constant 0 : i32
    %c0_i32_0 = arith.constant 0 : i32
    %c0_i32_1 = arith.constant 0 : i32
    %c0_i32_2 = arith.constant 0 : i32
    return %c0_i32, %c0_i32_0, %c0_i32_1 : i32, i32, i32
  }
  func.func @transform_4(%arg0: i32, %arg1: i32) -> (i32, i32) {
    %c0_i32 = arith.constant 0 : i32
    %c0_i32_0 = arith.constant 0 : i32
    %c0_i32_1 = arith.constant 0 : i32
    return %c0_i32, %c0_i32_0 : i32, i32
  }
  func.func @transform_5(%arg0: i32, %arg1: i32) -> (i32, i32, i32, i32) {
    %c0_i32 = arith.constant 0 : i32
    %c0_i32_0 = arith.constant 0 : i32
    %c0_i32_1 = arith.constant 0 : i32
    return %arg0, %arg1, %c0_i32, %c0_i32_0 : i32, i32, i32, i32
  }
}

</mosaic_0001>

<bundles_post_ra>
// kernel: tpu_custom_call.1
= control target key start
LH: loop header
LB: loop body
LE: loop exit
PB: predicated region body
PF: predicated region fallthrough
CT: control target
= control target key end

     0   :  { %10 = vsyncpa [#allocation5], 0  ;;  %s14109_s0 = inlined_call_operand.vmem [shape: f32[2,20,20,128], index: 0, kind: input, shape index: {}]   ;;  %s14110_s1 = inlined_call_operand.vmem [shape: bf16[3,384,128], index: 1, kind: input, shape index: {}]   ;;  %s14111_s2 = inlined_call_operand.vmem [shape: f32[1,128], index: 2, kind: input, shape index: {}]   ;;  %s14112_s3 = inlined_call_operand.vmem [shape: bf16[3,384,128], index: 3, kind: input, shape index: {}]   ;;  %s14113_s4 = inlined_call_operand.vmem [shape: f32[1,128], index: 4, kind: input, shape index: {}]   ;;  %s14114_s5 = inlined_call_operand.hbm [shape: f32[2,16,16,128], index: 5, kind: output, shape index: {}]  }
   0x1   :  { %12 = vsyncpa [#allocation5 + $0x1], 0  ;;  %s10092_s18 = smov 0   ;;  %s10094_s19 = smov 0  }
   0x2   :  { %s10096_s20 = smov 0   ;;  %s10098_s21 = smov 0  }
   0x3   :  { %s10100_s22 = smov 0   ;;  %s10102_s23 = smov 0  }
   0x4   :  { %s10104_s24 = smov 0   ;;  %s10106_s25 = smov 0  }
   0x5 LB: > { %s8410_s26 = sadd.s32 4294967295, %s10055_s25   ;;  %s8411_s27 = sadd.s32 4294967294, %s10055_s25   ;;  %s10055_s25 = sphi %s10106_s25, %s18_s25   ;;  %s10051_s24 = sphi %s10104_s24, %s14488_s24   ;;  %s10047_s23 = sphi %s10102_s23, %s14487_s23   ;;  %s10043_s22 = sphi %s10100_s22, %s14486_s22   ;;  %s10039_s21 = sphi %s10098_s21, %s14485_s21   ;;  %s10035_s20 = sphi %s10096_s20, %s14484_s20   ;;  %s10031_s19 = sphi %s10094_s19, %s14483_s19   ;;  %s10027_s18 = sphi %s10092_s18, %s14482_s18  }
   0x6   : > { %s27_s28 = sadd.s32 1, %s10047_s23  ;;  %s30_s29 = sadd.s32 1, %s10051_s24 }
   0x7   : > { %p28_p0 = scmp.ge.s32.totalorder %s27_s28, 2  ;;  %p133_p1 = scmp.ne.s32.totalorder %s10035_s20, %s10031_s19 }
   0x8   : > { %p134_p2 = scmp.eq.s32.totalorder %s8410_s26, 3  ;;  %p139_p5 = scmp.ne.s32.totalorder %s10031_s19, %s10027_s18 }
   0x9   : > { %s14490_s28 = smov (%p28_p0, %s27_s28), 0  ;;  %s14492_s29 = smov (!%p28_p0, %s30_s29), %s10051_s24 }
   0xa   : > { %s119_s30 = ssub.s32 %s10047_s23, %s14490_s28  ;;  %p10143_p3 = por %p134_p2, %p133_p1 }
   0xb   : > { %p32_p4 = scmp.ge.s32.totalorder %s14492_s29, 2  ;;  %p140_p6 = scmp.eq.s32.totalorder %s8411_s27, 3 }
   0xc   : > { %p8413_p7 = scmp.ge.s32.totalorder %s10055_s25, 1  ;;  %p170_p9 = scmp.lt.s32.totalorder %s10055_s25, 5 }
   0xd   : > { %s14494_s29 = smov (%p32_p4, %s14492_s29), 0  ;;  %p10152_p8 = por %p140_p6, %p139_p5 }
   0xe   : > { %14215 = sst [smem:[#allocation10_spill]] %s14494_s29  ;;  %s118_s8 = ssub.s32 %s10051_s24, %s14494_s29 }
   0xf   : > { %s123_s9 = sadd.s32 1, %s10035_s20  ;;  %s120_s10 = sor.u32 %s119_s30, %s118_s8 }
  0x10   : > { %p171_p10 = pnand %p8413_p7, %p170_p9  ;;  %p121_p11 = scmp.eq.s32.totalorder %s120_s10, 0 }
  0x12   : > { %s10161_s11 = scalar_select %p121_p11, %s10035_s20, %s123_s9  }
  0x13   : > { %174 = sbr.rel (%p171_p10) target bundleno = 1051 (0x41b), region = 36 }
  0x18   : > { %s14115_s12 = sand.u32 1, %s10031_s19   ;;  %p193_p12 = scmp.lt.s32.totalorder %s10039_s21, 0 }
  0x19   : > { %s8414_s13 = sshll.u32 %s14115_s12, 7  ;;  %s194_s14 = ssub.s32 0, %s10039_s21 }
  0x1a   : > { %s8415_s15 = smin.u32 %s10039_s21, %s194_s14  ;;  %s10171_s27 = scalar_lea.vmem [#allocation4], %s8414_s13 }
  0x1b   : > { %s196_s16 = sand.u32 1, %s8415_s15   ;;  %p8418_p0 = scmp.ne.s32.totalorder %s10039_s21, 0 }
  0x1c   : > { %s197_s17 = ssub.s32 0, %s196_s16  ;;  %s209_s30 = smul.u32 (!%p8418_p0), 480, %s10043_s22 }
  0x1d   : > { %s14496_s17 = smov (!%p193_p12, %s197_s17), %s196_s16  ;;  %208 = sbr.rel (%p8418_p0) target bundleno = 56 (0x38), region = 40 }
  0x1e   : > { %p8417_p13 = scmp.lt.s32.totalorder %s14496_s17, 0  ;;  %s203_s26 = sadd.s32 2, %s14496_s17 }
  0x1f   : > { %s10178_s10 = scalar_lea.vmem (!%p8418_p0), %s14109_s0, %s209_s30 }
  0x20   : > { %s14498_s26 = smov (!%p8417_p13, %s203_s26), %s14496_s17 }
  0x22   : > { %v271_v0 = vld [vmem:[%s10178_s10] sm:$0xff]  ;;  %v273_v1 = vld [vmem:[%s10178_s10 + $0x8] sm:$0xff]  ;;  %v275_v2 = vld [vmem:[%s10178_s10 + $0x18] sm:$0xff] }
  0x23   : > { %272 = vst [vmem:[#allocation2] sm:$0xff] %v271_v0  ;;  %274 = vst [vmem:[#allocation2 + $0x8] sm:$0xff] %v273_v1  ;;  %v277_v3 = vld [vmem:[%s10178_s10 + $0x20] sm:$0xff]  ;;  %v279_v4 = vld [vmem:[%s10178_s10 + $0x30] sm:$0xff] }
  0x24   : > { %276 = vst [vmem:[#allocation2 + $0x18] sm:$0xff] %v275_v2  ;;  %v281_v5 = vld [vmem:[%s10178_s10 + $0x38] sm:$0xff]  ;;  %278 = vst [vmem:[#allocation2 + $0x20] sm:$0xff] %v277_v3  ;;  %v283_v6 = vld [vmem:[%s10178_s10 + $0x48] sm:$0xff] }
  0x25   : > { %280 = vst [vmem:[#allocation2 + $0x30] sm:$0xff] %v279_v4  ;;  %282 = vst [vmem:[#allocation2 + $0x38] sm:$0xff] %v281_v5  ;;  %v285_v7 = vld [vmem:[%s10178_s10 + $0x50] sm:$0xff]  ;;  %v287_v8 = vld [vmem:[%s10178_s10 + $0x60] sm:$0xff] }
  0x26   : > { %284 = vst [vmem:[#allocation2 + $0x48] sm:$0xff] %v283_v6  ;;  %286 = vst [vmem:[#allocation2 + $0x50] sm:$0xff] %v285_v7  ;;  %v289_v9 = vld [vmem:[%s10178_s10 + $0x68] sm:$0xff]  ;;  %v291_v10 = vld [vmem:[%s10178_s10 + $0x78] sm:$0xff] }
  0x27   : > { %288 = vst [vmem:[#allocation2 + $0x60] sm:$0xff] %v287_v8  ;;  %v293_v11 = vld [vmem:[%s10178_s10 + $0x80] sm:$0xff]  ;;  %290 = vst [vmem:[#allocation2 + $0x68] sm:$0xff] %v289_v9  ;;  %v295_v12 = vld [vmem:[%s10178_s10 + $0x90] sm:$0xff] }
  0x28   : > { %292 = vst [vmem:[#allocation2 + $0x78] sm:$0xff] %v291_v10  ;;  %294 = vst [vmem:[#allocation2 + $0x80] sm:$0xff] %v293_v11  ;;  %v297_v13 = vld [vmem:[%s10178_s10 + $0x98] sm:$0xff]  ;;  %v299_v14 = vld [vmem:[%s10178_s10 + $0xa8] sm:$0xff] }
  0x29   : > { %296 = vst [vmem:[#allocation2 + $0x90] sm:$0xff] %v295_v12  ;;  %298 = vst [vmem:[#allocation2 + $0x98] sm:$0xff] %v297_v13  ;;  %v301_v15 = vld [vmem:[%s10178_s10 + $0xb0] sm:$0xff]  ;;  %v303_v16 = vld [vmem:[%s10178_s10 + $0xc0] sm:$0xff] }
  0x2a   : > { %300 = vst [vmem:[#allocation2 + $0xa8] sm:$0xff] %v299_v14  ;;  %v305_v17 = vld [vmem:[%s10178_s10 + $0xc8] sm:$0xff]  ;;  %302 = vst [vmem:[#allocation2 + $0xb0] sm:$0xff] %v301_v15  ;;  %v307_v18 = vld [vmem:[%s10178_s10 + $0xd8] sm:$0xff] }
  0x2b   : > { %304 = vst [vmem:[#allocation2 + $0xc0] sm:$0xff] %v303_v16  ;;  %306 = vst [vmem:[#allocation2 + $0xc8] sm:$0xff] %v305_v17  ;;  %v309_v19 = vld [vmem:[%s10178_s10 + $0xe0] sm:$0xff]  ;;  %v311_v20 = vld [vmem:[%s10178_s10 + $0xf0] sm:$0xff] }
  0x2c   : > { %308 = vst [vmem:[#allocation2 + $0xd8] sm:$0xff] %v307_v18  ;;  %310 = vst [vmem:[#allocation2 + $0xe0] sm:$0xff] %v309_v19  ;;  %v313_v21 = vld [vmem:[%s10178_s10 + $0xf8] sm:$0xff]  ;;  %v315_v22 = vld [vmem:[%s10178_s10 + $0x108] sm:$0xff] }
  0x2d   : > { %312 = vst [vmem:[#allocation2 + $0xf0] sm:$0xff] %v311_v20  ;;  %v317_v23 = vld [vmem:[%s10178_s10 + $0x110] sm:$0xff]  ;;  %314 = vst [vmem:[#allocation2 + $0xf8] sm:$0xff] %v313_v21  ;;  %v8420_v25 = vld [vmem:[%s10178_s10 + $0x28] sm:$0xf] }
  0x2e   : > { %316 = vst [vmem:[#allocation2 + $0x108] sm:$0xff] %v315_v22  ;;  %318 = vst [vmem:[#allocation2 + $0x110] sm:$0xff] %v317_v23  ;;  %v8419_v24 = vld [vmem:[%s10178_s10 + $0x10] sm:$0xf]  ;;  %v8421_v26 = vld [vmem:[%s10178_s10 + $0x40] sm:$0xf] }
  0x2f   : > { %330 = vst [vmem:[#allocation2 + $0x10] sm:$0xf] %v8419_v24  ;;  %332 = vst [vmem:[#allocation2 + $0x28] sm:$0xf] %v8420_v25  ;;  %v8422_v27 = vld [vmem:[%s10178_s10 + $0x58] sm:$0xf] }
  0x30   : > { %334 = vst [vmem:[#allocation2 + $0x40] sm:$0xf] %v8421_v26  ;;  %v8423_v28 = vld [vmem:[%s10178_s10 + $0x70] sm:$0xf]  ;;  %v8424_v29 = vld [vmem:[%s10178_s10 + $0x88] sm:$0xf] }
  0x31   : > { %336 = vst [vmem:[#allocation2 + $0x58] sm:$0xf] %v8422_v27  ;;  %338 = vst [vmem:[#allocation2 + $0x70] sm:$0xf] %v8423_v28  ;;  %v8425_v30 = vld [vmem:[%s10178_s10 + $0xa0] sm:$0xf] }
  0x32   : > { %340 = vst [vmem:[#allocation2 + $0x88] sm:$0xf] %v8424_v29  ;;  %v8426_v31 = vld [vmem:[%s10178_s10 + $0xb8] sm:$0xf]  ;;  %v8427_v32 = vld [vmem:[%s10178_s10 + $0xd0] sm:$0xf] }
  0x33   : > { %342 = vst [vmem:[#allocation2 + $0xa0] sm:$0xf] %v8425_v30  ;;  %344 = vst [vmem:[#allocation2 + $0xb8] sm:$0xf] %v8426_v31  ;;  %v8428_v33 = vld [vmem:[%s10178_s10 + $0xe8] sm:$0xf] }
  0x34   : > { %346 = vst [vmem:[#allocation2 + $0xd0] sm:$0xf] %v8427_v32  ;;  %v8429_v34 = vld [vmem:[%s10178_s10 + $0x100] sm:$0xf]  ;;  %v8430_v35 = vld [vmem:[%s10178_s10 + $0x118] sm:$0xf] }
  0x35   : > { %348 = vst [vmem:[#allocation2 + $0xe8] sm:$0xf] %v8428_v33  ;;  %350 = vst [vmem:[#allocation2 + $0x100] sm:$0xf] %v8429_v34 }
  0x36   : > { %352 = vst [vmem:[#allocation2 + $0x118] sm:$0xf] %v8430_v35 }
  0x37   : > { %356 = vsyncadd [#allocation3], 3840 }
  0x38 PF: > { %s358_s14 = smul.u32 288, %s14498_s26  ;;  %s360_s16 = scalar_lea.sflag [#allocation3], %s14498_s26 }
  0x3a   : > { %s10218_s15 = scalar_lea.vmem [#allocation2], %s358_s14 }
  0x3b   : > { %10019 = dma.done.wait %s360_s16, 3840 }
  0x3c   : > { %10020 = vsyncadd %s360_s16, 4294963456  ;;  %s365_s17 = sadd.s32 1, %s10039_s21 }
  0x3d   : > { %p8432_p1 = scmp.ge.s32.totalorder %s365_s17, 2 }
  0x3e   : > { %s370_s30 = ssub.s32 (!%p8432_p1), 1, %s14498_s26  ;;  %s8338_s8 = smul.u32 (!%p8432_p1), 192, %s10039_s21 }
  0x3f   : > { %369 = sbr.rel (%p8432_p1) target bundleno = 90 (0x5a), region = 81 }
  0x40   : > { %s8339_s9 = smul.u32 (!%p8432_p1), 480, %s10043_s22 }
  0x41   : > { %s376_s10 = smul.u32 (!%p8432_p1), 288, %s370_s30 }
  0x42   : > { %s8340_s12 = sadd.s32 (!%p8432_p1), %s8339_s9, %s8338_s8 }
  0x43   : > { %s10230_s29 = scalar_lea.vmem (!%p8432_p1), %s14109_s0, %s8340_s12  ;;  %s10235_s16 = scalar_lea.vmem (!%p8432_p1), [#allocation2], %s376_s10 }
  0x44   : > { %v8434_v36 = vld [vmem:[%s10230_s29 + $0xc0] sm:$0xff]  ;;  %v8435_v37 = vld [vmem:[%s10230_s29 + $0xc8] sm:$0xff]  ;;  %v8436_v38 = vld [vmem:[%s10230_s29 + $0xd8] sm:$0xff]  ;;  %s378_s12 = scalar_lea.sflag [#allocation3], %s370_s30 }
  0x45   : > { %440 = vst [vmem:[%s10235_s16] sm:$0xff] %v8434_v36  ;;  %442 = vst [vmem:[%s10235_s16 + $0x8] sm:$0xff] %v8435_v37  ;;  %v8437_v39 = vld [vmem:[%s10230_s29 + $0xe0] sm:$0xff]  ;;  %v8438_v40 = vld [vmem:[%s10230_s29 + $0xf0] sm:$0xff] }
  0x46   : > { %444 = vst [vmem:[%s10235_s16 + $0x18] sm:$0xff] %v8436_v38  ;;  %v8439_v41 = vld [vmem:[%s10230_s29 + $0xf8] sm:$0xff]  ;;  %446 = vst [vmem:[%s10235_s16 + $0x20] sm:$0xff] %v8437_v39  ;;  %v8440_v42 = vld [vmem:[%s10230_s29 + $0x108] sm:$0xff] }
  0x47   : > { %448 = vst [vmem:[%s10235_s16 + $0x30] sm:$0xff] %v8438_v40  ;;  %450 = vst [vmem:[%s10235_s16 + $0x38] sm:$0xff] %v8439_v41  ;;  %v8441_v43 = vld [vmem:[%s10230_s29 + $0x110] sm:$0xff]  ;;  %v8442_v44 = vld [vmem:[%s10230_s29 + $0x120] sm:$0xff] }
  0x48   : > { %452 = vst [vmem:[%s10235_s16 + $0x48] sm:$0xff] %v8440_v42  ;;  %454 = vst [vmem:[%s10235_s16 + $0x50] sm:$0xff] %v8441_v43  ;;  %v8443_v45 = vld [vmem:[%s10230_s29 + $0x128] sm:$0xff]  ;;  %v8444_v46 = vld [vmem:[%s10230_s29 + $0x138] sm:$0xff] }
  0x49   : > { %456 = vst [vmem:[%s10235_s16 + $0x60] sm:$0xff] %v8442_v44  ;;  %v8445_v47 = vld [vmem:[%s10230_s29 + $0x140] sm:$0xff]  ;;  %458 = vst [vmem:[%s10235_s16 + $0x68] sm:$0xff] %v8443_v45  ;;  %v8446_v48 = vld [vmem:[%s10230_s29 + $0x150] sm:$0xff] }
  0x4a   : > { %460 = vst [vmem:[%s10235_s16 + $0x78] sm:$0xff] %v8444_v46  ;;  %462 = vst [vmem:[%s10235_s16 + $0x80] sm:$0xff] %v8445_v47  ;;  %v8447_v49 = vld [vmem:[%s10230_s29 + $0x158] sm:$0xff]  ;;  %v8448_v50 = vld [vmem:[%s10230_s29 + $0x168] sm:$0xff] }
  0x4b   : > { %464 = vst [vmem:[%s10235_s16 + $0x90] sm:$0xff] %v8446_v48  ;;  %466 = vst [vmem:[%s10235_s16 + $0x98] sm:$0xff] %v8447_v49  ;;  %v8449_v51 = vld [vmem:[%s10230_s29 + $0x170] sm:$0xff]  ;;  %v8450_v52 = vld [vmem:[%s10230_s29 + $0x180] sm:$0xff] }
  0x4c   : > { %468 = vst [vmem:[%s10235_s16 + $0xa8] sm:$0xff] %v8448_v50  ;;  %v8451_v53 = vld [vmem:[%s10230_s29 + $0x188] sm:$0xff]  ;;  %470 = vst [vmem:[%s10235_s16 + $0xb0] sm:$0xff] %v8449_v51  ;;  %v8452_v54 = vld [vmem:[%s10230_s29 + $0x198] sm:$0xff] }
  0x4d   : > { %472 = vst [vmem:[%s10235_s16 + $0xc0] sm:$0xff] %v8450_v52  ;;  %474 = vst [vmem:[%s10235_s16 + $0xc8] sm:$0xff] %v8451_v53  ;;  %v8453_v55 = vld [vmem:[%s10230_s29 + $0x1a0] sm:$0xff]  ;;  %v8454_v56 = vld [vmem:[%s10230_s29 + $0x1b0] sm:$0xff] }
  0x4e   : > { %476 = vst [vmem:[%s10235_s16 + $0xd8] sm:$0xff] %v8452_v54  ;;  %478 = vst [vmem:[%s10235_s16 + $0xe0] sm:$0xff] %v8453_v55  ;;  %v8455_v57 = vld [vmem:[%s10230_s29 + $0x1b8] sm:$0xff]  ;;  %v8456_v58 = vld [vmem:[%s10230_s29 + $0x1c8] sm:$0xff] }
  0x4f   : > { %480 = vst [vmem:[%s10235_s16 + $0xf0] sm:$0xff] %v8454_v56  ;;  %v8457_v59 = vld [vmem:[%s10230_s29 + $0x1d0] sm:$0xff]  ;;  %482 = vst [vmem:[%s10235_s16 + $0xf8] sm:$0xff] %v8455_v57  ;;  %v8460_v61 = vld [vmem:[%s10230_s29 + $0xe8] sm:$0xf] }
  0x50   : > { %484 = vst [vmem:[%s10235_s16 + $0x108] sm:$0xff] %v8456_v58  ;;  %486 = vst [vmem:[%s10235_s16 + $0x110] sm:$0xff] %v8457_v59  ;;  %v8458_v60 = vld [vmem:[%s10230_s29 + $0xd0] sm:$0xf]  ;;  %v8462_v62 = vld [vmem:[%s10230_s29 + $0x100] sm:$0xf] }
  0x51   : > { %8459 = vst [vmem:[%s10235_s16 + $0x10] sm:$0xf] %v8458_v60  ;;  %8461 = vst [vmem:[%s10235_s16 + $0x28] sm:$0xf] %v8460_v61  ;;  %v8464_v63 = vld [vmem:[%s10230_s29 + $0x118] sm:$0xf] }
  0x52   : > { %8463 = vst [vmem:[%s10235_s16 + $0x40] sm:$0xf] %v8462_v62  ;;  %v8466_v0 = vld [vmem:[%s10230_s29 + $0x130] sm:$0xf]  ;;  %v8468_v1 = vld [vmem:[%s10230_s29 + $0x148] sm:$0xf] }
  0x53   : > { %8465 = vst [vmem:[%s10235_s16 + $0x58] sm:$0xf] %v8464_v63  ;;  %8467 = vst [vmem:[%s10235_s16 + $0x70] sm:$0xf] %v8466_v0  ;;  %v8470_v2 = vld [vmem:[%s10230_s29 + $0x160] sm:$0xf] }
  0x54   : > { %8469 = vst [vmem:[%s10235_s16 + $0x88] sm:$0xf] %v8468_v1  ;;  %v8472_v3 = vld [vmem:[%s10230_s29 + $0x178] sm:$0xf]  ;;  %v8474_v4 = vld [vmem:[%s10230_s29 + $0x190] sm:$0xf] }
  0x55   : > { %8471 = vst [vmem:[%s10235_s16 + $0xa0] sm:$0xf] %v8470_v2  ;;  %8473 = vst [vmem:[%s10235_s16 + $0xb8] sm:$0xf] %v8472_v3  ;;  %v8476_v5 = vld [vmem:[%s10230_s29 + $0x1a8] sm:$0xf] }
  0x56   : > { %8475 = vst [vmem:[%s10235_s16 + $0xd0] sm:$0xf] %v8474_v4  ;;  %v8478_v6 = vld [vmem:[%s10230_s29 + $0x1c0] sm:$0xf]  ;;  %v8480_v7 = vld [vmem:[%s10230_s29 + $0x1d8] sm:$0xf] }
  0x57   : > { %8477 = vst [vmem:[%s10235_s16 + $0xe8] sm:$0xf] %v8476_v5  ;;  %8479 = vst [vmem:[%s10235_s16 + $0x100] sm:$0xf] %v8478_v6 }
  0x58   : > { %8481 = vst [vmem:[%s10235_s16 + $0x118] sm:$0xf] %v8480_v7 }
  0x59   : > { %524 = vsyncadd %s378_s12, 3840 }
  0x5a PF: > { %v9792_v8 = vld [vmem:[%s14110_s1 + $0x138] sm:$0xff]   ;;  %v9795_v11 = vld [vmem:[%s14110_s1 + $0x130] sm:$0xff]   ;;  %v9798_v14 = vld [vmem:[%s14110_s1 + $0x128] sm:$0xff]   ;;  %v793_v27 = vlaneseq  ;;  %vm14207_vm0 = vcmask 1046528   ;;  %vm14209_vm1 = vsmask.f32 7424 }
  0x5b   : > { %v9793_v9 = vld [vmem:[%s14110_s1 + $0x178] sm:$0xff]   ;;  %8937 = vmatprep.subr.bf16.mxu0 %v9792_v8  ;;  %v9796_v12 = vld [vmem:[%s14110_s1 + $0x170] sm:$0xff]   ;;  %v9799_v15 = vld [vmem:[%s14110_s1 + $0x168] sm:$0xff]   ;;  %v10057_v41 = vmov 1966171168   ;;  %s14330_s13 = sshll.u32 %s10039_s21, 3 }
  0x5c   : > { %v9794_v10 = vld [vmem:[%s14110_s1 + $0xf8] sm:$0xff]   ;;  %9501 = vmatprep.subr.bf16.mxu1 %v9793_v9  ;;  %v9797_v13 = vld [vmem:[%s14110_s1 + $0xf0] sm:$0xff]   ;;  %v9800_v16 = vld [vmem:[%s14110_s1 + $0xe8] sm:$0xff]   ;;  %v10380_v35 = vshrl.u32 %v793_v27, 7  ;;  %v791_v42 = vunpack.c.l.s4 %v10057_v41  ;;  %s8685_s17 = sadd.s32 4294967295, %s14330_s13  ;;  %s8936_s12 = sshll.u32 %s10039_s21, 4 }
  0x5d   : > { %8938 = vmatpush3.bf16.msra.mxu0 %v9794_v10  ;;  %9502 = vmatpush3.bf16.msra.mxu1 %v9793_v9  ;;  %v9801_v17 = vld [vmem:[%s14110_s1 + $0x120] sm:$0xff]   ;;  %v9804_v20 = vld [vmem:[%s14110_s1 + $0x118] sm:$0xff]   ;;  %v9807_v23 = vld [vmem:[%s14110_s1 + $0x110] sm:$0xff]   ;;  %s8930_s13 = sshll.u32 %s10043_s22, 5  ;;  %s8291_s22 = sshll.u32 %s10171_s27, 4  ;;  %s14046_s22 = int_to_ptr.vmem [resolvable:$true] %s8291_s22 }
  0x5e   : > { %8939 = vmatprep.subr.bf16.mxu0 %v9795_v11  ;;  %9503 = vmatprep.subr.bf16.mxu1 %v9796_v12  ;;  %v9802_v18 = vld [vmem:[%s14110_s1 + $0x160] sm:$0xff]   ;;  %v9805_v21 = vld [vmem:[%s14110_s1 + $0x158] sm:$0xff]   ;;  %v9808_v24 = vld [vmem:[%s14110_s1 + $0x150] sm:$0xff]   ;;  %14217 = vst [vmem:[#allocation11_spill] sm:$0xff] %v10380_v35  ;;  %v792_v51 = vunpack.c.0.s8 %v791_v42  ;;  %s8288_s21 = sadd.s32 %s8936_s12, %s8930_s13  ;;  %s14480_s14 = sand.u32 1, %s10031_s19  }
  0x5f   : > { %v9803_v19 = vld [vmem:[%s14110_s1 + $0xe0] sm:$0xff]   ;;  %v9806_v22 = vld [vmem:[%s14110_s1 + $0xd8] sm:$0xff]   ;;  %v9809_v25 = vld [vmem:[%s14110_s1 + $0xd0] sm:$0xff]   ;;  %s14058_s29 = scalar_lea.sflag [#allocation5], %s14480_s14  ;;  %s9961_s16 = scalar_lea.vmem %s14046_s22, 2048 }
  0x60   : > { %v9810_v26 = vld [vmem:[%s14110_s1 + $0x108] sm:$0xff]   ;;  %v9813_v30 = vld [vmem:[%s14110_s1 + $0x100] sm:$0xff]   ;;  %v528_v32 = vld [vmem:[%s10218_s15 + $0x18] sm:$0xff]  ;;  %v10402_v60 = vsub.s32 %v792_v51, %v10380_v35  ;;  %p9962_p2 = scmp.ne.s32.totalorder %s14046_s22, %s9961_s16  ;;  %s10059_s26 = smov [#allocation4]  }
  0x61   : > { %8940 = vmatpush3.bf16.msra.mxu0 %v9797_v13  ;;  %9504 = vmatpush3.bf16.msra.mxu1 %v9796_v12  ;;  %v9811_v28 = vld [vmem:[%s14110_s1 + $0x148] sm:$0xff]   ;;  %v9814_v31 = vld [vmem:[%s14110_s1 + $0x140] sm:$0xff]   ;;  %v531_v38 = vld [vmem:[%s10218_s15 + $0x30] sm:$0xff]  ;;  %s9965_s30 = sshll.u32 %s10059_s26, 4  ;;  %s9966_s30 = int_to_ptr.vmem [resolvable:$false] %s9965_s30 }
  0x62   : > { %8941 = vmatprep.subr.bf16.mxu0 %v9798_v14  ;;  %9505 = vmatprep.subr.bf16.mxu1 %v9799_v15  ;;  %v9812_v29 = vld [vmem:[%s14110_s1 + $0xc8] sm:$0xff]   ;;  %v529_v33 = vld [vmem:[%s10218_s15 + $0x20] sm:$0xff]  ;;  %v532_v39 = vld [vmem:[%s10218_s15 + $0x38] sm:$0xff]  ;;  %p9963_p4 = pnand %p9962_p2, %p10143_p3  ;;  %p9968_p6 = scmp.lt.s32.totalorder %s14046_s22, %s9966_s30 }
  0x63   : > { %v530_v34 = vld [vmem:[%s10218_s15 + $0x28] sm:$0xf]  ;;  %v563_v36 = vpack.c.bf16 %v529_v33, %v528_v32  ;;  %v533_v40 = vld [vmem:[%s10218_s15 + $0x40] sm:$0xf]  ;;  %v10385_v43 = vpack.c.bf16 %v532_v39, %v531_v38  ;;  %v10398_v58 = vld [vmem:[%s14110_s1 + $0xb8] sm:$0xff]  }
  0x64   : > { %v564_v37 = vpack.c.bf16 %v530_v34, %v530_v34  ;;  %v10387_v44 = vpack.c.bf16 %v533_v40, %v533_v40  ;;  %v9815_v49 = vld [vmem:[%s14110_s1 + $0xc0] sm:$0xff]   ;;  %v534_v7 = vld [vmem:[%s10218_s15 + $0x48] sm:$0xff]  ;;  %v535_v8 = vld [vmem:[%s10218_s15 + $0x50] sm:$0xff]  ;;  %p9964_p5 = pneg %p9963_p4 }
  0x65   : > { %8942 = vmatpush3.bf16.msra.mxu0 %v9800_v16  ;;  %9506 = vmatpush3.bf16.msra.mxu1 %v9799_v15  ;;  %v602_v45 = vshrl.u32 %v563_v36, 16  ;;  %v604_v46 = vshll.u32 %v563_v36, 16  ;;  %v760_v48 = vrot.slane %v563_v36, 1  ;;  %v617_v53 = vshrl.u32 %v10385_v43, 16  ;;  %v536_v9 = vld [vmem:[%s10218_s15 + $0x58] sm:$0xf] }
  0x66   : > { %8943 = vmatprep.subr.bf16.mxu0 %v9801_v17  ;;  %9507 = vmatprep.subr.bf16.mxu1 %v9802_v18  ;;  %v609_v47 = vshll.u32 %v564_v37, 16  ;;  %v761_v50 = vrot.slane %v564_v37, 1  ;;  %v613_v52 = vshrl.u32 %v564_v37, 16  ;;  %v619_v56 = vshll.u32 %v10385_v43, 16 }
  0x67   : > { %v606_v54 = vrot.slane %v604_v46, 1  ;;  %v624_v57 = vshll.u32 %v10387_v44, 16  ;;  %v763_v61 = vrot.slane %v10385_v43, 1  ;;  %v764_v62 = vrot.slane %v10387_v44, 1 }
  0x68   : > { %v611_v55 = vrot.slane %v609_v47, 1  ;;  %v762_v59 = vsel %vm14207_vm0, %v760_v48, %v761_v50  ;;  %v621_v2 = vrot.slane %v619_v56, 1  ;;  %v958_v6 = vrot.slane %v761_v50, %v10402_v60 }
  0x69   : > { %8944 = vmatpush3.bf16.msra.mxu0 %v9803_v19  ;;  %9508 = vmatpush3.bf16.msra.mxu1 %v9802_v18  ;;  %v607_v63 = vor.u32 %v606_v54, %v602_v45  ;;  %v879_v0 = vcombine.high %v762_v59, %v762_v59  ;;  %v900_v3 = vrot.slane %v762_v59, %v10402_v60  ;;  %v626_v4 = vrot.slane %v624_v57, 1  ;;  %v9818_v18 = vld [vmem:[%s14110_s1 + $0x78] sm:$0xff]  }
  0x6a   : > { %8945 = vmatprep.subr.bf16.mxu0 %v9804_v20  ;;  %9509 = vmatprep.subr.bf16.mxu1 %v9805_v21  ;;  %v615_v1 = vor.u32 %v613_v52, %v611_v55  ;;  %v765_v5 = vsel %vm14207_vm0, %v763_v61, %v764_v62  ;;  %v622_v12 = vor.u32 %v621_v2, %v617_v53 }
  0x6b   : > { %v612_v10 = vsel %vm14209_vm1, %v607_v63, %v611_v55  ;;  %v907_v11 = vrot.slane %v879_v0, %v10402_v60  ;;  %v969_v16 = vcombine.high %v765_v5, %v765_v5  ;;  %v990_v17 = vrot.slane %v765_v5, %v10402_v60 }
  0x6c   : > { %v944_v13 = vcombine.low %v564_v37, %v615_v1  ;;  %v877_v14 = vcombine.low %v563_v36, %v612_v10  ;;  %v878_v15 = vcombine.high %v563_v36, %v612_v10  ;;  %v627_v19 = vsel %vm14209_vm1, %v622_v12, %v626_v4 }
  0x6d   : > { %8946 = vmatpush3.bf16.msra.mxu0 %v9806_v22  ;;  %9510 = vmatpush3.bf16.msra.mxu1 %v9805_v21  ;;  %v10423_v21 = vpack.c.bf16 %v535_v8, %v534_v7  ;;  %v10425_v22 = vpack.c.bf16 %v536_v9, %v536_v9 }
  0x6e   : > { %8947 = vmatprep.subr.bf16.mxu0 %v9807_v23  ;;  %9511 = vmatprep.subr.bf16.mxu1 %v9808_v24  ;;  %v951_v20 = vrot.slane %v944_v13, %v10402_v60  ;;  %v886_v23 = vrot.slane %v877_v14, %v10402_v60 }
  0x70   : > { %v959_v27 = vcombine.low %v951_v20, %v958_v6  ;;  %v909_v32 = vcombine.high %v886_v23, %v900_v3 }
  0x71   : > { %8948 = vmatpush3.bf16.msra.mxu0 %v9809_v25  ;;  %9512 = vmatpush3.bf16.msra.mxu1 %v9808_v24  ;;  %v893_v24 = vrot.slane %v878_v15, %v10402_v60  ;;  %v967_v25 = vcombine.low %v10385_v43, %v627_v19 }
  0x72   : > { %8949 = vmatprep.subr.bf16.mxu0 %v9810_v26  ;;  %9513 = vmatprep.subr.bf16.mxu1 %v9811_v28  ;;  %v968_v26 = vcombine.high %v10385_v43, %v627_v19  ;;  %v10435_v36 = vrot.slane %v959_v27, %v10402_v60  ;;  %v10448_v42 = vrot.slane %v909_v32, %v10402_v60  ;;  %v634_v19 = vshll.u32 %v10423_v21, 16 }
  0x73   : > { %v910_v33 = vcombine.low %v893_v24, %v907_v11  ;;  %v911_v34 = vcombine.high %v893_v24, %v907_v11  ;;  %v976_v37 = vrot.slane %v967_v25, %v10402_v60  ;;  %v639_v25 = vshll.u32 %v10425_v22, 16 }
  0x74   : > { %v983_v38 = vrot.slane %v968_v26, %v10402_v60  ;;  %v636_v32 = vrot.slane %v634_v19, 1  ;;  %v9830_v19 = vld [vmem:[%s14110_s1 + $0xa0] sm:$0xff]  }
  0x75   : > { %8950 = vmatpush3.bf16.msra.mxu0 %v9812_v29  ;;  %9514 = vmatpush3.bf16.msra.mxu1 %v9811_v28  ;;  %v997_v28 = vrot.slane %v969_v16, %v10402_v60  ;;  %v628_v29 = vshrl.u32 %v10387_v44, 16  ;;  %v10445_v41 = vrot.slane %v910_v33, %v10402_v60  ;;  %v10451_v43 = vrot.slane %v911_v34, %v10402_v60 }
  0x76   : > { %8951 = vmatprep.subr.bf16.mxu0 %v9813_v30  ;;  %9515 = vmatprep.subr.bf16.mxu1 %v9814_v31  ;;  %v632_v30 = vshrl.u32 %v10423_v21, 16  ;;  %v998_v45 = vcombine.low %v976_v37, %v990_v17  ;;  %v999_v46 = vcombine.high %v976_v37, %v990_v17  ;;  %v641_v33 = vrot.slane %v639_v25, 1 }
  0x77   : > { %v10439_v39 = vor.u32 %v628_v29, %v626_v4  ;;  %v1000_v47 = vcombine.low %v983_v38, %v997_v28  ;;  %v1001_v48 = vcombine.high %v983_v38, %v997_v28  ;;  %v1896_v51 = vcombine.low %v10445_v41, %v10451_v43 }
  0x78   : > { %v8543_v52 = vcombine.high %v10445_v41, %v10451_v43  ;;  %v10462_v53 = vrot.slane %v998_v45, %v10402_v60  ;;  %v10468_v55 = vrot.slane %v999_v46, %v10402_v60  ;;  %v766_v34 = vrot.slane %v10423_v21, 1 }
  0x79   : > { %8952 = vmatpush3.bf16.msra.mxu0 %v9815_v49  ;;  %9516 = vmatpush3.bf16.msra.mxu1 %v9814_v31  ;;  %v908_v31 = vcombine.low %v886_v23, %v900_v3  ;;  %v10465_v54 = vrot.slane %v1000_v47, %v10402_v60  ;;  %v10471_v56 = vrot.slane %v1001_v48, %v10402_v60  ;;  %v767_v37 = vrot.slane %v10425_v22, 1  ;;  %v537_v48 = vld [vmem:[%s10218_s15 + $0x60] sm:$0xff] }
  0x7a   : > { %9541 = vmatprep.subr.bf16.mxu0 %v10398_v58  ;;  %9045 = vmatprep.subr.bf16.mxu1 %v9818_v18  ;;  %v1918_v61 = vrot.slane %v1896_v51, %v10402_v60  ;;  %v1925_v63 = vrot.slane %v8543_v52, %v10402_v60  ;;  %v1030_v0 = vcombine.high %v10462_v53, %v10462_v53  ;;  %v538_v52 = vld [vmem:[%s10218_s15 + $0x68] sm:$0xff] }
  0x7b   : > { %v10442_v40 = vrot.slane %v908_v31, %v10402_v60  ;;  %v1031_v1 = vcombine.high %v10465_v54, %v10465_v54  ;;  %v1032_v2 = vcombine.high %v10468_v55, %v10468_v55  ;;  %v1961_v3 = vcombine.low %v10435_v36, %v10462_v53  ;;  %v9817_v31 = vld [vmem:[%s14110_s1 + $0xb0] sm:$0xff]  }
  0x7c   : > { %v1929_v5 = vcombine.high %v1918_v61, %v1925_v63  ;;  %v1928_v7 = vcombine.low %v1918_v61, %v1925_v63  ;;  %v1962_v8 = vcombine.low %v10468_v55, %v1030_v0  ;;  %v1034_v51 = vcombine.low %v10387_v44, %v10439_v39  ;;  %v539_v0 = vld [vmem:[%s10218_s15 + $0x70] sm:$0xf]  ;;  %v9823_v44 = vld [vmem:[%s14110_s1 + $0xa8] sm:$0xff]  }
  0x7d   : > { %v1894_v49 = vcombine.low %v10442_v40, %v10448_v42  ;;  %v8542_v50 = vcombine.high %v10442_v40, %v10448_v42  ;;  %v1963_v9 = vcombine.low %v1032_v2, %v10465_v54  ;;  %v1964_v10 = vcombine.low %v10471_v56, %v1031_v1 }
  0x7e   : > { %v1971_v11 = vrot.slane %v1961_v3, %v10402_v60  ;;  %v1957_v13 = vrot.slane %v1929_v5, %v10402_v60  ;;  %v1950_v15 = vrot.slane %v1928_v7, %v10402_v60  ;;  %v1978_v16 = vrot.slane %v1962_v8, %v10402_v60  ;;  %v9820_v3 = vld [vmem:[%s14110_s1 + $0x70] sm:$0xff]  }
  0x7f   : > { %v1904_v57 = vrot.slane %v1894_v49, %v10402_v60  ;;  %v1911_v59 = vrot.slane %v8542_v50, %v10402_v60  ;;  %v1985_v17 = vrot.slane %v1963_v9, %v10402_v60  ;;  %v1992_v18 = vrot.slane %v1964_v10, %v10402_v60  ;;  %v9821_v7 = vld [vmem:[%s14110_s1 + $0x30] sm:$0xff]  }
  0x80   : > { %v1993_v26 = vcombine.low %v1971_v11, %v1978_v16  ;;  %v1994_v28 = vcombine.high %v1971_v11, %v1978_v16  ;;  %v637_v49 = vor.u32 %v636_v32, %v632_v30  ;;  %v768_v50 = vsel %vm14207_vm0, %v766_v34, %v767_v37  ;;  %v9825_v32 = vld [vmem:[%s14110_s1 + $0x60] sm:$0xff]  }
  0x81   : > { %v1927_v4 = vcombine.high %v1904_v57, %v1911_v59  ;;  %v1926_v6 = vcombine.low %v1904_v57, %v1911_v59  ;;  %v1995_v27 = vcombine.low %v1985_v17, %v1992_v18  ;;  %v1996_v29 = vcombine.high %v1985_v17, %v1992_v18 }
  0x82   : > { %v2003_v38 = vrot.slane %v1993_v26, %v10402_v60  ;;  %v2010_v46 = vrot.slane %v1994_v28, %v10402_v60  ;;  %v1048_v61 = vrot.slane %v764_v62, %v10402_v60  ;;  %v1059_v63 = vcombine.high %v768_v50, %v768_v50  ;;  %v9824_v26 = vld [vmem:[%s14110_s1 + $0x28] sm:$0xff]  }
  0x83   : > { %v1943_v12 = vrot.slane %v1927_v4, %v10402_v60  ;;  %v1936_v14 = vrot.slane %v1926_v6, %v10402_v60  ;;  %v2017_v45 = vrot.slane %v1995_v27, %v10402_v60  ;;  %v2024_v47 = vrot.slane %v1996_v29, %v10402_v60 }
  0x84   : > { %v642_v30 = vsel %vm14209_vm1, %v637_v49, %v641_v33  ;;  %v1041_v1 = vrot.slane %v1034_v51, %v10402_v60  ;;  %v1080_v39 = vrot.slane %v768_v50, %v10402_v60  ;;  %v1087_v5 = vrot.slane %v1059_v63, %v10402_v60  ;;  %v9836_v50 = vld [vmem:[%s14110_s1 + $0x98] sm:$0xff]  }
  0x85   : > { %v1960_v20 = vcombine.low %v1943_v12, %v1957_v13  ;;  %v1959_v23 = vcombine.high %v1936_v14, %v1950_v15  ;;  %v1958_v24 = vcombine.low %v1936_v14, %v1950_v15  ;;  %v2026_v57 = vcombine.high %v2003_v38, %v2017_v45 }
  0x86   : > { %v2027_v59 = vcombine.low %v2010_v46, %v2024_v47  ;;  %v2025_v2 = vcombine.low %v2003_v38, %v2017_v45  ;;  %v1057_v62 = vcombine.low %v10423_v21, %v642_v30  ;;  %v1058_v4 = vcombine.high %v10423_v21, %v642_v30  ;;  %v9822_v21 = vld [vmem:[%s14110_s1 + $0x68] sm:$0xff]  }
  0x87   : > { %2867 = vmatprep.mubr.bf16.mxu0 %v1960_v20  ;;  %9517 = vmatprep.mubr.bf16.mxu1 %v1959_v23  ;;  %v643_v6 = vshrl.u32 %v10425_v22, 16  ;;  %v1033_v8 = vcombine.high %v10471_v56, %v10471_v56  ;;  %v1049_v9 = vcombine.low %v1041_v1, %v1048_v61  ;;  %v10542_v10 = vpack.c.bf16 %v538_v52, %v537_v48 }
  0x88   : > { %2868 = vmatmul.mubr.bf16.vlgmr.msra.gmra.mxu0 %v1958_v24  ;;  %9518 = vmatmul.mubr.bf16.vlgmr.msra.gmra.mxu1 %v2026_v57  ;;  %v10544_v11 = vpack.c.bf16 %v539_v0, %v539_v0  ;;  %v1066_v12 = vrot.slane %v1057_v62, %v10402_v60  ;;  %v1073_v13 = vrot.slane %v1058_v4, %v10402_v60  ;;  %v9827_v0 = vld [vmem:[%s14110_s1 + $0x58] sm:$0xff]  }
  0x89   : > { %9542 = vmatpush3.bf16.msra.mxu0 %v10398_v58  ;;  %v9819_v58 = vld [vmem:[%s14110_s1 + $0x38] sm:$0xff]   ;;  %2875 = vmatprep.mubr.bf16.mxu0 %v2027_v59  ;;  %v645_v14 = vor.u32 %v643_v6, %v641_v33  ;;  %v10552_v15 = vrot.slane %v1049_v9, %v10402_v60  ;;  %v647_v16 = vshrl.u32 %v10542_v10, 16  ;;  %v649_v17 = vshll.u32 %v10542_v10, 16 }
  0x8a   : > { %9543 = vmatprep.subr.bf16.mxu0 %v9817_v31  ;;  %9046 = vmatpush3.bf16.msra.mxu1 %v9819_v58  ;;  %v654_v18 = vshll.u32 %v10544_v11, 16  ;;  %v1088_v20 = vcombine.low %v1066_v12, %v1080_v39  ;;  %v1089_v23 = vcombine.high %v1066_v12, %v1080_v39  ;;  %v1090_v24 = vcombine.low %v1073_v13, %v1087_v5  ;;  %v9828_v12 = vld [vmem:[%s14110_s1 + $0x18] sm:$0xff]  }
  0x8b   : > { %14218 = vst [vmem:[#allocation12_spill] sm:$0xff] %v10552_v15  ;;  %9047 = vmatprep.subr.bf16.mxu1 %v9820_v3  ;;  %v1091_v25 = vcombine.high %v1073_v13, %v1087_v5  ;;  %v2028_v27 = vcombine.low %v1033_v8, %v10552_v15  ;;  %v651_v28 = vrot.slane %v649_v17, 1  ;;  %v770_v47 = vrot.slane %v10544_v11, 1  ;;  %v541_v3 = vld [vmem:[%s10218_s15 + $0x80] sm:$0xff]  ;;  %v9829_v17 = vld [vmem:[%s14110_s1 + $0x50] sm:$0xff]  }
  0x8c   : > { %v10564_v29 = vrot.slane %v654_v18, 1  ;;  %v10571_v33 = vrot.slane %v1088_v20, %v10402_v60  ;;  %v10574_v34 = vrot.slane %v1090_v24, %v10402_v60  ;;  %v10577_v38 = vrot.slane %v1089_v23, %v10402_v60  ;;  %v9837_v18 = vld [vmem:[%s14110_s1 + $0x90] sm:$0xff]  }
  0x8d   : > { %9544 = vmatpush3.bf16.msra.mxu0 %v9817_v31  ;;  %v769_v31 = vrot.slane %v10542_v10, 1  ;;  %v10580_v45 = vrot.slane %v1091_v25, %v10402_v60  ;;  %v652_v46 = vor.u32 %v651_v28, %v647_v16  ;;  %v1124_v48 = vcombine.low %v10425_v22, %v645_v14 }
  0x8e   : > { %9545 = vmatprep.subr.bf16.mxu0 %v9823_v44  ;;  %9048 = vmatpush3.bf16.msra.mxu1 %v9821_v7  ;;  %v1138_v49 = vrot.slane %v767_v37, %v10402_v60  ;;  %v2029_v51 = vcombine.low %v10571_v33, %v10577_v38  ;;  %v8544_v52 = vcombine.high %v10571_v33, %v10577_v38  ;;  %v9826_v37 = vld [vmem:[%s14110_s1 + $0x20] sm:$0xff]  }
  0x8f   : > { %14219 = vst [vmem:[#allocation13_spill] sm:$0xff] %v10580_v45  ;;  %9049 = vmatprep.subr.bf16.mxu1 %v9822_v21  ;;  %v2031_v57 = vcombine.low %v10574_v34, %v10580_v45  ;;  %v2038_v22 = vrot.slane %v2028_v27, %v10402_v60  ;;  %v657_v59 = vsel %vm14209_vm1, %v652_v46, %v10564_v29  ;;  %v542_v21 = vld [vmem:[%s10218_s15 + $0x88] sm:$0xf] }
  0x90   : > { %2876 = vmatmul.mubr.bf16.gmra.mxu0 %v2025_v2  ;;  %v771_v61 = vsel %vm14207_vm0, %v769_v31, %v770_v47  ;;  %v1131_v63 = vrot.slane %v1124_v48, %v10402_v60  ;;  %v2045_v58 = vrot.slane %v2029_v51, %v10402_v60  ;;  %v2052_v30 = vrot.slane %v8544_v52, %v10402_v60  ;;  %v540_v2 = vld [vmem:[%s10218_s15 + $0x78] sm:$0xff] }
  0x91   : > { %9546 = vmatpush3.bf16.msra.mxu0 %v9823_v44  ;;  %v2059_v1 = vrot.slane %v2031_v57, %v10402_v60  ;;  %v1147_v39 = vcombine.low %v10542_v10, %v657_v59  ;;  %v1148_v62 = vcombine.high %v10542_v10, %v657_v59  ;;  %v1149_v4 = vcombine.high %v771_v61, %v771_v61  ;;  %v9831_v57 = vld [vmem:[%s14110_s1 + $0x10] sm:$0xff]  }
  0x92   : > { %9547 = vmatprep.subr.bf16.mxu0 %v9830_v19  ;;  %9050 = vmatpush3.bf16.msra.mxu1 %v9824_v26  ;;  %v1139_v44 = vcombine.low %v1131_v63, %v1138_v49  ;;  %v1170_v5 = vrot.slane %v771_v61, %v10402_v60  ;;  %v2060_v6 = vcombine.low %v2038_v22, %v2045_v58  ;;  %v658_v52 = vshrl.u32 %v10544_v11, 16  ;;  %v9832_v63 = vld [vmem:[%s14110_s1 + $0x48] sm:$0xff]  }
  0x93   : > { %9051 = vmatprep.subr.bf16.mxu1 %v9825_v32  ;;  %v2062_v7 = vcombine.low %v2052_v30, %v2059_v1  ;;  %v1156_v8 = vrot.slane %v1147_v39, %v10402_v60  ;;  %v8545_v9 = vcombine.high %v10574_v34, %v10580_v45  ;;  %v1163_v10 = vrot.slane %v1148_v62, %v10402_v60  ;;  %v9833_v62 = vld [vmem:[%s14110_s1 + $0x8] sm:$0xff]  }
  0x94   : > { %v10625_v13 = vrot.slane %v1139_v44, %v10402_v60  ;;  %v1177_v14 = vrot.slane %v1149_v4, %v10402_v60  ;;  %v2061_v16 = vcombine.high %v2038_v22, %v2045_v58  ;;  %v2063_v27 = vcombine.high %v2052_v30, %v2059_v1 }
  0x95   : > { %9548 = vmatpush3.bf16.msra.mxu0 %v9830_v19  ;;  %v10636_v19 = vrot.slane %v2060_v6, %v10402_v60  ;;  %v10639_v20 = vrot.slane %v2062_v7, %v10402_v60  ;;  %v1178_v23 = vcombine.low %v1156_v8, %v1170_v5  ;;  %v1179_v24 = vcombine.high %v1156_v8, %v1170_v5  ;;  %v543_v7 = vld [vmem:[%s10218_s15 + $0x90] sm:$0xff]  ;;  %v544_v8 = vld [vmem:[%s10218_s15 + $0x98] sm:$0xff] }
  0x96   : > { %9549 = vmatprep.subr.bf16.mxu0 %v9836_v50  ;;  %9052 = vmatpush3.bf16.msra.mxu1 %v9826_v37  ;;  %v1180_v25 = vcombine.low %v1163_v10, %v1177_v14  ;;  %v10642_v26 = vrot.slane %v8545_v9, %v10402_v60  ;;  %v10644_v28 = vpack.c.bf16 %v541_v3, %v540_v2  ;;  %v9834_v9 = vld [vmem:[%s14110_s1 + $0x40] sm:$0xff]  }
  0x97   : > { %9053 = vmatprep.subr.bf16.mxu1 %v9827_v0  ;;  %v2093_v31 = vcombine.high %v10636_v19, %v10639_v20  ;;  %v10649_v32 = vrot.slane %v1178_v23, %v10402_v60  ;;  %v10652_v46 = vrot.slane %v1179_v24, %v10402_v60  ;;  %v2077_v48 = vrot.slane %v2061_v16, %v10402_v60 }
  0x98   : > { %v10656_v49 = vrot.slane %v1180_v25, %v10402_v60  ;;  %v10659_v51 = vpack.c.bf16 %v542_v21, %v542_v21  ;;  %v662_v61 = vshrl.u32 %v10644_v28, 16  ;;  %v660_v58 = vor.u32 %v658_v52, %v10564_v29 }
  0x99   : > { %9550 = vmatpush3.bf16.msra.mxu0 %v9836_v50  ;;  %14220 = vst [vmem:[#allocation14_spill] sm:$0xff] %v10649_v32  ;;  %14221 = vst [vmem:[#allocation15_spill] sm:$0xff] %v10652_v46  ;;  %v2091_v50 = vrot.slane %v2063_v27, %v10402_v60  ;;  %9521 = vmatprep.mubr.bf16.mxu1 %v2093_v31  ;;  %v1210_v22 = vcombine.high %v10649_v32, %v10649_v32  ;;  %v664_v30 = vshll.u32 %v10644_v28, 16 }
  0x9a   : > { %9551 = vmatprep.subr.bf16.mxu0 %v9837_v18  ;;  %14222 = vst [vmem:[#allocation16_spill] sm:$0xff] %v10656_v49  ;;  %v1212_v37 = vcombine.high %v10652_v46, %v10652_v46  ;;  %v2096_v59 = vcombine.low %v10625_v13, %v10649_v32  ;;  %9054 = vmatpush3.bf16.msra.mxu1 %v9828_v12  ;;  %v669_v1 = vshll.u32 %v10659_v51, 16  ;;  %v772_v44 = vrot.slane %v10644_v28, 1 }
  0x9b   : > { %v2094_v0 = vcombine.low %v2077_v48, %v2091_v50  ;;  %9055 = vmatprep.subr.bf16.mxu1 %v9829_v17  ;;  %v2097_v39 = vcombine.low %v10652_v46, %v1210_v22  ;;  %v666_v29 = vrot.slane %v664_v30, 1  ;;  %v773_v5 = vrot.slane %v10659_v51, 1  ;;  %v525_v46 = vld [vmem:[%s10218_s15] sm:$0xff] }
  0x9c   : > { %v2098_v2 = vcombine.low %v1212_v37, %v10656_v49  ;;  %v10681_v3 = vrot.slane %v2096_v59, %v10402_v60  ;;  %v671_v4 = vrot.slane %v669_v1, 1  ;;  %v1181_v6 = vcombine.high %v1163_v10, %v1177_v14  ;;  %v9835_v37 = vld [vmem:[%s14110_s1] sm:$0xff]   ;;  %v9838_v1 = vld [vmem:[%s14110_s1 + $0x238] sm:$0xff]  }
  0x9d   : > { %9552 = vmatpush3.bf16.msra.mxu0 %v9837_v18  ;;  %2883 = vmatprep.mubr.bf16.mxu0 %v2094_v0  ;;  %v10694_v21 = vrot.slane %v2097_v39, %v10402_v60  ;;  %v1211_v17 = vcombine.high %v10656_v49, %v10656_v49  ;;  %v545_v18 = vld [vmem:[%s10218_s15 + $0xa0] sm:$0xf]  ;;  %v667_v10 = vor.u32 %v666_v29, %v662_v61  ;;  %v673_v30 = vshrl.u32 %v10659_v51, 16 }
  0x9e   : > { %v10697_v12 = vrot.slane %v2098_v2, %v10402_v60  ;;  %v2127_v16 = vcombine.low %v10642_v26, %v10681_v3  ;;  %9056 = vmatpush3.bf16.msra.mxu1 %v9831_v57  ;;  %v774_v14 = vsel %vm14207_vm0, %v772_v44, %v773_v5  ;;  %v10708_v23 = vrot.slane %v1181_v6, %v10402_v60 }
  0x9f   : > { %v1214_v24 = vcombine.low %v10544_v11, %v660_v58  ;;  %9057 = vmatprep.subr.bf16.mxu1 %v9832_v63  ;;  %v1228_v31 = vrot.slane %v770_v47, %v10402_v60  ;;  %v1260_v48 = vrot.slane %v774_v14, %v10402_v60  ;;  %v672_v50 = vsel %vm14209_vm1, %v667_v10, %v671_v4 }
  0xa0   : > { %14223 = vst [vmem:[#allocation17_spill] sm:$0xff] %v10708_v23  ;;  %v2129_v25 = vcombine.low %v10694_v21, %v10697_v12  ;;  %v10714_v27 = vrot.slane %v2127_v16, %v10402_v60  ;;  %v1213_v52 = vcombine.high %v10708_v23, %v10708_v23  ;;  %v2162_v22 = vcombine.low %v10708_v23, %v1211_v17 }
  0xa1   : > { %v1221_v57 = vrot.slane %v1214_v24, %v10402_v60  ;;  %v1237_v11 = vcombine.low %v10644_v28, %v672_v50  ;;  %v2092_v47 = vcombine.low %v10636_v19, %v10639_v20  ;;  %v10734_v61 = vpack.c.bf16 %v544_v8, %v543_v7  ;;  %v9839_v7 = vld [vmem:[%s14110_s1 + $0x88] sm:$0xff]  }
  0xa2   : > { %v10729_v59 = vrot.slane %v2129_v25, %v10402_v60  ;;  %9058 = vmatpush3.bf16.msra.mxu1 %v9833_v62  ;;  %v10737_v0 = vrot.slane %v2162_v22, %v10402_v60  ;;  %v10739_v58 = vpack.c.bf16 %v545_v18, %v545_v18  ;;  %v675_v62 = vor.u32 %v673_v30, %v671_v4 }
  0xa3   : > { %v1229_v63 = vcombine.low %v1221_v57, %v1228_v31  ;;  %9059 = vmatprep.subr.bf16.mxu1 %v9834_v9  ;;  %v1246_v19 = vrot.slane %v1237_v11, %v10402_v60  ;;  %2884 = vmatmul.mubr.bf16.gmra.mxu0 %v2092_v47  ;;  %v677_v20 = vshrl.u32 %v10734_v61, 16  ;;  %v679_v2 = vshll.u32 %v10734_v61, 16 }
  0xa4   : > { %v2160_v39 = vcombine.high %v10714_v27, %v10729_v59  ;;  %v684_v29 = vshll.u32 %v10739_v58, 16  ;;  %v775_v6 = vrot.slane %v10734_v61, 1  ;;  %v14117_v17 = vrot.slane %v10739_v58, 1  ;;  %9553 = vmatprep.subr.bf16.mxu0 %v9839_v7 }
  0xa5   : > { %v10751_v44 = vrot.slane %v1229_v63, %v10402_v60  ;;  %v1268_v8 = vcombine.low %v1246_v19, %v1260_v48  ;;  %v1269_v9 = vcombine.high %v1246_v19, %v1260_v48  ;;  %v681_v16 = vrot.slane %v679_v2, 1  ;;  %9554 = vmatpush3.bf16.msra.mxu0 %v9839_v7 }
  0xa6   : > { %9522 = vmatmul.mubr.bf16.gmra.mxu1 %v2160_v39  ;;  %v10760_v10 = vrot.slane %v684_v29, 1  ;;  %v1238_v4 = vcombine.high %v10644_v28, %v672_v50  ;;  %v1239_v24 = vcombine.high %v774_v14, %v774_v14  ;;  %v1304_v28 = vcombine.low %v10659_v51, %v675_v62  ;;  %v9841_v51 = vld [vmem:[%s14110_s1 + $0x80] sm:$0xff]  }
  0xa7   : > { %14224 = vst [vmem:[#allocation18_spill] sm:$0xff] %v10751_v44  ;;  %v2163_v18 = vcombine.low %v1213_v52, %v10751_v44  ;;  %9060 = vmatpush3.bf16.msra.mxu1 %v9835_v37  ;;  %v10764_v25 = vrot.slane %v1268_v8, %v10402_v60  ;;  %v10767_v31 = vrot.slane %v1269_v9, %v10402_v60 }
  0xa8   : > { %v682_v57 = vor.u32 %v681_v16, %v677_v20  ;;  %9581 = vmatprep.subr.bf16.mxu1 %v9838_v1  ;;  %v1253_v52 = vrot.slane %v1238_v4, %v10402_v60  ;;  %v1267_v22 = vrot.slane %v1239_v24, %v10402_v60  ;;  %v10786_v11 = vsel %vm14207_vm0, %v775_v6, %v14117_v17  ;;  %v547_v4 = vld [vmem:[%s10218_s15 + $0xb0] sm:$0xff]  ;;  %v548_v24 = vld [vmem:[%s10218_s15 + $0xb8] sm:$0xf] }
  0xa9   : > { %14225 = vst [vmem:[#allocation19_spill] sm:$0xff] %v10764_v25  ;;  %14226 = vst [vmem:[#allocation20_spill] sm:$0xff] %v10767_v31  ;;  %v10770_v48 = vrot.slane %v2163_v18, %v10402_v60  ;;  %v2164_v14 = vcombine.low %v10764_v25, %v10767_v31  ;;  %v8546_v50 = vcombine.high %v10764_v25, %v10767_v31  ;;  %v546_v18 = vld [vmem:[%s10218_s15 + $0xa8] sm:$0xff]  ;;  %9555 = vmatprep.subr.bf16.mxu0 %v9841_v51 }
  0xaa   : > { %v10781_v37 = vsel %vm14209_vm1, %v682_v57, %v10760_v10  ;;  %v1270_v63 = vcombine.low %v1253_v52, %v1267_v22  ;;  %v1271_v30 = vcombine.high %v1253_v52, %v1267_v22  ;;  %v1311_v1 = vrot.slane %v1304_v28, %v10402_v60  ;;  %9556 = vmatpush3.bf16.msra.mxu0 %v9841_v51 }
  0xab   : > { %v2194_v47 = vcombine.low %v10737_v0, %v10770_v48  ;;  %v10792_v39 = vrot.slane %v2164_v14, %v10402_v60  ;;  %v10795_v19 = vrot.slane %v8546_v50, %v10402_v60  ;;  %v1318_v20 = vrot.slane %v773_v5, %v10402_v60 }
  0xac   : > { %v1327_v2 = vcombine.low %v10734_v61, %v10781_v37  ;;  %v10806_v29 = vrot.slane %v1270_v63, %v10402_v60  ;;  %v10809_v6 = vrot.slane %v1271_v30, %v10402_v60  ;;  %v1350_v7 = vrot.slane %v10786_v11, %v10402_v60 }
  0xad   : > { %v10803_v62 = vrot.slane %v2194_v47, %v10402_v60  ;;  %v2196_v5 = vcombine.low %v10792_v39, %v10795_v19  ;;  %v1319_v8 = vcombine.low %v1311_v1, %v1318_v20  ;;  %v2128_v16 = vcombine.high %v10642_v26, %v10681_v3 }
  0xae   : > { %14227 = vst [vmem:[#allocation21_spill] sm:$0xff] %v10806_v29  ;;  %v1336_v9 = vrot.slane %v1327_v2, %v10402_v60  ;;  %v2229_v57 = vcombine.low %v10806_v29, %v10809_v6  ;;  %v8547_v52 = vcombine.high %v10806_v29, %v10809_v6  ;;  %v2130_v22 = vcombine.high %v10694_v21, %v10697_v12 }
  0xaf   : > { %v10831_v28 = vrot.slane %v2196_v5, %v10402_v60  ;;  %v10834_v14 = vrot.slane %v1319_v8, %v10402_v60  ;;  %v2144_v63 = vrot.slane %v2128_v16, %v10402_v60  ;;  %v10856_v51 = vpack.c.bf16 %v548_v24, %v548_v24 }
  0xb0   : > { %v1358_v26 = vcombine.low %v1336_v9, %v1350_v7  ;;  %v1359_v3 = vcombine.high %v1336_v9, %v1350_v7  ;;  %v10837_v50 = vrot.slane %v2229_v57, %v10402_v60  ;;  %v10840_v47 = vrot.slane %v8547_v52, %v10402_v60 }
  0xb1   : > { %14228 = vst [vmem:[#allocation22_spill] sm:$0xff] %v10834_v14  ;;  %v2158_v21 = vrot.slane %v2130_v22, %v10402_v60  ;;  %v2227_v12 = vcombine.high %v10803_v62, %v10831_v28  ;;  %v10854_v7 = vpack.c.bf16 %v547_v4, %v546_v18  ;;  %v688_v9 = vshrl.u32 %v10739_v58, 16 }
  0xb2   : > { %v10847_v30 = vrot.slane %v1358_v26, %v10402_v60  ;;  %v10850_v1 = vrot.slane %v1359_v3, %v10402_v60  ;;  %v2261_v20 = vcombine.low %v10837_v50, %v10840_v47  ;;  %v1328_v16 = vcombine.high %v10734_v61, %v10781_v37  ;;  %v549_v37 = vld [vmem:[%s10218_s15 + $0xc0] sm:$0xff] }
  0xb3   : > { %v2161_v2 = vcombine.low %v2144_v63, %v2158_v21  ;;  %9525 = vmatprep.mubr.bf16.mxu1 %v2227_v12  ;;  %v692_v4 = vshrl.u32 %v10854_v7, 16  ;;  %v694_v24 = vshll.u32 %v10854_v7, 16  ;;  %v699_v57 = vshll.u32 %v10856_v51, 16 }
  0xb4   : > { %14229 = vst [vmem:[#allocation23_spill] sm:$0xff] %v10847_v30  ;;  %14230 = vst [vmem:[#allocation24_spill] sm:$0xff] %v10850_v1  ;;  %v1390_v5 = vcombine.high %v10847_v30, %v10847_v30  ;;  %v2231_v8 = vcombine.low %v10834_v14, %v10847_v30  ;;  %v10866_v18 = vrot.slane %v2261_v20, %v10402_v60  ;;  %v778_v61 = vrot.slane %v10854_v7, 1  ;;  %v550_v20 = vld [vmem:[%s10218_s15 + $0xc8] sm:$0xff] }
  0xb5   : > { %2891 = vmatprep.mubr.bf16.mxu0 %v2161_v2  ;;  %v690_v26 = vor.u32 %v688_v9, %v10760_v10  ;;  %v696_v3 = vrot.slane %v694_v24, 1  ;;  %v701_v63 = vrot.slane %v699_v57, 1  ;;  %v14122_v21 = vrot.slane %v10856_v51, 1  ;;  %v551_v2 = vld [vmem:[%s10218_s15 + $0xd0] sm:$0xf] }
  0xb6   : > { %v2232_v52 = vcombine.low %v10850_v1, %v1390_v5  ;;  %v10873_v22 = vrot.slane %v2231_v8, %v10402_v60  ;;  %v1329_v12 = vcombine.high %v10786_v11, %v10786_v11  ;;  %v1343_v5 = vrot.slane %v1328_v16, %v10402_v60 }
  0xb7   : > { %v1392_v10 = vcombine.high %v10850_v1, %v10850_v1  ;;  %v1394_v8 = vcombine.low %v10739_v58, %v690_v26  ;;  %v697_v9 = vor.u32 %v696_v3, %v692_v4  ;;  %v780_v24 = vsel %vm14207_vm0, %v778_v61, %v14122_v21 }
  0xb8   : > { %v10884_v17 = vrot.slane %v2232_v52, %v10402_v60  ;;  %v1357_v57 = vrot.slane %v1329_v12, %v10402_v60  ;;  %v14231_v11 = vrot.slane %v10739_v58, 1  ;;  %v1440_v30 = vrot.slane %v780_v24, %v10402_v60 }
  0xb9   : > { %v1401_v16 = vrot.slane %v1394_v8, %v10402_v60  ;;  %v2159_v4 = vcombine.low %v10714_v27, %v10729_v59  ;;  %v702_v26 = vsel %vm14209_vm1, %v697_v9, %v701_v63  ;;  %v10904_v21 = vpack.c.bf16 %v550_v20, %v549_v37  ;;  %v9843_v20 = vld [vmem:[%s14110_s1 + $0x1f8] sm:$0xff]  }
  0xba   : > { %v1408_v35 = vrot.slane %v14231_v11, %v10402_v60  ;;  %v2263_v52 = vcombine.low %v10873_v22, %v10884_v17  ;;  %v1360_v3 = vcombine.low %v1343_v5, %v1357_v57  ;;  %v1361_v61 = vcombine.high %v1343_v5, %v1357_v57  ;;  %9153 = vmatprep.subr.bf16.mxu0 %v9843_v20 }
  0xbb   : > { %v1417_v11 = vcombine.low %v10854_v7, %v702_v26  ;;  %2892 = vmatmul.mubr.bf16.gmra.mxu0 %v2159_v4  ;;  %v10910_v1 = vpack.c.bf16 %v551_v2, %v551_v2  ;;  %v703_v59 = vshrl.u32 %v10856_v51, 16  ;;  %v707_v37 = vshrl.u32 %v10904_v21, 16 }
  0xbc   : > { %v10907_v12 = vrot.slane %v2263_v52, %v10402_v60  ;;  %v1409_v58 = vcombine.low %v1401_v16, %v1408_v35  ;;  %v10913_v8 = vrot.slane %v1360_v3, %v10402_v60  ;;  %v10916_v27 = vrot.slane %v1361_v61, %v10402_v60 }
  0xbd   : > { %v1426_v5 = vrot.slane %v1417_v11, %v10402_v60  ;;  %v709_v9 = vshll.u32 %v10904_v21, 16  ;;  %v705_v4 = vor.u32 %v703_v59, %v701_v63  ;;  %v781_v49 = vrot.slane %v10904_v21, 1 }
  0xbe   : > { %14232 = vst [vmem:[#allocation25_spill] sm:$0xff] %v10913_v8  ;;  %14233 = vst [vmem:[#allocation26_spill] sm:$0xff] %v10916_v27  ;;  %v2294_v35 = vcombine.high %v10866_v18, %v10907_v12  ;;  %v10926_v2 = vrot.slane %v1409_v58, %v10402_v60  ;;  %v1391_v57 = vcombine.high %v10913_v8, %v10913_v8  ;;  %v714_v58 = vshll.u32 %v10910_v1, 16 }
  0xbf   : > { %v1393_v52 = vcombine.high %v10916_v27, %v10916_v27  ;;  %v2296_v16 = vcombine.low %v1392_v10, %v10913_v8  ;;  %v1448_v3 = vcombine.low %v1426_v5, %v1440_v30  ;;  %v1449_v61 = vcombine.high %v1426_v5, %v1440_v30 }
  0xc0   : > { %14234 = vst [vmem:[#allocation27_spill] sm:$0xff] %v10926_v2  ;;  %9526 = vmatmul.mubr.bf16.gmra.mxu1 %v2294_v35  ;;  %v711_v14 = vrot.slane %v709_v9, 1  ;;  %v2297_v11 = vcombine.low %v10916_v27, %v1391_v57  ;;  %v716_v30 = vrot.slane %v714_v58, 1  ;;  %v14134_v35 = vrot.slane %v10910_v1, 1 }
  0xc1   : > { %v2298_v31 = vcombine.low %v1393_v52, %v10926_v2  ;;  %v10939_v29 = vrot.slane %v2296_v16, %v10402_v60  ;;  %v10943_v23 = vrot.slane %v1448_v3, %v10402_v60  ;;  %v10946_v63 = vrot.slane %v1449_v61, %v10402_v60 }
  0xc2   : > { %v712_v10 = vor.u32 %v711_v14, %v707_v37  ;;  %v10951_v20 = vrot.slane %v2297_v11, %v10402_v60  ;;  %v1418_v5 = vcombine.high %v10854_v7, %v702_v26  ;;  %v1419_v37 = vcombine.high %v780_v24, %v780_v24  ;;  %v552_v11 = vld [vmem:[%s10218_s15 + $0xd8] sm:$0xff] }
  0xc3   : > { %14235 = vst [vmem:[#allocation28_spill] sm:$0xff] %v10943_v23  ;;  %14236 = vst [vmem:[#allocation29_spill] sm:$0xff] %v10946_v63  ;;  %v2299_v9 = vcombine.low %v10943_v23, %v10946_v63  ;;  %v10958_v57 = vrot.slane %v2298_v31, %v10402_v60  ;;  %v10968_v16 = vsel %vm14207_vm0, %v781_v49, %v14134_v35  ;;  %v14237_v24 = vrot.slane %v10856_v51, 1  ;;  %v553_v49 = vld [vmem:[%s10218_s15 + $0xe0] sm:$0xff]  ;;  %v554_v35 = vld [vmem:[%s10218_s15 + $0xe8] sm:$0xf] }
  0xc4   : > { %v10961_v14 = vsel %vm14209_vm1, %v712_v10, %v716_v30  ;;  %v2328_v52 = vcombine.low %v10939_v29, %v10951_v20  ;;  %v1433_v7 = vrot.slane %v1418_v5, %v10402_v60  ;;  %v1484_v26 = vcombine.low %v10856_v51, %v705_v4 }
  0xc5   : > { %v10973_v31 = vrot.slane %v2299_v9, %v10402_v60  ;;  %v1447_v3 = vrot.slane %v1419_v37, %v10402_v60  ;;  %v1498_v61 = vrot.slane %v14237_v24, %v10402_v60  ;;  %v1507_v58 = vcombine.low %v10904_v21, %v10961_v14 }
  0xc6   : > { %v10984_v10 = vrot.slane %v2328_v52, %v10402_v60  ;;  %v1491_v5 = vrot.slane %v1484_v26, %v10402_v60  ;;  %v1530_v4 = vrot.slane %v10968_v16, %v10402_v60  ;;  %v8548_v9 = vcombine.high %v10943_v23, %v10946_v63 }
  0xc7   : > { %v2330_v51 = vcombine.low %v10958_v57, %v10973_v31  ;;  %v1450_v37 = vcombine.low %v1433_v7, %v1447_v3  ;;  %v1451_v24 = vcombine.high %v1433_v7, %v1447_v3  ;;  %v1516_v59 = vrot.slane %v1507_v58, %v10402_v60 }
  0xc8   : > { %v1123_v52 = vcombine.high %v10580_v45, %v10580_v45  ;;  %v1499_v8 = vcombine.low %v1491_v5, %v1498_v61  ;;  %v2195_v26 = vcombine.high %v10737_v0, %v10770_v48  ;;  %v2197_v27 = vcombine.high %v10792_v39, %v10795_v19 }
  0xc9   : > { %v11002_v63 = vrot.slane %v2330_v51, %v10402_v60  ;;  %v11005_v2 = vrot.slane %v1450_v37, %v10402_v60  ;;  %v11008_v7 = vrot.slane %v1451_v24, %v10402_v60  ;;  %v1538_v3 = vcombine.low %v1516_v59, %v1530_v4 }
  0xca   : > { %v11011_v58 = vrot.slane %v1499_v8, %v10402_v60  ;;  %v2211_v61 = vrot.slane %v2195_v26, %v10402_v60  ;;  %v2225_v0 = vrot.slane %v2197_v27, %v10402_v60  ;;  %v11015_v48 = vpack.c.bf16 %v553_v49, %v552_v11 }
  0xcb   : > { %14238 = vst [vmem:[#allocation30_spill] sm:$0xff] %v11005_v2  ;;  %v2361_v39 = vcombine.high %v10984_v10, %v11002_v63  ;;  %v11020_v19 = vrot.slane %v1538_v3, %v10402_v60  ;;  %v2364_v5 = vcombine.low %v11005_v2, %v11008_v7  ;;  %v11025_v51 = vrot.slane %v8548_v9, %v10402_v60 }
  0xcc   : > { %14239 = vst [vmem:[#allocation31_spill] sm:$0xff] %v11011_v58  ;;  %v8549_v8 = vcombine.high %v11005_v2, %v11008_v7  ;;  %v2228_v37 = vcombine.low %v2211_v61, %v2225_v0  ;;  %v11029_v24 = vpack.c.bf16 %v554_v35, %v554_v35  ;;  %v718_v27 = vshrl.u32 %v10910_v1, 16 }
  0xcd   : > { %14240 = vst [vmem:[#allocation32_spill] sm:$0xff] %v11020_v19  ;;  %v11033_v11 = vcombine.low %v1123_v52, %v10625_v13  ;;  %9529 = vmatprep.mubr.bf16.mxu1 %v2361_v39  ;;  %v2366_v49 = vcombine.low %v11011_v58, %v11020_v19  ;;  %v11038_v26 = vrot.slane %v2364_v5, %v10402_v60  ;;  %v722_v9 = vshrl.u32 %v11015_v48, 16 }
  0xce   : > { %v11042_v3 = vrot.slane %v8549_v8, %v10402_v60  ;;  %2899 = vmatprep.mubr.bf16.mxu0 %v2228_v37  ;;  %v720_v35 = vor.u32 %v718_v27, %v716_v30  ;;  %v724_v61 = vshll.u32 %v11015_v48, 16  ;;  %v729_v0 = vshll.u32 %v11029_v24, 16 }
  0xcf   : > { %14241 = vst [vmem:[#allocation33_spill] sm:$0xff] %v11033_v11  ;;  %v11047_v13 = vrot.slane %v2366_v49, %v10402_v60  ;;  %v2395_v52 = vcombine.low %v11025_v51, %v11038_v26  ;;  %v784_v39 = vrot.slane %v11015_v48, 1  ;;  %v14147_v5 = vrot.slane %v11029_v24, 1 }
  0xd0   : > { %v726_v2 = vrot.slane %v724_v61, 1  ;;  %v11053_v58 = vrot.slane %v729_v0, 1  ;;  %v1508_v30 = vcombine.high %v10904_v21, %v10961_v14  ;;  %v1509_v8 = vcombine.high %v10968_v16, %v10968_v16 }
  0xd1   : > { %v2397_v37 = vcombine.low %v11042_v3, %v11047_v13  ;;  %v11062_v27 = vrot.slane %v2395_v52, %v10402_v60  ;;  %v786_v49 = vsel %vm14207_vm0, %v784_v39, %v14147_v5  ;;  %v1539_v23 = vcombine.high %v1516_v59, %v1530_v4 }
  0xd2   : > { %v727_v61 = vor.u32 %v726_v2, %v722_v9  ;;  %v1523_v0 = vrot.slane %v1508_v30, %v10402_v60  ;;  %v1537_v11 = vrot.slane %v1509_v8, %v10402_v60  ;;  %v1570_v21 = vcombine.high %v11020_v19, %v11020_v19 }
  0xd3   : > { %v11072_v14 = vrot.slane %v2397_v37, %v10402_v60  ;;  %v11075_v16 = vrot.slane %v1539_v23, %v10402_v60  ;;  %v1574_v52 = vcombine.low %v10910_v1, %v720_v35  ;;  %v14243_v39 = vrot.slane %v10910_v1, 1 }
  0xd4   : > { %v732_v2 = vsel %vm14209_vm1, %v727_v61, %v11053_v58  ;;  %v1540_v4 = vcombine.low %v1523_v0, %v1537_v11  ;;  %v1541_v9 = vcombine.high %v1523_v0, %v1537_v11  ;;  %v1620_v30 = vrot.slane %v786_v49, %v10402_v60 }
  0xd5   : > { %14242 = vst [vmem:[#allocation34_spill] sm:$0xff] %v11075_v16  ;;  %v1588_v59 = vrot.slane %v14243_v39, %v10402_v60  ;;  %v2428_v8 = vcombine.high %v11062_v27, %v11072_v14  ;;  %v1572_v23 = vcombine.high %v11075_v16, %v11075_v16  ;;  %v1581_v37 = vrot.slane %v1574_v52, %v10402_v60 }
  0xd6   : > { %v1597_v35 = vcombine.low %v11015_v48, %v732_v2  ;;  %v11091_v1 = vrot.slane %v1540_v4, %v10402_v60  ;;  %v11094_v39 = vrot.slane %v1541_v9, %v10402_v60  ;;  %v2430_v11 = vcombine.low %v11075_v16, %v1570_v21 }
  0xd7   : > { %v2226_v61 = vcombine.low %v10803_v62, %v10831_v28  ;;  %9530 = vmatmul.mubr.bf16.gmra.mxu1 %v2428_v8  ;;  %v1589_v0 = vcombine.low %v1581_v37, %v1588_v59  ;;  %v1598_v19 = vcombine.high %v11015_v48, %v732_v2  ;;  %v1599_v52 = vcombine.high %v786_v49, %v786_v49 }
  0xd8   : > { %14244 = vst [vmem:[#allocation35_spill] sm:$0xff] %v11091_v1  ;;  %14245 = vst [vmem:[#allocation36_spill] sm:$0xff] %v11094_v39  ;;  %v1606_v5 = vrot.slane %v1597_v35, %v10402_v60  ;;  %v1571_v45 = vcombine.high %v11091_v1, %v11091_v1  ;;  %v1573_v4 = vcombine.high %v11094_v39, %v11094_v39 }
  0xd9   : > { %v2431_v9 = vcombine.low %v1572_v23, %v11091_v1  ;;  %v11107_v21 = vrot.slane %v2430_v11, %v10402_v60  ;;  %2900 = vmatmul.mubr.bf16.gmra.mxu0 %v2226_v61  ;;  %v11110_v62 = vrot.slane %v1589_v0, %v10402_v60  ;;  %v1613_v59 = vrot.slane %v1598_v19, %v10402_v60 }
  0xda   : > { %v1628_v28 = vcombine.low %v1606_v5, %v1620_v30  ;;  %v1627_v48 = vrot.slane %v1599_v52, %v10402_v60  ;;  %v2432_v49 = vcombine.low %v11094_v39, %v1571_v45  ;;  %v1629_v8 = vcombine.high %v1606_v5, %v1620_v30 }
  0xdb   : > { %14246 = vst [vmem:[#allocation37_spill] sm:$0xff] %v11110_v62  ;;  %v11116_v2 = vrot.slane %v2431_v9, %v10402_v60  ;;  %v2262_v23 = vcombine.high %v10837_v50, %v10840_v47  ;;  %v2433_v35 = vcombine.low %v1573_v4, %v11110_v62  ;;  %v2264_v5 = vcombine.high %v10873_v22, %v10884_v17  ;;  %v555_v4 = vld [vmem:[%s10218_s15 + $0xf0] sm:$0xff]  ;;  %v556_v9 = vld [vmem:[%s10218_s15 + $0xf8] sm:$0xff] }
  0xdc   : > { %v11121_v37 = vrot.slane %v1628_v28, %v10402_v60  ;;  %v1630_v19 = vcombine.low %v1613_v59, %v1627_v48  ;;  %v1631_v11 = vcombine.high %v1613_v59, %v1627_v48  ;;  %v11125_v61 = vrot.slane %v2432_v49, %v10402_v60  ;;  %v557_v28 = vld [vmem:[%s10218_s15 + $0x100] sm:$0xf] }
  0xdd   : > { %v2462_v45 = vcombine.low %v11107_v21, %v11116_v2  ;;  %v11130_v0 = vrot.slane %v1629_v8, %v10402_v60  ;;  %v11137_v47 = vrot.slane %v2433_v35, %v10402_v60  ;;  %v2278_v48 = vrot.slane %v2262_v23, %v10402_v60 }
  0xde   : > { %14247 = vst [vmem:[#allocation38_spill] sm:$0xff] %v11121_v37  ;;  %v11140_v30 = vrot.slane %v1630_v19, %v10402_v60  ;;  %v11143_v52 = vrot.slane %v1631_v11, %v10402_v60  ;;  %v2292_v19 = vrot.slane %v2264_v5, %v10402_v60  ;;  %v581_v50 = vpack.c.bf16 %v556_v9, %v555_v4 }
  0xdf   : > { %14248 = vst [vmem:[#allocation39_spill] sm:$0xff] %v11130_v0  ;;  %v11149_v59 = vrot.slane %v2462_v45, %v10402_v60  ;;  %v2497_v17 = vcombine.low %v11121_v37, %v11130_v0  ;;  %v8550_v22 = vcombine.high %v11121_v37, %v11130_v0  ;;  %v2464_v49 = vcombine.low %v11125_v61, %v11137_v47 }
  0xe0   : > { %14249 = vst [vmem:[#allocation40_spill] sm:$0xff] %v11140_v30  ;;  %14250 = vst [vmem:[#allocation41_spill] sm:$0xff] %v11143_v52  ;;  %v2499_v8 = vcombine.low %v11140_v30, %v11143_v52  ;;  %v8551_v35 = vcombine.high %v11140_v30, %v11143_v52  ;;  %v582_v0 = vpack.c.bf16 %v557_v28, %v557_v28  ;;  %v1736_v9 = vshrl.u32 %v581_v50, 16 }
  0xe1   : > { %v11164_v11 = vrot.slane %v2497_v17, %v10402_v60  ;;  %v11167_v45 = vrot.slane %v8550_v22, %v10402_v60  ;;  %v11170_v23 = vrot.slane %v2464_v49, %v10402_v60  ;;  %v2295_v52 = vcombine.low %v2278_v48, %v2292_v19 }
  0xe2   : > { %v11173_v1 = vrot.slane %v2499_v8, %v10402_v60  ;;  %v11176_v39 = vrot.slane %v8551_v35, %v10402_v60  ;;  %v733_v17 = vshrl.u32 %v11029_v24, 16  ;;  %v14251_v22 = vrot.slane %v11029_v24, 1 }
  0xe3   : > { %v2529_v5 = vcombine.low %v11164_v11, %v11167_v45  ;;  %v2495_v28 = vcombine.high %v11149_v59, %v11170_v23  ;;  %2907 = vmatprep.mubr.bf16.mxu0 %v2295_v52  ;;  %v1738_v8 = vshll.u32 %v581_v50, 16  ;;  %v1743_v48 = vshll.u32 %v582_v0, 16 }
  0xe4   : > { %v1678_v4 = vrot.slane %v14251_v22, %v10402_v60  ;;  %v2531_v49 = vcombine.low %v11173_v1, %v11176_v39  ;;  %v735_v19 = vor.u32 %v733_v17, %v11053_v58  ;;  %v1752_v30 = vrot.slane %v581_v50, 1  ;;  %v526_v58 = vld [vmem:[%s10218_s15 + $0x8] sm:$0xff]  ;;  %v527_v17 = vld [vmem:[%s10218_s15 + $0x10] sm:$0xf] }
  0xe5   : > { %v11189_v35 = vrot.slane %v2529_v5, %v10402_v60  ;;  %v1753_v22 = vrot.slane %v582_v0, 1  ;;  %9533 = vmatprep.mubr.bf16.mxu1 %v2495_v28  ;;  %v1740_v62 = vrot.slane %v1738_v8, 1  ;;  %v1745_v37 = vrot.slane %v1743_v48, 1 }
  0xe6   : > { %v11193_v16 = vrot.slane %v2531_v49, %v10402_v60  ;;  %v2293_v52 = vcombine.low %v10866_v18, %v10907_v12  ;;  %v1664_v44 = vcombine.low %v11029_v24, %v735_v19  ;;  %v1747_v32 = vshrl.u32 %v582_v0, 16 }
  0xe7   : > { %14252 = vst [vmem:[#allocation42_spill] sm:$0xff] %v11189_v35  ;;  %v1754_v25 = vsel %vm14207_vm0, %v1752_v30, %v1753_v22  ;;  %v1836_v5 = vrot.slane %v1753_v22, %v10402_v60  ;;  %v1741_v49 = vor.u32 %v1740_v62, %v1736_v9  ;;  %v2329_v24 = vcombine.high %v10939_v29, %v10951_v20 }
  0xe8   : > { %v2562_v28 = vcombine.high %v11189_v35, %v11193_v16  ;;  %v1757_v15 = vcombine.high %v1754_v25, %v1754_v25  ;;  %v1778_v8 = vrot.slane %v1754_v25, %v10402_v60  ;;  %2908 = vmatmul.mubr.bf16.gmra.mxu0 %v2293_v52  ;;  %v1671_v18 = vrot.slane %v1664_v44, %v10402_v60 }
  0xe9   : > { %v1749_v12 = vor.u32 %v1747_v32, %v1745_v37  ;;  %v2331_v30 = vcombine.high %v10958_v57, %v10973_v31  ;;  %v1746_v48 = vsel %vm14209_vm1, %v1741_v49, %v1745_v37  ;;  %v561_v22 = vpack.c.bf16 %v526_v58, %v525_v46 }
  0xea   : > { %9534 = vmatmul.mubr.bf16.gmra.mxu1 %v2562_v28  ;;  %v1785_v19 = vrot.slane %v1757_v15, %v10402_v60  ;;  %v11213_v62 = vpack.c.bf16 %v527_v17, %v527_v17  ;;  %v1679_v9 = vcombine.low %v1671_v18, %v1678_v4  ;;  %v1755_v25 = vcombine.low %v581_v50, %v1746_v48 }
  0xeb   : > { %v1756_v52 = vcombine.high %v581_v50, %v1746_v48  ;;  %v1822_v35 = vcombine.low %v582_v0, %v1749_v12  ;;  %v2345_v32 = vrot.slane %v2329_v24, %v10402_v60  ;;  %v2359_v44 = vrot.slane %v2331_v30, %v10402_v60 }
  0xec   : > { %v587_v29 = vshrl.u32 %v561_v22, 16  ;;  %v589_v20 = vshll.u32 %v561_v22, 16  ;;  %v11218_v57 = vrot.slane %v1679_v9, %v10402_v60  ;;  %v1764_v31 = vrot.slane %v1755_v25, %v10402_v60 }
  0xed   : > { %v1771_v15 = vrot.slane %v1756_v52, %v10402_v60  ;;  %v1829_v46 = vrot.slane %v1822_v35, %v10402_v60  ;;  %v2362_v37 = vcombine.low %v2345_v32, %v2359_v44  ;;  %v594_v50 = vshll.u32 %v11213_v62, 16 }
  0xee   : > { %v591_v4 = vrot.slane %v589_v20, 1  ;;  %v757_v0 = vrot.slane %v561_v22, 1  ;;  %v1786_v58 = vcombine.low %v1764_v31, %v1778_v8  ;;  %v1787_v17 = vcombine.high %v1764_v31, %v1778_v8 }
  0xef   : > { %v1788_v28 = vcombine.low %v1771_v15, %v1785_v19  ;;  %v1789_v49 = vcombine.high %v1771_v15, %v1785_v19  ;;  %v1837_v18 = vcombine.low %v1829_v46, %v1836_v5  ;;  %2915 = vmatprep.mubr.bf16.mxu0 %v2362_v37  ;;  %v11224_v24 = vrot.slane %v594_v50, 1 }
  0xf0   : > { %v592_v12 = vor.u32 %v591_v4, %v587_v29  ;;  %v758_v30 = vrot.slane %v11213_v62, 1  ;;  %v11228_v48 = vrot.slane %v1786_v58, %v10402_v60  ;;  %v11234_v9 = vrot.slane %v1787_v17, %v10402_v60 }
  0xf1   : > { %v11231_v35 = vrot.slane %v1788_v28, %v10402_v60  ;;  %v11237_v8 = vrot.slane %v1789_v49, %v10402_v60  ;;  %v11240_v5 = vrot.slane %v1837_v18, %v10402_v60  ;;  %v2360_v52 = vcombine.low %v10984_v10, %v11002_v63 }
  0xf2   : > { %14253 = vst [vmem:[#allocation43_spill] sm:$0xff] %v11228_v48  ;;  %14255 = vst [vmem:[#allocation45_spill] sm:$0xff] %v11234_v9  ;;  %v597_v19 = vsel %vm14209_vm1, %v592_v12, %v11224_v24  ;;  %v759_v25 = vsel %vm14207_vm0, %v757_v0, %v758_v30  ;;  %v1818_v32 = vcombine.high %v11228_v48, %v11228_v48 }
  0xf3   : > { %14254 = vst [vmem:[#allocation44_spill] sm:$0xff] %v11231_v35  ;;  %14256 = vst [vmem:[#allocation46_spill] sm:$0xff] %v11237_v8  ;;  %v1819_v44 = vcombine.high %v11231_v35, %v11231_v35  ;;  %v1820_v29 = vcombine.high %v11234_v9, %v11234_v9  ;;  %v2564_v20 = vcombine.low %v11218_v57, %v11228_v48  ;;  %2916 = vmatmul.mubr.bf16.gmra.mxu0 %v2360_v52  ;;  %v14287_v48 = vld [vmem:[#allocation35_spill] sm:$0xff] }
  0xf4   : > { %14257 = vst [vmem:[#allocation47_spill] sm:$0xff] %v11240_v5  ;;  %v1821_v31 = vcombine.high %v11237_v8, %v11237_v8  ;;  %v787_v15 = vcombine.low %v561_v22, %v597_v19  ;;  %v788_v46 = vcombine.high %v561_v22, %v597_v19  ;;  %v789_v37 = vcombine.high %v759_v25, %v759_v25 }
  0xf5   : > { %v2565_v63 = vcombine.low %v11234_v9, %v1818_v32  ;;  %v2566_v10 = vcombine.low %v1820_v29, %v11231_v35  ;;  %v2567_v4 = vcombine.low %v11237_v8, %v1819_v44  ;;  %v11261_v50 = vrot.slane %v2564_v20, %v10402_v60  ;;  %v14285_v35 = vld [vmem:[#allocation32_spill] sm:$0xff]  ;;  %v14292_v9 = vld [vmem:[#allocation41_spill] sm:$0xff] }
  0xf6   : > { %v2631_v0 = vcombine.low %v1821_v31, %v11240_v5  ;;  %v796_v58 = vrot.slane %v787_v15, %v10402_v60  ;;  %v803_v17 = vrot.slane %v788_v46, %v10402_v60  ;;  %v810_v28 = vrot.slane %v759_v25, %v10402_v60 }
  0xf7   : > { %v11268_v22 = vrot.slane %v2565_v63, %v10402_v60  ;;  %v11271_v49 = vrot.slane %v2566_v10, %v10402_v60  ;;  %v11274_v18 = vrot.slane %v2567_v4, %v10402_v60  ;;  %v817_v12 = vrot.slane %v789_v37, %v10402_v60 }
  0xf8   : > { %v11278_v19 = vrot.slane %v2631_v0, %v10402_v60  ;;  %v818_v52 = vcombine.low %v796_v58, %v810_v28  ;;  %v819_v32 = vcombine.high %v796_v58, %v810_v28  ;;  %v2396_v44 = vcombine.high %v11025_v51, %v11038_v26 }
  0xf9   : > { %v2596_v25 = vcombine.low %v11261_v50, %v11268_v22  ;;  %v2598_v29 = vcombine.low %v11271_v49, %v11274_v18  ;;  %v820_v20 = vcombine.low %v803_v17, %v817_v12  ;;  %v821_v31 = vcombine.high %v803_v17, %v817_v12 }
  0xfa   : > { %v11288_v15 = vrot.slane %v11278_v19, %v10402_v60  ;;  %v828_v46 = vrot.slane %v818_v52, %v10402_v60  ;;  %v842_v37 = vrot.slane %v819_v32, %v10402_v60  ;;  %v2398_v63 = vcombine.high %v11042_v3, %v11047_v13 }
  0xfb   : > { %v11295_v51 = vrot.slane %v2596_v25, %v10402_v60  ;;  %v11298_v26 = vrot.slane %v2598_v29, %v10402_v60  ;;  %v835_v10 = vrot.slane %v820_v20, %v10402_v60  ;;  %v849_v4 = vrot.slane %v821_v31, %v10402_v60 }
  0xfc   : > { %v2654_v0 = vcombine.high %v11288_v15, %v11288_v15  ;;  %v3091_v58 = vcombine.low %v828_v46, %v842_v37  ;;  %v8576_v17 = vcombine.high %v828_v46, %v842_v37  ;;  %v2412_v28 = vrot.slane %v2396_v44, %v10402_v60 }
  0xfd   : > { %v2629_v3 = vcombine.high %v11295_v51, %v11298_v26  ;;  %v3093_v13 = vcombine.low %v835_v10, %v849_v4  ;;  %v8577_v12 = vcombine.high %v835_v10, %v849_v4  ;;  %v2426_v52 = vrot.slane %v2398_v63, %v10402_v60 }
  0xfe   : > { %v3101_v32 = vrot.slane %v3091_v58, %v10402_v60  ;;  %v3108_v25 = vrot.slane %v8576_v17, %v10402_v60  ;;  %v598_v29 = vshrl.u32 %v11213_v62, 16  ;;  %v868_v20 = vrot.slane %v758_v30, %v10402_v60 }
  0xff   : > { %9537 = vmatprep.mubr.bf16.mxu1 %v2629_v3  ;;  %v3115_v31 = vrot.slane %v3093_v13, %v10402_v60  ;;  %v3122_v44 = vrot.slane %v8577_v12, %v10402_v60  ;;  %v2429_v46 = vcombine.low %v2412_v28, %v2426_v52  ;;  %v940_v37 = vcombine.high %v10442_v40, %v10442_v40 }
 0x100   : > { %9538 = vmatmul.mubr.bf16.gmra.mxu1 %v2654_v0  ;;  %v3123_v10 = vcombine.low %v3101_v32, %v3108_v25  ;;  %v3124_v63 = vcombine.high %v3101_v32, %v3108_v25  ;;  %v600_v4 = vor.u32 %v598_v29, %v11224_v24  ;;  %v941_v58 = vcombine.high %v10445_v41, %v10445_v41 }
 0x101   : > { %v3125_v17 = vcombine.low %v3115_v31, %v3122_v44  ;;  %v3126_v5 = vcombine.high %v3115_v31, %v3122_v44  ;;  %2923 = vmatprep.mubr.bf16.mxu0 %v2429_v46  ;;  %v942_v30 = vcombine.high %v10448_v42, %v10448_v42  ;;  %v3159_v3 = vcombine.low %v10448_v42, %v940_v37 }
 0x102   : > { %v3140_v28 = vrot.slane %v3124_v63, %v10402_v60  ;;  %v11324_v13 = vrot.slane %v3123_v10, %v10402_v60  ;;  %v854_v0 = vcombine.low %v11213_v62, %v600_v4  ;;  %v3161_v24 = vcombine.low %v10451_v43, %v941_v58 }
 0x103   : > { %v3154_v12 = vrot.slane %v3126_v5, %v10402_v60  ;;  %v11330_v52 = vrot.slane %v3125_v17, %v10402_v60  ;;  %v3160_v32 = vcombine.low %v942_v30, %v10445_v41  ;;  %v11334_v25 = vrot.slane %v3159_v3, %v10402_v60 }
 0x104   : > { %v861_v42 = vrot.slane %v854_v0, %v10402_v60  ;;  %v3189_v29 = vrot.slane %v3161_v24, %v10402_v60  ;;  %v2427_v31 = vcombine.low %v11062_v27, %v11072_v14  ;;  %v2463_v62 = vcombine.high %v11107_v21, %v11116_v2  ;;  %v9840_v14 = vld [vmem:[%s14110_s1 + $0x230] sm:$0xff]  }
 0x105   : > { %v3157_v44 = vcombine.low %v3140_v28, %v3154_v12  ;;  %v3155_v5 = vcombine.low %v11324_v13, %v11330_v52  ;;  %v3182_v46 = vrot.slane %v3160_v32, %v10402_v60  ;;  %v2465_v41 = vcombine.high %v11125_v61, %v11137_v47 }
 0x106   : > { %v869_v37 = vcombine.low %v861_v42, %v868_v20  ;;  %2924 = vmatmul.mubr.bf16.gmra.mxu0 %v2427_v31  ;;  %v2479_v10 = vrot.slane %v2463_v62, %v10402_v60  ;;  %v943_v63 = vcombine.high %v10451_v43, %v10451_v43  ;;  %v3226_v27 = vcombine.low %v10462_v53, %v10468_v55 }
 0x107   : > { %4064 = vmatprep.mubr.bf16.mxu1 %v3157_v44  ;;  %v3193_v21 = vcombine.high %v3182_v46, %v3189_v29  ;;  %v3192_v2 = vcombine.low %v3182_v46, %v3189_v29  ;;  %v2493_v4 = vrot.slane %v2465_v41, %v10402_v60  ;;  %v8578_v61 = vcombine.high %v10462_v53, %v10468_v55  ;;  %v9936_v53 = vld [vmem:[%s14110_s1 + $0x238] sm:$0xff]   ;;  %v9842_v29 = vld [vmem:[%s14110_s1 + $0x228] sm:$0xff]  }
 0x108   : > { %4065 = vmatmul.mubr.bf16.vlgmr.msra.gmra.mxu1 %v3155_v5  ;;  %v876_v47 = vrot.slane %v869_v37, %v10402_v60  ;;  %v3225_v43 = vcombine.low %v943_v63, %v10435_v36  ;;  %v3228_v20 = vcombine.low %v10465_v54, %v10471_v56  ;;  %v11363_v58 = vrot.slane %v3226_v27, %v10402_v60 }
 0x109   : > { %v3221_v17 = vrot.slane %v3193_v21, %v10402_v60  ;;  %v11367_v30 = vrot.slane %v3192_v2, %v10402_v60  ;;  %v2496_v3 = vcombine.low %v2479_v10, %v2493_v4  ;;  %v11370_v28 = vrot.slane %v8578_v61, %v10402_v60  ;;  %9582 = vmatpush3.bf16.msra.mxu1 %v9936_v53  ;;  %v14258_v4 = vld [vmem:[#allocation12_spill] sm:$0xff] }
 0x10a   : > { %v3158_v36 = vcombine.low %v876_v47, %v10442_v40  ;;  %v3235_v55 = vrot.slane %v3225_v43, %v10402_v60  ;;  %v11378_v0 = vrot.slane %v3228_v20, %v10402_v60  ;;  %v2494_v24 = vcombine.low %v11149_v59, %v11170_v23  ;;  %9583 = vmatprep.subr.bf16.mxu1 %v9840_v14 }
 0x10b   : > { %2931 = vmatprep.mubr.bf16.mxu0 %v2496_v3  ;;  %v2530_v12 = vcombine.high %v11164_v11, %v11167_v45  ;;  %v2532_v32 = vcombine.high %v11173_v1, %v11176_v39  ;;  %v1120_v42 = vcombine.high %v10571_v33, %v10571_v33  ;;  %v1122_v40 = vcombine.high %v10577_v38, %v10577_v38 }
 0x10c   : > { %v3168_v59 = vrot.slane %v3158_v36, %v10402_v60  ;;  %v3258_v23 = vcombine.high %v3235_v55, %v11363_v58  ;;  %v3260_v11 = vcombine.high %v11370_v28, %v11378_v0  ;;  %v3257_v45 = vcombine.low %v3235_v55, %v11363_v58 }
 0x10d   : > { %v3259_v1 = vcombine.low %v11370_v28, %v11378_v0  ;;  %v2546_v39 = vrot.slane %v2530_v12, %v10402_v60  ;;  %v2560_v31 = vrot.slane %v2532_v32, %v10402_v60  ;;  %v8579_v62 = vcombine.high %v10465_v54, %v10471_v56  ;;  %9584 = vmatpush3.bf16.msra.mxu1 %v9840_v14  ;;  %v9846_v54 = vld [vmem:[%s14110_s1 + $0x220] sm:$0xff]  }
 0x10e   : > { %v3191_v44 = vcombine.high %v3168_v59, %v11334_v25  ;;  %v3190_v5 = vcombine.low %v3168_v59, %v11334_v25  ;;  %v3274_v46 = vrot.slane %v3258_v23, %v10402_v60  ;;  %v3288_v41 = vrot.slane %v3260_v11, %v10402_v60  ;;  %2932 = vmatmul.mubr.bf16.gmra.mxu0 %v2494_v24  ;;  %v14260_v24 = vld [vmem:[#allocation42_spill] sm:$0xff]  ;;  %v14261_v23 = vld [vmem:[#allocation15_spill] sm:$0xff] }
 0x10f   : > { %v1303_v37 = vcombine.high %v10809_v6, %v10809_v6  ;;  %v1483_v10 = vcombine.high %v11008_v7, %v11008_v7  ;;  %v2563_v63 = vcombine.low %v2546_v39, %v2560_v31  ;;  %v3294_v27 = vcombine.low %v10577_v38, %v1120_v42  ;;  %9585 = vmatprep.subr.bf16.mxu1 %v9842_v29  ;;  %v14262_v11 = vld [vmem:[#allocation14_spill] sm:$0xff] }
 0x110   : > { %v3207_v56 = vrot.slane %v3191_v44, %v10402_v60  ;;  %v11418_v25 = vrot.slane %v3190_v5, %v10402_v60  ;;  %v11421_v14 = vrot.slane %v3257_v45, %v10402_v60  ;;  %v3295_v21 = vcombine.low %v1122_v40, %v10574_v34 }
 0x111   : > { %v11425_v2 = vrot.slane %v3259_v1, %v10402_v60  ;;  %2939 = vmatprep.mubr.bf16.mxu0 %v2563_v63  ;;  %v11428_v38 = vrot.slane %v8579_v62, %v10402_v60  ;;  %v14259_v61 = vcombine.low %v14258_v4, %v10571_v33  ;;  %v11437_v43 = vrot.slane %v3294_v27, %v10402_v60  ;;  %v14263_v1 = vld [vmem:[#allocation13_spill] sm:$0xff] }
 0x112   : > { %v3224_v20 = vcombine.low %v3207_v56, %v3221_v17  ;;  %v3222_v3 = vcombine.low %v11418_v25, %v11367_v30  ;;  %v3291_v53 = vcombine.low %v3274_v46, %v3288_v41  ;;  %v11442_v36 = vrot.slane %v3295_v21, %v10402_v60  ;;  %9586 = vmatpush3.bf16.msra.mxu1 %v9842_v29  ;;  %v9851_v29 = vld [vmem:[%s14110_s1 + $0x218] sm:$0xff]   ;;  %v14264_v62 = vld [vmem:[#allocation33_spill] sm:$0xff] }
 0x113   : > { %v11434_v47 = vrot.slane %v14259_v61, %v10402_v60  ;;  %v2561_v33 = vcombine.low %v14260_v24, %v11193_v16  ;;  %v2597_v17 = vcombine.high %v11261_v50, %v11268_v22  ;;  %9587 = vmatprep.subr.bf16.mxu1 %v9846_v54  ;;  %v2599_v40 = vcombine.high %v11271_v49, %v11274_v18  ;;  %v9856_v56 = vld [vmem:[%s14110_s1 + $0x210] sm:$0xff]   ;;  %v14265_v61 = vld [vmem:[#allocation19_spill] sm:$0xff] }
 0x114   : > { %4072 = vmatprep.mubr.bf16.mxu1 %v3224_v20  ;;  %v3327_v32 = vcombine.high %v11437_v43, %v11442_v36  ;;  %v3326_v42 = vcombine.low %v11437_v43, %v11442_v36  ;;  %v1121_v16 = vcombine.high %v10574_v34, %v10574_v34  ;;  %v3289_v50 = vcombine.low %v11421_v14, %v11425_v2 }
 0x115   : > { %v3325_v55 = vcombine.high %v11428_v38, %v11434_v47  ;;  %v3324_v12 = vcombine.low %v11428_v38, %v11434_v47  ;;  %4073 = vmatmul.mubr.bf16.gmra.mxu1 %v3222_v3  ;;  %v2613_v59 = vrot.slane %v2597_v17, %v10402_v60  ;;  %v3361_v45 = vcombine.low %v14262_v11, %v14261_v23  ;;  %v14266_v3 = vld [vmem:[#allocation17_spill] sm:$0xff] }
 0x116   : > { %4080 = vmatprep.mubr.bf16.mxu1 %v3291_v53  ;;  %v3355_v49 = vrot.slane %v3327_v32, %v10402_v60  ;;  %2940 = vmatmul.mubr.bf16.gmra.mxu0 %v2561_v33  ;;  %v2627_v18 = vrot.slane %v2599_v40, %v10402_v60  ;;  %v3359_v39 = vcombine.low %v14263_v1, %v1121_v16  ;;  %v14274_v1 = vld [vmem:[#allocation27_spill] sm:$0xff] }
 0x117   : > { %v3341_v22 = vrot.slane %v3325_v55, %v10402_v60  ;;  %v11471_v34 = vrot.slane %v3324_v12, %v10402_v60  ;;  %v8580_v31 = vcombine.high %v14262_v11, %v14261_v23  ;;  %v11479_v44 = vrot.slane %v14264_v62, %v10402_v60  ;;  %9588 = vmatpush3.bf16.msra.mxu1 %v9846_v54  ;;  %v14268_v55 = vld [vmem:[#allocation18_spill] sm:$0xff]  ;;  %v14270_v12 = vld [vmem:[#allocation21_spill] sm:$0xff] }
 0x118   : > { %v11482_v5 = vrot.slane %v3361_v45, %v10402_v60  ;;  %v11485_v41 = vrot.slane %v3326_v42, %v10402_v60  ;;  %v2630_v63 = vcombine.low %v2613_v59, %v2627_v18  ;;  %v2628_v27 = vcombine.low %v11295_v51, %v11298_v26  ;;  %9589 = vmatprep.subr.bf16.mxu1 %v9851_v29  ;;  %v14267_v51 = vld [vmem:[#allocation16_spill] sm:$0xff]  ;;  %v14272_v45 = vld [vmem:[#allocation22_spill] sm:$0xff] }
 0x119   : > { %v3358_v46 = vcombine.low %v3341_v22, %v3355_v49  ;;  %v11493_v21 = vrot.slane %v3359_v39, %v10402_v60  ;;  %v11496_v4 = vrot.slane %v8580_v31, %v10402_v60  ;;  %v2639_v54 = vcombine.high %v11278_v19, %v11278_v19  ;;  %v14271_v22 = vld [vmem:[#allocation20_spill] sm:$0xff] }
 0x11a   : > { %v1300_v20 = vcombine.high %v14265_v61, %v14265_v61  ;;  %2947 = vmatprep.mubr.bf16.mxu0 %v2630_v63  ;;  %v3426_v26 = vcombine.low %v14267_v51, %v14266_v3  ;;  %v8581_v53 = vcombine.high %v14267_v51, %v14266_v3  ;;  %v14269_v24 = vcombine.low %v14268_v55, %v14265_v61  ;;  %v14273_v18 = vld [vmem:[#allocation28_spill] sm:$0xff] }
 0x11b   : > { %v1301_v17 = vcombine.high %v14270_v12, %v14270_v12  ;;  %v3392_v19 = vcombine.high %v11493_v21, %v11479_v44  ;;  %v3394_v32 = vcombine.high %v11482_v5, %v11496_v4  ;;  %v3391_v42 = vcombine.low %v11493_v21, %v11479_v44  ;;  %9590 = vmatpush3.bf16.msra.mxu1 %v9851_v29  ;;  %v14275_v29 = vld [vmem:[#allocation31_spill] sm:$0xff]  ;;  %v9861_v63 = vld [vmem:[%s14110_s1 + $0x208] sm:$0xff]  }
 0x11c   : > { %v11510_v33 = vrot.slane %v14269_v24, %v10402_v60  ;;  %v3393_v40 = vcombine.low %v11482_v5, %v11496_v4  ;;  %v2653_v16 = vrot.slane %v2639_v54, %v10402_v60  ;;  %v3429_v59 = vcombine.low %v14271_v22, %v1300_v20  ;;  %9591 = vmatprep.subr.bf16.mxu1 %v9856_v56  ;;  %v14276_v55 = vld [vmem:[#allocation24_spill] sm:$0xff]  ;;  %v14277_v24 = vld [vmem:[#allocation23_spill] sm:$0xff] }
 0x11d   : > { %v11525_v23 = vrot.slane %v3426_v26, %v10402_v60  ;;  %v11528_v11 = vrot.slane %v8581_v53, %v10402_v60  ;;  %v3495_v49 = vcombine.low %v1303_v37, %v14272_v45  ;;  %v3563_v39 = vcombine.low %v14274_v1, %v14273_v18  ;;  %4081 = vmatmul.mubr.bf16.gmra.mxu1 %v3289_v50 }
 0x11e   : > { %v11540_v31 = vcombine.low %v1483_v10, %v14275_v29  ;;  %v3408_v62 = vrot.slane %v3392_v19, %v10402_v60  ;;  %4088 = vmatprep.mubr.bf16.mxu1 %v3358_v46  ;;  %v3422_v54 = vrot.slane %v3394_v32, %v10402_v60  ;;  %2948 = vmatmul.mubr.bf16.gmra.mxu0 %v2628_v27 }
 0x11f   : > { %v11548_v37 = vrot.slane %v3429_v59, %v10402_v60  ;;  %v3459_v61 = vcombine.high %v11525_v23, %v11528_v11  ;;  %v3356_v10 = vcombine.low %v11471_v34, %v11485_v41  ;;  %v11555_v50 = vrot.slane %v3391_v42, %v10402_v60  ;;  %2955 = vmatprep.mubr.bf16.mxu0 %v2653_v16  ;;  %v14279_v59 = vld [vmem:[#allocation25_spill] sm:$0xff] }
 0x120   : > { %v1302_v20 = vcombine.high %v14271_v22, %v14271_v22  ;;  %v3494_v46 = vcombine.low %v10809_v6, %v1301_v17  ;;  %v11561_v27 = vrot.slane %v3393_v40, %v10402_v60  ;;  %v3458_v51 = vcombine.low %v11525_v23, %v11528_v11  ;;  %9592 = vmatpush3.bf16.msra.mxu1 %v9856_v56  ;;  %v14278_v22 = vld [vmem:[#allocation26_spill] sm:$0xff] }
 0x121   : > { %v3461_v3 = vcombine.high %v11510_v33, %v11548_v37  ;;  %v3460_v26 = vcombine.low %v11510_v33, %v11548_v37  ;;  %v3496_v19 = vcombine.low %v14277_v24, %v14276_v55  ;;  %v11576_v17 = vrot.slane %v3495_v49, %v10402_v60  ;;  %9593 = vmatprep.subr.bf16.mxu1 %v9861_v63 }
 0x122   : > { %v3493_v53 = vcombine.low %v1302_v20, %v14270_v12  ;;  %v11573_v6 = vrot.slane %v3494_v46, %v10402_v60  ;;  %v3425_v32 = vcombine.low %v3408_v62, %v3422_v54  ;;  %v3475_v42 = vrot.slane %v3459_v61, %v10402_v60  ;;  %v9863_v62 = vld [vmem:[%s14110_s1 + $0x200] sm:$0xff]  }
 0x123   : > { %v3156_v40 = vcombine.high %v11324_v13, %v11330_v52  ;;  %v8582_v56 = vcombine.high %v14277_v24, %v14276_v55  ;;  %v11587_v16 = vrot.slane %v3496_v19, %v10402_v60  ;;  %v3561_v45 = vcombine.low %v14279_v59, %v14278_v22 }
 0x124   : > { %v11584_v12 = vrot.slane %v3493_v53, %v10402_v60  ;;  %v8583_v49 = vcombine.high %v14279_v59, %v14278_v22  ;;  %v3489_v1 = vrot.slane %v3461_v3, %v10402_v60  ;;  %v11595_v29 = vrot.slane %v3458_v51, %v10402_v60  ;;  %9594 = vmatpush3.bf16.msra.mxu1 %v9861_v63  ;;  %v14280_v3 = vld [vmem:[#allocation38_spill] sm:$0xff]  ;;  %v14281_v51 = vld [vmem:[#allocation37_spill] sm:$0xff] }
 0x125   : > { %v11598_v13 = vrot.slane %v8582_v56, %v10402_v60  ;;  %v11601_v52 = vrot.slane %v3563_v39, %v10402_v60  ;;  %4089 = vmatmul.mubr.bf16.gmra.mxu1 %v3356_v10  ;;  %v11607_v54 = vrot.slane %v3460_v26, %v10402_v60  ;;  %v3528_v20 = vcombine.high %v11576_v17, %v11587_v16 }
 0x126   : > { %v3526_v61 = vcombine.high %v11584_v12, %v11573_v6  ;;  %v3525_v46 = vcombine.low %v11584_v12, %v11573_v6  ;;  %4096 = vmatprep.mubr.bf16.mxu1 %v3425_v32  ;;  %2956 = vmatmul.mubr.bf16.gmra.mxu0 %v11288_v15  ;;  %v3527_v39 = vcombine.low %v11576_v17, %v11587_v16 }
 0x127   : > { %v11619_v63 = vrot.slane %v3561_v45, %v10402_v60  ;;  %v11622_v10 = vrot.slane %v8583_v49, %v10402_v60  ;;  %v3223_v53 = vcombine.high %v11418_v25, %v11367_v30  ;;  %v11632_v15 = vrot.slane %v3528_v20, %v10402_v60  ;;  %9557 = vmatprep.mubr.bf16.mxu0 %v3156_v40  ;;  %v14283_v20 = vld [vmem:[#allocation29_spill] sm:$0xff] }
 0x128   : > { %v11629_v55 = vrot.slane %v3526_v61, %v10402_v60  ;;  %9595 = vmatprep.subr.bf16.mxu1 %v9863_v62  ;;  %v3423_v30 = vcombine.low %v11555_v50, %v11561_v27  ;;  %v3492_v25 = vcombine.low %v3475_v42, %v3489_v1  ;;  %v3490_v40 = vcombine.low %v11595_v29, %v11607_v54  ;;  %v9844_v42 = vld [vmem:[%s14110_s1 + $0x1b8] sm:$0xff]  }
 0x129   : > { %v3593_v24 = vcombine.high %v11598_v13, %v11619_v63  ;;  %v3595_v19 = vcombine.high %v11622_v10, %v11601_v52  ;;  %v3592_v32 = vcombine.low %v11598_v13, %v11619_v63  ;;  %v3594_v56 = vcombine.low %v11622_v10, %v11601_v52  ;;  %9596 = vmatpush3.bf16.msra.mxu1 %v9863_v62 }
 0x12a   : > { %v1480_v22 = vcombine.high %v14273_v18, %v14273_v18  ;;  %v3559_v59 = vcombine.low %v11629_v55, %v11632_v15  ;;  %v11651_v45 = vrot.slane %v3525_v46, %v10402_v60  ;;  %v11654_v49 = vrot.slane %v3527_v39, %v10402_v60  ;;  %v14282_v18 = vld [vmem:[#allocation30_spill] sm:$0xff]  ;;  %v9845_v39 = vld [vmem:[%s14110_s1 + $0x1f0] sm:$0xff]  }
 0x12b   : > { %v3290_v61 = vcombine.high %v11421_v14, %v11425_v2  ;;  %v11662_v1 = vrot.slane %v3593_v24, %v10402_v60  ;;  %v1481_v62 = vcombine.high %v14282_v18, %v14282_v18  ;;  %v1482_v46 = vcombine.high %v14283_v20, %v14283_v20 }
 0x12c   : > { %v3627_v55 = vcombine.low %v14283_v20, %v1480_v22  ;;  %v11673_v14 = vrot.slane %v3595_v19, %v10402_v60  ;;  %v11676_v2 = vrot.slane %v3592_v32, %v10402_v60  ;;  %v11679_v15 = vrot.slane %v3594_v56, %v10402_v60  ;;  %v14284_v19 = vld [vmem:[#allocation34_spill] sm:$0xff]  ;;  %v14286_v56 = vld [vmem:[#allocation36_spill] sm:$0xff] }
 0x12d   : > { %v11683_v24 = vrot.slane %v11540_v31, %v10402_v60  ;;  %4097 = vmatmul.mubr.bf16.gmra.mxu1 %v3423_v30  ;;  %v3628_v22 = vcombine.low %v1482_v46, %v14282_v18  ;;  %v3629_v20 = vcombine.low %v11008_v7, %v1481_v62  ;;  %v3694_v8 = vcombine.low %v14285_v35, %v14284_v19  ;;  %v9847_v7 = vld [vmem:[%s14110_s1 + $0x1b0] sm:$0xff]  }
 0x12e   : > { %v11688_v26 = vrot.slane %v3627_v55, %v10402_v60  ;;  %4104 = vmatprep.mubr.bf16.mxu1 %v3492_v25  ;;  %9558 = vmatmul.mubr.bf16.vlgmr.msra.gmra.mxu0 %v3223_v53  ;;  %v8584_v32 = vcombine.high %v14285_v35, %v14284_v19  ;;  %v3696_v31 = vcombine.low %v14287_v48, %v14286_v56 }
 0x12f   : > { %v8585_v30 = vcombine.high %v14287_v48, %v14286_v56  ;;  %9154 = vmatpush3.bf16.msra.mxu0 %v9844_v42  ;;  %9561 = vmatprep.mubr.bf16.mxu0 %v3290_v61  ;;  %v11702_v18 = vrot.slane %v3628_v22, %v10402_v60  ;;  %v11705_v53 = vrot.slane %v3629_v20, %v10402_v60  ;;  %v9848_v48 = vld [vmem:[%s14110_s1 + $0x1e8] sm:$0xff]  }
 0x130   : > { %v11708_v35 = vrot.slane %v3694_v8, %v10402_v60  ;;  %9155 = vmatprep.subr.bf16.mxu0 %v9845_v39  ;;  %v11716_v61 = vrot.slane %v8584_v32, %v10402_v60  ;;  %v11719_v42 = vrot.slane %v3696_v31, %v10402_v60  ;;  %v3357_v22 = vcombine.high %v11471_v34, %v11485_v41  ;;  %v9849_v34 = vld [vmem:[%s14110_s1 + $0x1a8] sm:$0xff]  }
 0x131   : > { %v11722_v62 = vrot.slane %v8585_v30, %v10402_v60  ;;  %v3660_v8 = vcombine.high %v11688_v26, %v11702_v18  ;;  %v3662_v46 = vcombine.high %v11705_v53, %v11683_v24  ;;  %v3659_v55 = vcombine.low %v11688_v26, %v11702_v18 }
 0x132   : > { %v3661_v39 = vcombine.low %v11705_v53, %v11683_v24  ;;  %v3727_v20 = vcombine.high %v11708_v35, %v11716_v61  ;;  %v3726_v32 = vcombine.low %v11708_v35, %v11716_v61  ;;  %v3626_v56 = vcombine.low %v11662_v1, %v11673_v14  ;;  %v9850_v14 = vld [vmem:[%s14110_s1 + $0x1e0] sm:$0xff]  }
 0x133   : > { %14288 = vst [vmem:[#allocation12_spill] sm:$0xff] %v11722_v62  ;;  %v3729_v19 = vcombine.high %v11719_v42, %v11722_v62  ;;  %9156 = vmatpush3.bf16.msra.mxu0 %v9847_v7  ;;  %v3424_v41 = vcombine.high %v11555_v50, %v11561_v27  ;;  %v3491_v30 = vcombine.high %v11595_v29, %v11607_v54 }
 0x134   : > { %9157 = vmatprep.subr.bf16.mxu0 %v9848_v48  ;;  %v11752_v25 = vrot.slane %v3660_v8, %v10402_v60  ;;  %v11755_v1 = vrot.slane %v3662_v46, %v10402_v60  ;;  %v3558_v7 = vcombine.high %v11651_v45, %v11654_v49  ;;  %v3728_v50 = vcombine.low %v11719_v42, %v11722_v62 }
 0x135   : > { %4105 = vmatmul.mubr.bf16.gmra.mxu1 %v3490_v40  ;;  %v11765_v27 = vrot.slane %v3659_v55, %v10402_v60  ;;  %v11768_v29 = vrot.slane %v3661_v39, %v10402_v60  ;;  %v11771_v54 = vrot.slane %v3727_v20, %v10402_v60  ;;  %v1660_v48 = vcombine.high %v14280_v3, %v14280_v3  ;;  %v14289_v40 = vld [vmem:[#allocation40_spill] sm:$0xff]  ;;  %v9852_v39 = vld [vmem:[%s14110_s1 + $0x1a0] sm:$0xff]  }
 0x136   : > { %4112 = vmatprep.mubr.bf16.mxu1 %v3559_v59  ;;  %9562 = vmatmul.mubr.bf16.gmra.mxu0 %v3357_v22  ;;  %v11776_v8 = vrot.slane %v3729_v19, %v10402_v60  ;;  %v11779_v46 = vrot.slane %v3726_v32, %v10402_v60  ;;  %v1661_v55 = vcombine.high %v14289_v40, %v14289_v40  ;;  %v14290_v20 = vld [vmem:[#allocation39_spill] sm:$0xff] }
 0x137   : > { %9158 = vmatpush3.bf16.msra.mxu0 %v9849_v34  ;;  %9565 = vmatprep.mubr.bf16.mxu0 %v3424_v41  ;;  %v1662_v31 = vcombine.high %v14290_v20, %v14290_v20  ;;  %v3762_v59 = vcombine.low %v14290_v20, %v1660_v48  ;;  %v14291_v22 = vcombine.low %v14281_v51, %v14280_v3  ;;  %v9853_v41 = vld [vmem:[%s14110_s1 + $0x1d8] sm:$0xff]  }
 0x138   : > { %v3693_v32 = vcombine.low %v11752_v25, %v11755_v1  ;;  %9159 = vmatprep.subr.bf16.mxu0 %v9850_v14  ;;  %v11798_v34 = vrot.slane %v3728_v50, %v10402_v60  ;;  %v3764_v62 = vcombine.low %v14292_v9, %v1661_v55  ;;  %v1663_v48 = vcombine.high %v14292_v9, %v14292_v9 }
 0x139   : > { %v11793_v19 = vrot.slane %v14291_v22, %v10402_v60  ;;  %v3763_v3 = vcombine.low %v1662_v31, %v14289_v40  ;;  %v11808_v51 = vrot.slane %v3762_v59, %v10402_v60  ;;  %v4448_v14 = vcombine.high %v11363_v58, %v11370_v28  ;;  %v9854_v40 = vld [vmem:[%s14110_s1 + $0x198] sm:$0xff]  }
 0x13a   : > { %v4450_v50 = vcombine.high %v11378_v0, %v11428_v38  ;;  %v11815_v20 = vrot.slane %v3764_v62, %v10402_v60  ;;  %v3828_v22 = vcombine.low %v1663_v48, %v11218_v57  ;;  %v4447_v55 = vcombine.low %v11363_v58, %v11370_v28  ;;  %v9855_v58 = vld [vmem:[%s14110_s1 + $0x1d0] sm:$0xff]  }
 0x13b   : > { %v4449_v9 = vcombine.low %v11378_v0, %v11428_v38  ;;  %9160 = vmatpush3.bf16.msra.mxu0 %v9852_v39  ;;  %v11828_v59 = vrot.slane %v3763_v3, %v10402_v60  ;;  %v3793_v57 = vcombine.low %v11793_v19, %v11808_v51  ;;  %v11833_v62 = vrot.slane %v4448_v14, %v10402_v60 }
 0x13c   : > { %9161 = vmatprep.subr.bf16.mxu0 %v9853_v41  ;;  %v3794_v28 = vcombine.high %v11793_v19, %v11808_v51  ;;  %v11841_v0 = vrot.slane %v4450_v50, %v10402_v60  ;;  %v11844_v38 = vrot.slane %v4447_v55, %v10402_v60  ;;  %v14293_v48 = vcombine.low %v11651_v45, %v11654_v49 }
 0x13d   : > { %v11847_v39 = vrot.slane %v4449_v9, %v10402_v60  ;;  %v3625_v41 = vcombine.high %v11676_v2, %v11679_v15  ;;  %v3796_v3 = vcombine.high %v11828_v59, %v11815_v20  ;;  %v3795_v14 = vcombine.low %v11828_v59, %v11815_v20  ;;  %v9857_v9 = vld [vmem:[%s14110_s1 + $0x190] sm:$0xff]  }
 0x13e   : > { %4113 = vmatmul.mubr.bf16.gmra.mxu1 %v14293_v48  ;;  %v11859_v50 = vrot.slane %v3828_v22, %v10402_v60  ;;  %9566 = vmatmul.mubr.bf16.gmra.mxu0 %v3491_v30  ;;  %v3692_v45 = vcombine.high %v11765_v27, %v11768_v29  ;;  %v11871_v22 = vrot.slane %v3793_v57, %v10402_v60 }
 0x13f   : > { %4120 = vmatprep.mubr.bf16.mxu1 %v3626_v56  ;;  %9569 = vmatprep.mubr.bf16.mxu0 %v3558_v7  ;;  %v11874_v56 = vrot.slane %v3795_v14, %v10402_v60  ;;  %v11879_v48 = vrot.slane %v3794_v28, %v10402_v60  ;;  %v4482_v14 = vcombine.low %v11434_v47, %v11437_v43 }
 0x140   : > { %9162 = vmatpush3.bf16.msra.mxu0 %v9854_v40  ;;  %v9858_v40 = vld [vmem:[%s14110_s1 + $0x1c8] sm:$0xff]   ;;  %v11891_v49 = vrot.slane %v3796_v3, %v10402_v60  ;;  %v11897_v28 = vrot.slane %v11859_v50, %v10402_v60  ;;  %v4484_v30 = vcombine.low %v11442_v36, %v11493_v21  ;;  %v4483_v57 = vcombine.high %v11434_v47, %v11437_v43 }
 0x141   : > { %9163 = vmatprep.subr.bf16.mxu0 %v9855_v58  ;;  %v11902_v7 = vrot.slane %v4482_v14, %v10402_v60  ;;  %v4485_v3 = vcombine.high %v11442_v36, %v11493_v21  ;;  %v4518_v55 = vcombine.high %v11479_v44, %v11482_v5  ;;  %v9859_v58 = vld [vmem:[%s14110_s1 + $0x188] sm:$0xff]   ;;  %v4520_v14 = vcombine.high %v11496_v4, %v11525_v23  ;;  %v9860_v36 = vld [vmem:[%s14110_s1 + $0x1c0] sm:$0xff]  }
 0x142   : > { %v11914_v31 = vrot.slane %v4484_v30, %v10402_v60  ;;  %v4517_v47 = vcombine.low %v11479_v44, %v11482_v5  ;;  %v4519_v43 = vcombine.low %v11496_v4, %v11525_v23  ;;  %v11926_v21 = vrot.slane %v4483_v57, %v10402_v60 }
 0x143   : > { %v11932_v30 = vrot.slane %v4518_v55, %v10402_v60  ;;  %v4552_v44 = vcombine.low %v11528_v11, %v11510_v33  ;;  %v14294_v4 = vcombine.low %v11676_v2, %v11679_v15  ;;  %v11946_v57 = vrot.slane %v4520_v14, %v10402_v60  ;;  %v9862_v14 = vld [vmem:[%s14110_s1 + $0x180] sm:$0xff]  }
 0x144   : > { %9164 = vmatpush3.bf16.msra.mxu0 %v9857_v9  ;;  %v11929_v9 = vrot.slane %v4485_v3, %v10402_v60  ;;  %v11949_v55 = vrot.slane %v4517_v47, %v10402_v60  ;;  %v11957_v15 = vrot.slane %v4519_v43, %v10402_v60  ;;  %v4554_v3 = vcombine.low %v11548_v37, %v11584_v12 }
 0x145   : > { %9165 = vmatprep.subr.bf16.mxu0 %v9858_v40  ;;  %v4514_v40 = vcombine.low %v11902_v7, %v11914_v31  ;;  %v11967_v1 = vrot.slane %v4552_v44, %v10402_v60  ;;  %v4555_v47 = vcombine.high %v11548_v37, %v11584_v12  ;;  %v4589_v12 = vcombine.low %v11587_v16, %v11598_v13 }
 0x146   : > { %4121 = vmatmul.mubr.bf16.gmra.mxu1 %v14294_v4  ;;  %9570 = vmatmul.mubr.bf16.gmra.mxu0 %v3625_v41  ;;  %v4516_v2 = vcombine.low %v11926_v21, %v11929_v9  ;;  %v4658_v37 = vcombine.high %v11702_v18, %v11705_v53 }
 0x147   : > { %4128 = vmatprep.mubr.bf16.mxu1 %v3693_v32  ;;  %9573 = vmatprep.mubr.bf16.mxu0 %v3692_v45  ;;  %v4553_v32 = vcombine.high %v11528_v11, %v11510_v33  ;;  %v4588_v33 = vcombine.high %v11573_v6, %v11576_v17  ;;  %v4590_v11 = vcombine.high %v11587_v16, %v11598_v13 }
 0x148   : > { %v11936_v5 = vpop.f32.mrf.mxu0  ;;  %9166 = vmatpush3.bf16.msra.mxu0 %v9859_v58  ;;  %v11976_v58 = vrot.slane %v4554_v3, %v10402_v60  ;;  %v11994_v45 = vrot.slane %v4555_v47, %v10402_v60  ;;  %v4622_v47 = vcombine.low %v11619_v63, %v11622_v10  ;;  %v12016_v16 = vrot.slane %v4589_v12, %v10402_v60 }
 0x149   : > { %9167 = vmatprep.subr.bf16.mxu0 %v9860_v36  ;;  %v11983_v44 = vrot.slane %v4553_v32, %v10402_v60  ;;  %v4587_v36 = vcombine.low %v11573_v6, %v11576_v17  ;;  %v12003_v41 = vrot.slane %v4588_v33, %v10402_v60  ;;  %v12006_v6 = vrot.slane %v4590_v11, %v10402_v60 }
 0x14a   : > { %v8954_v4 = vpop.f32.mrf.mxu0  ;;  %v4624_v13 = vcombine.low %v11601_v52, %v11688_v26  ;;  %v14295_v11 = vcombine.low %v11765_v27, %v11768_v29  ;;  %v12028_v3 = vrot.slane %v4622_v47, %v10402_v60  ;;  %v4625_v12 = vcombine.high %v11601_v52, %v11688_v26 }
 0x14b   : > { %v12009_v17 = vrot.slane %v4587_v36, %v10402_v60  ;;  %v14298_v26 = vcombine.high %v11871_v22, %v11874_v56  ;;  %v3851_v29 = vcombine.high %v11897_v28, %v11897_v28 }
 0x14c   : > { %v11980_v43 = vpop.f32.mrf.mxu0  ;;  %9168 = vmatpush3.bf16.msra.mxu0 %v9862_v14  ;;  %v4623_v14 = vcombine.high %v11619_v63, %v11622_v10  ;;  %v14296_v63 = vcombine.low %v11771_v54, %v11776_v8  ;;  %v14297_v10 = vcombine.high %v11779_v46, %v11798_v34  ;;  %v12045_v47 = vrot.slane %v4624_v13, %v10402_v60 }
 0x14d   : > { %v12054_v8 = vrot.slane %v4625_v12, %v10402_v60  ;;  %v8955_v13 = vadd.f32 %v8954_v4, %v11936_v5  ;;  %v3836_v5 = vcombine.high %v11859_v50, %v11859_v50 }
 0x14e   : > { %v12000_v32 = vpop.f32.mrf.mxu0  ;;  %4129 = vmatmul.mubr.bf16.gmra.mxu1 %v14295_v11  ;;  %9574 = vmatmul.mubr.bf16.gmra.mxu0 %v14297_v10  ;;  %v12051_v54 = vrot.slane %v4623_v14, %v10402_v60  ;;  %v4660_v11 = vcombine.high %v11683_v24, %v11708_v35  ;;  %v9519_v10 = vpop.f32.mrf.mxu1  ;;  %v3758_v14 = vcombine.low %v11779_v46, %v11798_v34 }
 0x14f   : > { %4136 = vmatprep.mubr.bf16.mxu1 %v14296_v63  ;;  %9577 = vmatprep.mubr.bf16.mxu0 %v14298_v26  ;;  %v12059_v63 = vrot.slane %v4658_v37, %v10402_v60  ;;  %v3827_v37 = vcombine.low %v11879_v48, %v11891_v49  ;;  %v4693_v46 = vcombine.high %v11716_v61, %v11719_v42 }
 0x150   : > { %v8959_v33 = vpop.f32.mrf.mxu0  ;;  %v12070_v36 = vrot.slane %v4660_v11, %v10402_v60  ;;  %v2997_v23 = vpop.f32.mrf.mxu1  ;;  %v14299_v11 = vld [vmem:[#allocation12_spill] sm:$0xff] }
 0x151   : > { %v12081_v12 = vadd.f32 %v8955_v13, %v2997_v23  ;;  %v4695_v49 = vcombine.high %v14299_v11, %v11793_v19  ;;  %v12086_v48 = vrot.slane %v4693_v46, %v10402_v60  ;;  %v14300_v23 = vcombine.low %v11833_v62, %v11841_v0 }
 0x152   : > { %v8960_v52 = vpop.f32.mrf.mxu0  ;;  %v9520_v13 = vpop.f32.mrf.mxu1  ;;  %v4728_v46 = vcombine.high %v11808_v51, %v11828_v59  ;;  %v3825_v62 = vcombine.low %v11871_v22, %v11874_v56 }
 0x153   : > { %v8961_v4 = vadd.f32 %v8960_v52, %v8959_v33  ;;  %v558_v33 = vld [vmem:[%s10218_s15 + $0x108] sm:$0xff]  ;;  %v559_v52 = vld [vmem:[%s10218_s15 + $0x110] sm:$0xff] }
 0x154   : > { %v8962_v26 = vpop.f32.mrf.mxu0 }
 0x155   : > { %v12100_v25 = vadd.f32 %v9519_v10, %v8961_v4  ;;  %v3850_v10 = vrot.slane %v3836_v5, %v10402_v60  ;;  %v583_v4 = vpack.c.bf16 %v559_v52, %v558_v33 }
 0x156   : > { %v8963_v34 = vpop.f32.mrf.mxu0  ;;  %4137 = vmatmul.mubr.bf16.gmra.mxu1 %v3758_v14  ;;  %9578 = vmatmul.mubr.bf16.gmra.mxu0 %v3851_v29  ;;  %v12094_v14 = vrot.slane %v4695_v49, %v10402_v60  ;;  %v560_v49 = vld [vmem:[%s10218_s15 + $0x118] sm:$0xf] }
 0x157   : > { %4144 = vmatprep.mubr.bf16.mxu1 %v3827_v37  ;;  %v8964_v27 = vadd.f32 %v8963_v34, %v8962_v26  ;;  %5132 = vmatprep.mubr.bf16.mxu0 %v14300_v23  ;;  %v4730_v37 = vcombine.high %v11815_v20, %v11859_v50  ;;  %v12111_v26 = vrot.slane %v4728_v46, %v10402_v60  ;;  %v4289_v22 = vshrl.u32 %v583_v4, 16 }
 0x158   : > { %v12120_v23 = vpack.c.bf16 %v560_v49, %v560_v49  ;;  %v4291_v56 = vshll.u32 %v583_v4, 16 }
 0x159   : > { %v12102_v29 = vadd.f32 %v9520_v13, %v8964_v27  ;;  %v12114_v34 = vrot.slane %v4730_v37, %v10402_v60  ;;  %v14301_v13 = vcombine.low %v11844_v38, %v11847_v39  ;;  %v4305_v37 = vrot.slane %v583_v4, 1 }
 0x15a   : > { %v4296_v46 = vshll.u32 %v12120_v23, 16  ;;  %v4293_v5 = vrot.slane %v4291_v56, 1  ;;  %v4306_v33 = vrot.slane %v12120_v23, 1 }
 0x15c   : > { %v4298_v52 = vrot.slane %v4296_v46, 1  ;;  %v4294_v49 = vor.u32 %v4293_v5, %v4289_v22  ;;  %v4307_v27 = vsel %vm14207_vm0, %v4305_v37, %v4306_v33  ;;  %v14303_v46 = vcombine.low %v11932_v30, %v11946_v57 }
 0x15d   : > { %v4310_v56 = vcombine.high %v4307_v27, %v4307_v27  ;;  %v14305_v30 = vcombine.low %v11949_v55, %v11957_v15  ;;  %v14306_v57 = vcombine.high %v11949_v55, %v11957_v15 }
 0x15e   : > { %4145 = vmatmul.mubr.bf16.gmra.mxu1 %v3825_v62  ;;  %5133 = vmatmul.mubr.bf16.vlgmr.msra.gmra.mxu0 %v14301_v13  ;;  %v12130_v62 = vpop.f32.mrf.mxu1  ;;  %v14302_v13 = vcombine.high %v11844_v38, %v11847_v39 }
 0x15f   : > { %4152 = vmatprep.mubr.bf16.mxu1 %v3850_v10  ;;  %5140 = vmatprep.mubr.bf16.mxu0 %v4516_v2  ;;  %v4299_v10 = vsel %vm14209_vm1, %v4294_v49, %v4298_v52  ;;  %v4338_v49 = vrot.slane %v4310_v56, %v10402_v60 }
 0x160   : > { %v4308_v2 = vcombine.low %v583_v4, %v4299_v10  ;;  %v4309_v22 = vcombine.high %v583_v4, %v4299_v10  ;;  %v14304_v4 = vcombine.high %v11902_v7, %v11914_v31  ;;  %v4300_v10 = vshrl.u32 %v12120_v23, 16 }
 0x161   : > { %v4657_v31 = vcombine.low %v11702_v18, %v11705_v53  ;;  %v4659_v7 = vcombine.low %v11683_v24, %v11708_v35  ;;  %v14309_v35 = vcombine.low %v11967_v1, %v11976_v58 }
 0x162   : > { %v4317_v38 = vrot.slane %v4308_v2, %v10402_v60  ;;  %v4324_v39 = vrot.slane %v4309_v22, %v10402_v60  ;;  %v4302_v22 = vor.u32 %v4300_v10, %v4298_v52  ;;  %v14310_v52 = vcombine.high %v12009_v17, %v12016_v16 }
 0x163   : > { %v8965_v0 = vpop.f32.mrf.mxu0  ;;  %v12181_v18 = vrot.slane %v4659_v7, %v10402_v60 }
 0x164   : > { %v4342_v2 = vcombine.high %v4324_v39, %v4338_v49  ;;  %v4375_v53 = vcombine.low %v12120_v23, %v4302_v22  ;;  %v4694_v23 = vcombine.low %v14299_v11, %v11793_v19 }
 0x165   : > { %v8966_v9 = vpop.f32.mrf.mxu0 }
 0x166   : > { %4153 = vmatmul.mubr.bf16.gmra.mxu1 %v11897_v28  ;;  %5141 = vmatmul.mubr.bf16.gmra.mxu0 %v4514_v40  ;;  %v12141_v21 = vpop.f32.mrf.mxu1  ;;  %v8967_v5 = vadd.f32 %v8966_v9, %v8965_v0  ;;  %v4331_v40 = vrot.slane %v4307_v27, %v10402_v60  ;;  %v4341_v9 = vcombine.low %v4324_v39, %v4338_v49  ;;  %v14312_v49 = vld [vmem:[#allocation45_spill] sm:$0xff] }
 0x167   : > { %9597 = vmatprep.mubr.bf16.mxu1 %v14302_v13  ;;  %5148 = vmatprep.mubr.bf16.mxu0 %v14303_v46  ;;  %v14307_v27 = vcombine.low %v11983_v44, %v11994_v45  ;;  %v12172_v46 = vpop.f32.mrf.mxu0  ;;  %v14308_v45 = vcombine.high %v11967_v1, %v11976_v58  ;;  %v12178_v44 = vrot.slane %v4657_v31, %v10402_v60 }
 0x168   : > { %v3013_v28 = vpop.f32.mrf.mxu1  ;;  %v4339_v0 = vcombine.low %v4317_v38, %v4331_v40  ;;  %v4340_v13 = vcombine.high %v4317_v38, %v4331_v40  ;;  %v4356_v55 = vrot.slane %v4341_v9, %v10402_v60  ;;  %v4370_v24 = vrot.slane %v4342_v2, %v10402_v60 }
 0x169   : > { %v12146_v37 = vadd.f32 %v8967_v5, %v3013_v28  ;;  %v14311_v39 = vcombine.low %v12003_v41, %v12006_v6  ;;  %v4692_v40 = vcombine.low %v11716_v61, %v11719_v42  ;;  %v4727_v1 = vcombine.low %v11808_v51, %v11828_v59  ;;  %v14314_v41 = vld [vmem:[#allocation46_spill] sm:$0xff]  ;;  %v14315_v6 = vld [vmem:[#allocation44_spill] sm:$0xff]  ;;  %v14316_v42 = vld [vmem:[#allocation47_spill] sm:$0xff] }
 0x16a   : > { %v4349_v56 = vrot.slane %v4339_v0, %v10402_v60  ;;  %v4363_v15 = vrot.slane %v4340_v13, %v10402_v60  ;;  %v4372_v28 = vcombine.high %v4356_v55, %v4356_v55  ;;  %v4729_v58 = vcombine.low %v11815_v20, %v11859_v50  ;;  %v12208_v0 = vpop.f32.mrf.mxu0 }
 0x16b   : > { %v8659_v61 = vcombine.high %v14315_v6, %v14314_v41  ;;  %v4382_v51 = vrot.slane %v4375_v53, %v10402_v60  ;;  %v4389_v20 = vrot.slane %v4306_v33, %v10402_v60  ;;  %v4690_v59 = vcombine.high %v12178_v44, %v12181_v18 }
 0x16c   : > { %v4371_v5 = vcombine.high %v4349_v56, %v4349_v56  ;;  %v4373_v38 = vcombine.high %v4363_v15, %v4363_v15  ;;  %v4829_v19 = vcombine.low %v14316_v42, %v4349_v56  ;;  %v4832_v13 = vcombine.low %v4370_v24, %v4372_v28 }
 0x16d   : > { %v4702_v9 = vrot.slane %v4692_v40, %v10402_v60  ;;  %v12220_v31 = vrot.slane %v4727_v1, %v10402_v60  ;;  %v12223_v7 = vrot.slane %v4729_v58, %v10402_v60  ;;  %v14317_v56 = vcombine.high %v12028_v3, %v12045_v47 }
 0x16e   : > { %9598 = vmatmul.mubr.bf16.vlgmr.msra.gmra.mxu1 %v14304_v4  ;;  %5149 = vmatmul.mubr.bf16.gmra.mxu0 %v14305_v30  ;;  %v14313_v4 = vld [vmem:[#allocation43_spill] sm:$0xff]  ;;  %v4830_v50 = vcombine.low %v4363_v15, %v4371_v5  ;;  %v4831_v11 = vcombine.low %v4373_v38, %v4356_v55  ;;  %v4793_v15 = vrot.slane %v8659_v61, %v10402_v60 }
 0x16f   : > { %9601 = vmatprep.mubr.bf16.mxu1 %v14306_v57  ;;  %5156 = vmatprep.mubr.bf16.mxu0 %v14307_v27  ;;  %v4762_v10 = vcombine.low %v14313_v4, %v14312_v49  ;;  %v8658_v30 = vcombine.high %v14313_v4, %v14312_v49  ;;  %v4764_v57 = vcombine.low %v14315_v6, %v14314_v41 }
 0x170   : > { %v4716_v27 = vrot.slane %v4694_v23, %v10402_v60  ;;  %v4390_v53 = vcombine.low %v4382_v51, %v4389_v20  ;;  %v4846_v5 = vrot.slane %v4830_v50, %v10402_v60  ;;  %v4853_v28 = vrot.slane %v4831_v11, %v10402_v60 }
 0x171   : > { %v4772_v2 = vrot.slane %v4762_v10, %v10402_v60  ;;  %v4779_v33 = vrot.slane %v8658_v30, %v10402_v60  ;;  %v4786_v55 = vrot.slane %v4764_v57, %v10402_v60  ;;  %v4860_v38 = vrot.slane %v4832_v13, %v10402_v60 }
 0x172   : > { %v4725_v23 = vcombine.high %v4702_v9, %v4716_v27  ;;  %v4397_v4 = vrot.slane %v4390_v53, %v10402_v60  ;;  %v4760_v10 = vcombine.high %v12220_v31, %v12223_v7  ;;  %v14321_v20 = vcombine.low %v12059_v63, %v12070_v36 }
 0x173   : > { %v4794_v1 = vcombine.low %v4772_v2, %v4779_v33  ;;  %v4796_v49 = vcombine.low %v4786_v55, %v4793_v15  ;;  %v4863_v6 = vcombine.low %v4853_v28, %v4860_v38  ;;  %v4689_v11 = vcombine.low %v12178_v44, %v12181_v18 }
 0x174   : > { %v4795_v53 = vcombine.high %v4772_v2, %v4779_v33  ;;  %v14323_v44 = vcombine.low %v12111_v26, %v12114_v34 }
 0x175   : > { %v4804_v57 = vrot.slane %v4794_v1, %v10402_v60  ;;  %v4818_v61 = vrot.slane %v4796_v49, %v10402_v60  ;;  %v4885_v51 = vrot.slane %v4863_v6, %v10402_v60 }
 0x176   : > { %9602 = vmatmul.mubr.bf16.gmra.mxu1 %v14308_v45  ;;  %5157 = vmatmul.mubr.bf16.gmra.mxu0 %v14309_v35  ;;  %v12233_v45 = vrot.slane %v4829_v19, %v10402_v60  ;;  %v14318_v35 = vcombine.low %v12009_v17, %v12016_v16  ;;  %v4374_v16 = vcombine.high %v4370_v24, %v4370_v24 }
 0x177   : > { %9605 = vmatprep.mubr.bf16.mxu1 %v14310_v52  ;;  %5164 = vmatprep.mubr.bf16.mxu0 %v14311_v39  ;;  %v14319_v39 = vcombine.low %v12051_v54, %v12054_v8  ;;  %v9524_v8 = vpop.f32.mrf.mxu1  ;;  %v14320_v24 = vcombine.low %v12028_v3, %v12045_v47  ;;  %v14322_v47 = vcombine.low %v12086_v48, %v12094_v14 }
 0x178   : > { %v4861_v41 = vcombine.low %v12233_v45, %v4846_v5  ;;  %v4811_v18 = vrot.slane %v4795_v53, %v10402_v60  ;;  %v4759_v48 = vcombine.low %v12220_v31, %v12223_v7  ;;  %v4826_v31 = vcombine.low %v4804_v57, %v4818_v61  ;;  %v9870_v53 = vld [vmem:[%s14112_s3 + $0xf0] sm:$0xff]  }
 0x17a   : > { %v4871_v19 = vrot.slane %v4861_v41, %v10402_v60 }
 0x17b   : > { %v8971_v22 = vpop.f32.mrf.mxu0 }
 0x17c   : > { %v4894_v13 = vcombine.high %v4871_v19, %v4885_v51 }
 0x17d   : > { %v8972_v52 = vpop.f32.mrf.mxu0 }
 0x17e   : > { %9606 = vmatmul.mubr.bf16.gmra.mxu1 %v14317_v56  ;;  %5165 = vmatmul.mubr.bf16.gmra.mxu0 %v14318_v35  ;;  %v8973_v40 = vadd.f32 %v8972_v52, %v8971_v22  ;;  %v12266_v22 = vpop.f32.mrf.mxu1  ;;  %v4724_v56 = vcombine.low %v4702_v9, %v4716_v27  ;;  %v4797_v35 = vcombine.high %v4786_v55, %v4793_v15 }
 0x17f   : > { %9609 = vmatprep.mubr.bf16.mxu1 %v4690_v59  ;;  %5172 = vmatprep.mubr.bf16.mxu0 %v14319_v39  ;;  %v8974_v58 = vpop.f32.mrf.mxu0  ;;  %v4827_v59 = vcombine.high %v4804_v57, %v4818_v61  ;;  %v4862_v9 = vcombine.high %v12233_v45, %v4846_v5  ;;  %v4864_v27 = vcombine.high %v4853_v28, %v4860_v38  ;;  %v9864_v28 = vld [vmem:[%s14112_s3 + $0x178] sm:$0xff]   ;;  %v9865_v57 = vld [vmem:[%s14112_s3 + $0x170] sm:$0xff]  }
 0x180   : > { %v12245_v17 = vadd.f32 %v12141_v21, %v8973_v40  ;;  %v4896_v21 = vcombine.low %v4374_v16, %v4397_v4  ;;  %v9527_v36 = vpop.f32.mrf.mxu1  ;;  %v4825_v39 = vrot.slane %v4797_v35, %v10402_v60  ;;  %9621 = vmatprep.subr.bf16.mxu0 %v9864_v28  ;;  %v4893_v4 = vcombine.low %v4871_v19, %v4885_v51 }
 0x181   : > { %v8975_v30 = vpop.f32.mrf.mxu0  ;;  %v4878_v34 = vrot.slane %v4862_v9, %v10402_v60  ;;  %v4892_v15 = vrot.slane %v4864_v27, %v10402_v60  ;;  %9622 = vmatpush3.bf16.msra.mxu0 %v9864_v28  ;;  %v9869_v9 = vld [vmem:[%s14112_s3 + $0x168] sm:$0xff]   ;;  %v9873_v27 = vld [vmem:[%s14112_s3 + $0x120] sm:$0xff]  }
 0x182   : > { %v8976_v54 = vadd.f32 %v8975_v30, %v8974_v58  ;;  %v4903_v50 = vrot.slane %v4896_v21, %v10402_v60  ;;  %v3029_v52 = vpop.f32.mrf.mxu1  ;;  %v4828_v14 = vcombine.low %v4811_v18, %v4825_v39  ;;  %9623 = vmatprep.subr.bf16.mxu0 %v9865_v57  ;;  %v9872_v39 = vld [vmem:[%s14112_s3 + $0xe8] sm:$0xff]  }
 0x183   : > { %v4895_v7 = vcombine.low %v4878_v34, %v4892_v15 }
 0x184   : > { %v12253_v42 = vadd.f32 %v9524_v8, %v8976_v54  ;;  %v4911_v3 = vrot.slane %v4903_v50, %v10402_v60  ;;  %v9528_v40 = vpop.f32.mrf.mxu1  ;;  %v4904_v38 = vcombine.high %v4903_v50, %v4903_v50 }
 0x185   : > { %9624 = vmatpush3.bf16.msra.mxu0 %v9865_v57 }
 0x186   : > { %9610 = vmatmul.mubr.bf16.gmra.mxu1 %v4725_v23  ;;  %5173 = vmatmul.mubr.bf16.gmra.mxu0 %v14320_v24  ;;  %v4919_v63 = vcombine.high %v4911_v3, %v4911_v3  ;;  %v12280_v33 = vpop.f32.mrf.mxu1  ;;  %v4918_v30 = vrot.slane %v4904_v38, %v10402_v60 }
 0x187   : > { %9613 = vmatprep.mubr.bf16.mxu1 %v4760_v10  ;;  %5180 = vmatprep.mubr.bf16.mxu0 %v14321_v20 }
 0x188   : > { %9625 = vmatprep.subr.bf16.mxu0 %v9869_v9 }
 0x189   : > { %9626 = vmatpush3.bf16.msra.mxu0 %v9869_v9 }
 0x18e   : > { %9614 = vmatmul.mubr.bf16.gmra.mxu1 %v4827_v59  ;;  %5181 = vmatmul.mubr.bf16.gmra.mxu0 %v4689_v11 }
 0x18f   : > { %9617 = vmatprep.mubr.bf16.mxu1 %v4894_v13  ;;  %5188 = vmatprep.mubr.bf16.mxu0 %v14322_v47  ;;  %v9866_v13 = vld [vmem:[%s14112_s3 + $0x138] sm:$0xff]  }
 0x190   : > { %9261 = vmatprep.subr.bf16.mxu1 %v9866_v13 }
 0x196   : > { %9618 = vmatmul.mubr.bf16.gmra.mxu1 %v4919_v63  ;;  %5189 = vmatmul.mubr.bf16.gmra.mxu0 %v4724_v56 }
 0x197   : > { %5196 = vmatprep.mubr.bf16.mxu0 %v14323_v44  ;;  %v12286_v1 = vpop.f32.mrf.mxu1  ;;  %v9871_v44 = vld [vmem:[%s14112_s3 + $0x128] sm:$0xff]  }
 0x199   : > { %v8977_v23 = vpop.f32.mrf.mxu0  ;;  %v3045_v45 = vpop.f32.mrf.mxu1 }
 0x19b   : > { %v8978_v2 = vpop.f32.mrf.mxu0  ;;  %v12295_v49 = vpop.f32.mrf.mxu1 }
 0x19c   : > { %v8979_v55 = vadd.f32 %v8978_v2, %v8977_v23 }
 0x19d   : > { %v12288_v58 = vpop.f32.mrf.mxu0  ;;  %v12298_v6 = vpop.f32.mrf.mxu1 }
 0x19e   : > { %5197 = vmatmul.mubr.bf16.gmra.mxu0 %v4759_v48  ;;  %v12282_v26 = vadd.f32 %v8979_v55, %v3029_v52  ;;  %v9875_v55 = vld [vmem:[%s14112_s3 + $0xe0] sm:$0xff]  }
 0x19f   : > { %5204 = vmatprep.mubr.bf16.mxu0 %v4828_v14  ;;  %v12290_v5 = vpop.f32.mrf.mxu0 }
 0x1a6   : > { %5205 = vmatmul.mubr.bf16.gmra.mxu0 %v4826_v31  ;;  %v8958_v31 = vadd.f32 %v12000_v32, %v11980_v43  ;;  %v9874_v43 = vld [vmem:[%s14112_s3 + $0x160] sm:$0xff]   ;;  %v9877_v32 = vld [vmem:[%s14112_s3 + $0xd8] sm:$0xff]  }
 0x1a7   : > { %5212 = vmatprep.mubr.bf16.mxu0 %v4895_v7  ;;  %9627 = vmatprep.subr.bf16.mxu0 %v9874_v43 }
 0x1a8   : > { %v8983_v16 = vpop.f32.mrf.mxu0  ;;  %9628 = vmatpush3.bf16.msra.mxu0 %v9874_v43 }
 0x1aa   : > { %v8984_v10 = vpop.f32.mrf.mxu0  ;;  %v12305_v24 = vpop.f32.mrf.mxu1 }
 0x1ab   : > { %v8985_v41 = vadd.f32 %v8984_v10, %v8983_v16  ;;  %v9876_v16 = vld [vmem:[%s14112_s3 + $0x118] sm:$0xff]  }
 0x1ac   : > { %v8986_v54 = vpop.f32.mrf.mxu0  ;;  %v3061_v60 = vpop.f32.mrf.mxu1 }
 0x1ad   : > { %v12300_v8 = vadd.f32 %v9527_v36, %v8985_v41  ;;  %v9867_v36 = vld [vmem:[%s14112_s3 + $0xf8] sm:$0xff]   ;;  %v3001_v41 = vadd.f32 %v8958_v31, %v12130_v62  ;;  %v9878_v62 = vld [vmem:[%s14112_s3 + $0x110] sm:$0xff]  }
 0x1ae   : > { %5213 = vmatmul.mubr.bf16.gmra.mxu0 %v4893_v4  ;;  %v8987_v61 = vpop.f32.mrf.mxu0  ;;  %v12309_v50 = vpop.f32.mrf.mxu1  ;;  %9262 = vmatpush3.bf16.msra.mxu1 %v9867_v36 }
 0x1af   : > { %5220 = vmatprep.mubr.bf16.mxu0 %v4918_v30  ;;  %v8988_v21 = vadd.f32 %v8987_v61, %v8986_v54 }
 0x1b0   : > { %v12316_v47 = vpop.f32.mrf.mxu1 }
 0x1b1   : > { %v12307_v19 = vadd.f32 %v9528_v40, %v8988_v21 }
 0x1b3   : > { %v8989_v51 = vpop.f32.mrf.mxu0 }
 0x1b5   : > { %v8990_v20 = vpop.f32.mrf.mxu0 }
 0x1b6   : > { %5221 = vmatmul.mubr.bf16.gmra.mxu0 %v4911_v3  ;;  %v8991_v59 = vadd.f32 %v8990_v20, %v8989_v51  ;;  %v9868_v3 = vld [vmem:[%s14112_s3 + $0x130] sm:$0xff]  }
 0x1b7   : > { %v12321_v63 = vpop.f32.mrf.mxu0  ;;  %9263 = vmatprep.subr.bf16.mxu1 %v9868_v3  ;;  %v9879_v3 = vld [vmem:[%s14112_s3 + $0xd0] sm:$0xff]  }
 0x1b8   : > { %v12311_v11 = vadd.f32 %v8991_v59, %v3045_v45  ;;  %9264 = vmatpush3.bf16.msra.mxu1 %v9870_v53  ;;  %v9880_v53 = vld [vmem:[%s14112_s3 + $0x158] sm:$0xff]  }
 0x1b9   : > { %v12333_v52 = vpop.f32.mrf.mxu0  ;;  %9265 = vmatprep.subr.bf16.mxu1 %v9871_v44  ;;  %9629 = vmatprep.subr.bf16.mxu0 %v9880_v53 }
 0x1ba   : > { %9630 = vmatpush3.bf16.msra.mxu0 %v9880_v53 }
 0x1bc   : > { %9266 = vmatpush3.bf16.msra.mxu1 %v9872_v39 }
 0x1bd   : > { %9267 = vmatprep.subr.bf16.mxu1 %v9873_v27 }
 0x1c0   : > { %v12326_v56 = vpop.f32.mrf.mxu1  ;;  %9268 = vmatpush3.bf16.msra.mxu1 %v9875_v55  ;;  %v9883_v55 = vld [vmem:[%s14112_s3 + $0x150] sm:$0xff]  }
 0x1c1   : > { %9269 = vmatprep.subr.bf16.mxu1 %v9876_v16  ;;  %9631 = vmatprep.subr.bf16.mxu0 %v9883_v55  ;;  %v8970_v16 = vadd.f32 %v12208_v0, %v12172_v46 }
 0x1c2   : > { %v12331_v35 = vpop.f32.mrf.mxu1  ;;  %9632 = vmatpush3.bf16.msra.mxu0 %v9883_v55  ;;  %v9884_v55 = vld [vmem:[%s14112_s3 + $0x100] sm:$0xff]  }
 0x1c4   : > { %v9540_v18 = vpop.f32.mrf.mxu1  ;;  %9270 = vmatpush3.bf16.msra.mxu1 %v9877_v32 }
 0x1c5   : > { %9271 = vmatprep.subr.bf16.mxu1 %v9878_v62 }
 0x1c6   : > { %v12341_v40 = vpop.f32.mrf.mxu1  ;;  %v8995_v23 = vpop.f32.mrf.mxu0 }
 0x1c8   : > { %v9061_v48 = vpop.f32.mrf.mxu1  ;;  %v8996_v14 = vpop.f32.mrf.mxu0  ;;  %9272 = vmatpush3.bf16.msra.mxu1 %v9879_v3 }
 0x1c9   : > { %v8997_v2 = vadd.f32 %v8996_v14, %v8995_v23  ;;  %v9881_v14 = vld [vmem:[%s14112_s3 + $0x108] sm:$0xff]  }
 0x1ca   : > { %v9062_v34 = vpop.f32.mrf.mxu1  ;;  %v8998_v15 = vpop.f32.mrf.mxu0  ;;  %9273 = vmatprep.subr.bf16.mxu1 %v9881_v14 }
 0x1cb   : > { %v9063_v7 = vadd.f32 %v9062_v34, %v9061_v48  ;;  %v12355_v45 = vadd.f32 %v12286_v1, %v8997_v2  ;;  %v9882_v2 = vld [vmem:[%s14112_s3 + $0xc8] sm:$0xff]  }
 0x1cc   : > { %v9064_v28 = vpop.f32.mrf.mxu1  ;;  %v8999_v38 = vpop.f32.mrf.mxu0  ;;  %9274 = vmatpush3.bf16.msra.mxu1 %v9882_v2 }
 0x1cd   : > { %v9000_v4 = vadd.f32 %v8999_v38, %v8998_v15  ;;  %v12361_v10 = vadd.f32 %v9063_v7, %v12081_v12  ;;  %9275 = vmatprep.subr.bf16.mxu1 %v9884_v55 }
 0x1ce   : > { %v9065_v1 = vpop.f32.mrf.mxu1  ;;  %v9001_v30 = vpop.f32.mrf.mxu0 }
 0x1cf   : > { %v9066_v54 = vadd.f32 %v9065_v1, %v9064_v28  ;;  %v12371_v57 = vadd.f32 %v12295_v49, %v9000_v4 }
 0x1d0   : > { %v9002_v12 = vpop.f32.mrf.mxu0 }
 0x1d1   : > { %v9003_v61 = vadd.f32 %v9002_v12, %v9001_v30  ;;  %v12373_v21 = vadd.f32 %v9066_v54, %v3001_v41 }
 0x1d2   : > { %v12375_v51 = vpop.f32.mrf.mxu0 }
 0x1d3   : > { %v12377_v20 = vadd.f32 %v9003_v61, %v3061_v60 }
 0x1d4   : > { %v12379_v59 = vpop.f32.mrf.mxu0 }
 0x1d5   : > { %v9067_v13 = vpop.f32.mrf.mxu1 }
 0x1d6   : > { %v9007_v36 = vpop.f32.mrf.mxu0 }
 0x1d7   : > { %v9068_v49 = vpop.f32.mrf.mxu1 }
 0x1d8   : > { %v9069_v44 = vadd.f32 %v9068_v49, %v9067_v13  ;;  %v9008_v60 = vpop.f32.mrf.mxu0 }
 0x1d9   : > { %v9070_v18 = vpop.f32.mrf.mxu1  ;;  %v9009_v39 = vadd.f32 %v9008_v60, %v9007_v36 }
 0x1da   : > { %v9010_v23 = vpop.f32.mrf.mxu0  ;;  %v4075_v48 = vadd.f32 %v9069_v44, %v12100_v25 }
 0x1db   : > { %v9071_v9 = vpop.f32.mrf.mxu1  ;;  %v12395_v27 = vadd.f32 %v12305_v24, %v9009_v39 }
 0x1dc   : > { %v9072_v34 = vadd.f32 %v9071_v9, %v9070_v18  ;;  %v9011_v15 = vpop.f32.mrf.mxu0 }
 0x1dd   : > { %v9073_v25 = vpop.f32.mrf.mxu1  ;;  %v9012_v31 = vadd.f32 %v9011_v15, %v9010_v23 }
 0x1de   : > { %v9013_v7 = vpop.f32.mrf.mxu0  ;;  %v4078_v28 = vadd.f32 %v9072_v34, %v12102_v29  ;;  %v3017_v29 = vadd.f32 %v8970_v16, %v12266_v22 }
 0x1df   : > { %v9074_v24 = vpop.f32.mrf.mxu1  ;;  %v12405_v38 = vadd.f32 %v12309_v50, %v9012_v31 }
 0x1e0   : > { %v9075_v4 = vadd.f32 %v9074_v24, %v9073_v25  ;;  %v9014_v43 = vpop.f32.mrf.mxu0 }
 0x1e1   : > { %v9076_v32 = vpop.f32.mrf.mxu1  ;;  %v9015_v1 = vadd.f32 %v9014_v43, %v9013_v7 }
 0x1e2   : > { %v12409_v30 = vpop.f32.mrf.mxu0  ;;  %v4083_v41 = vadd.f32 %v9075_v4, %v12146_v37 }
 0x1e3   : > { %v9077_v54 = vpop.f32.mrf.mxu1  ;;  %v12413_v12 = vadd.f32 %v9015_v1, %v12331_v35 }
 0x1e4   : > { %v9078_v61 = vadd.f32 %v9077_v54, %v9076_v32  ;;  %v12416_v50 = vpop.f32.mrf.mxu0 }
 0x1e5   : > { %v9079_v13 = vpop.f32.mrf.mxu1 }
 0x1e6   : > { %v9019_v36 = vpop.f32.mrf.mxu0  ;;  %v12418_v46 = vadd.f32 %v9078_v61, %v3017_v29 }
 0x1e7   : > { %v9080_v0 = vpop.f32.mrf.mxu1 }
 0x1e8   : > { %v9081_v62 = vadd.f32 %v9080_v0, %v9079_v13  ;;  %v9020_v49 = vpop.f32.mrf.mxu0 }
 0x1e9   : > { %v9082_v3 = vpop.f32.mrf.mxu1  ;;  %v9021_v53 = vadd.f32 %v9020_v49, %v9019_v36 }
 0x1ea   : > { %v9022_v44 = vpop.f32.mrf.mxu0  ;;  %v4091_v37 = vadd.f32 %v9081_v62, %v12245_v17  ;;  %v8982_v17 = vadd.f32 %v12290_v5, %v12288_v58 }
 0x1eb   : > { %v9083_v60 = vpop.f32.mrf.mxu1  ;;  %v12422_v35 = vadd.f32 %v12326_v56, %v9021_v53  ;;  %v9885_v56 = vld [vmem:[%s14112_s3 + $0xc0] sm:$0xff]  }
 0x1ec   : > { %v9084_v22 = vadd.f32 %v9083_v60, %v9082_v3  ;;  %v9023_v18 = vpop.f32.mrf.mxu0  ;;  %9276 = vmatpush3.bf16.msra.mxu1 %v9885_v56  ;;  %v3033_v24 = vadd.f32 %v8982_v17, %v12280_v33 }
 0x1ed   : > { %v9085_v39 = vpop.f32.mrf.mxu1 }
 0x1ee   : > { %v9559_v23 = vpop.f32.mrf.mxu0  ;;  %v4094_v14 = vadd.f32 %v9084_v22, %v12253_v42  ;;  %v9886_v42 = vld [vmem:[%s14112_s3 + $0x148] sm:$0xff]  }
 0x1ef   : > { %v9086_v9 = vpop.f32.mrf.mxu1  ;;  %v12425_v2 = vadd.f32 %v9559_v23, %v4075_v48  ;;  %9633 = vmatprep.subr.bf16.mxu0 %v9886_v42 }
 0x1f0   : > { %v9087_v34 = vadd.f32 %v9086_v9, %v9085_v39  ;;  %v4194_v15 = vpop.f32.mrf.mxu0  ;;  %9634 = vmatpush3.bf16.msra.mxu0 %v9886_v42 }
 0x1f1   : > { %v9088_v25 = vpop.f32.mrf.mxu1  ;;  %v12439_v48 = vadd.f32 %v4194_v15, %v12361_v10  ;;  %v9887_v10 = vld [vmem:[%s14112_s3 + $0x140] sm:$0xff]  }
 0x1f2   : > { %v9560_v31 = vpop.f32.mrf.mxu0  ;;  %v4099_v7 = vadd.f32 %v9087_v34, %v12282_v26  ;;  %9635 = vmatprep.subr.bf16.mxu0 %v9887_v10 }
 0x1f3   : > { %v9089_v58 = vpop.f32.mrf.mxu1  ;;  %v12442_v5 = vadd.f32 %v9560_v31, %v4078_v28 }
 0x1f4   : > { %v9090_v16 = vadd.f32 %v9089_v58, %v9088_v25  ;;  %v12445_v4 = vpop.f32.mrf.mxu0  ;;  %9636 = vmatpush3.bf16.msra.mxu0 %v9887_v10 }
 0x1f5   : > { %v9091_v43 = vpop.f32.mrf.mxu1 }
 0x1f6   : > { %v9563_v32 = vpop.f32.mrf.mxu0  ;;  %v12450_v1 = vadd.f32 %v9090_v16, %v3033_v24 }
 0x1f7   : > { %v9092_v26 = vpop.f32.mrf.mxu1  ;;  %v12452_v54 = vadd.f32 %v9563_v32, %v4091_v37 }
 0x1f8   : > { %v9093_v28 = vadd.f32 %v9092_v26, %v9091_v43  ;;  %v4210_v29 = vpop.f32.mrf.mxu0 }
 0x1f9   : > { %v9094_v61 = vpop.f32.mrf.mxu1  ;;  %v12454_v33 = vadd.f32 %v4210_v29, %v4083_v41  ;;  %v8994_v41 = vadd.f32 %v12333_v52, %v12321_v63 }
 0x1fa   : > { %v9564_v13 = vpop.f32.mrf.mxu0  ;;  %v4107_v36 = vadd.f32 %v9093_v28, %v12300_v8 }
 0x1fb   : > { %v9095_v0 = vpop.f32.mrf.mxu1  ;;  %v12457_v62 = vadd.f32 %v9564_v13, %v4094_v14  ;;  %v3049_v34 = vadd.f32 %v8994_v41, %v12298_v6  ;;  %v9006_v13 = vadd.f32 %v12379_v59, %v12375_v51 }
 0x1fc   : > { %v9096_v49 = vadd.f32 %v9095_v0, %v9094_v61  ;;  %v12459_v3 = vpop.f32.mrf.mxu0 }
 0x1fe   : > { %v9097_v53 = vpop.f32.mrf.mxu1  ;;  %v9567_v44 = vpop.f32.mrf.mxu0  ;;  %v4110_v37 = vadd.f32 %v9096_v49, %v12307_v19  ;;  %v9888_v19 = vld [vmem:[%s14112_s3 + $0x78] sm:$0xff]  }
 0x1ff   : > { %v12462_v22 = vadd.f32 %v9567_v44, %v4107_v36  ;;  %9341 = vmatprep.subr.bf16.mxu1 %v9888_v19 }
 0x200   : > { %v9098_v60 = vpop.f32.mrf.mxu1  ;;  %v4226_v39 = vpop.f32.mrf.mxu0 }
 0x201   : > { %v9099_v18 = vadd.f32 %v9098_v60, %v9097_v53  ;;  %v12466_v8 = vadd.f32 %v4226_v39, %v4099_v7  ;;  %v3065_v60 = vadd.f32 %v9006_v13, %v12316_v47 }
 0x202   : > { %v9100_v23 = vpop.f32.mrf.mxu1  ;;  %v9568_v14 = vpop.f32.mrf.mxu0 }
 0x203   : > { %v4115_v9 = vadd.f32 %v9099_v18, %v12311_v11  ;;  %v12469_v17 = vadd.f32 %v9568_v14, %v4110_v37 }
 0x204   : > { %v9101_v55 = vpop.f32.mrf.mxu1  ;;  %v12475_v56 = vpop.f32.mrf.mxu0 }
 0x205   : > { %v9102_v15 = vadd.f32 %v9101_v55, %v9100_v23 }
 0x206   : > { %v9103_v63 = vpop.f32.mrf.mxu1  ;;  %v9571_v52 = vpop.f32.mrf.mxu0 }
 0x207   : > { %v12477_v42 = vadd.f32 %v9102_v15, %v3049_v34 }
 0x208   : > { %v9104_v25 = vpop.f32.mrf.mxu1  ;;  %v4242_v11 = vpop.f32.mrf.mxu0 }
 0x209   : > { %v9105_v31 = vadd.f32 %v9104_v25, %v9103_v63  ;;  %v12479_v58 = vadd.f32 %v4242_v11, %v4115_v9  ;;  %v10058_v11 = vmov 1983009808  }
 0x20a   : > { %v9106_v7 = vpop.f32.mrf.mxu1  ;;  %v9572_v16 = vpop.f32.mrf.mxu0 }
 0x20b   : > { %v4123_v24 = vadd.f32 %v9105_v31, %v12355_v45 }
 0x20c   : > { %v9107_v43 = vpop.f32.mrf.mxu1  ;;  %v12484_v32 = vpop.f32.mrf.mxu0 }
 0x20d   : > { %v9108_v10 = vadd.f32 %v9107_v43, %v9106_v7  ;;  %v12482_v6 = vadd.f32 %v9571_v52, %v4123_v24  ;;  %v5404_v7 = vunpack.c.l.s4 %v10058_v11 }
 0x20e   : > { %v9109_v26 = vpop.f32.mrf.mxu1  ;;  %v9575_v29 = vpop.f32.mrf.mxu0 }
 0x20f   : > { %v4126_v28 = vadd.f32 %v9108_v10, %v12371_v57  ;;  %v5405_v13 = vunpack.c.0.s8 %v5404_v7 }
 0x210   : > { %v9110_v61 = vpop.f32.mrf.mxu1  ;;  %v4258_v49 = vpop.f32.mrf.mxu0 }
 0x211   : > { %v9111_v36 = vadd.f32 %v9110_v61, %v9109_v26  ;;  %v12489_v0 = vadd.f32 %v9572_v16, %v4126_v28  ;;  %v9018_v16 = vadd.f32 %v12416_v50, %v12409_v30  ;;  %v8684_v30 = vld [vmem:[%s14111_s2] ss:$0 sm:$0xff] }
 0x212   : > { %v9112_v45 = vpop.f32.mrf.mxu1  ;;  %v9576_v44 = vpop.f32.mrf.mxu0 }
 0x213   : > { %14324 = vst [vmem:[#allocation42_spill] sm:$0xff] %v12489_v0  ;;  %v4131_v53 = vadd.f32 %v9111_v36, %v12377_v20 }
 0x214   : > { %v9113_v37 = vpop.f32.mrf.mxu1  ;;  %v12495_v57 = vpop.f32.mrf.mxu0 }
 0x215   : > { %v9114_v41 = vadd.f32 %v9113_v37, %v9112_v45  ;;  %v12493_v18 = vadd.f32 %v4258_v49, %v4131_v53 }
 0x216   : > { %v9115_v39 = vpop.f32.mrf.mxu1  ;;  %v9579_v51 = vpop.f32.mrf.mxu0 }
 0x217   : > { %14325 = vst [vmem:[#allocation15_spill] sm:$0xff] %v12493_v18  ;;  %v12497_v23 = vadd.f32 %v9114_v41, %v3065_v60  ;;  %v14329_v60 = vld [vmem:[#allocation11_spill] sm:$0xff] }
 0x218   : > { %v9116_v59 = vpop.f32.mrf.mxu1  ;;  %v4274_v9 = vpop.f32.mrf.mxu0  ;;  %v12517_v41 = vsub.s32 %v5405_v13, %v14329_v60  ;;  %v12552_v13 = vld [vmem:[%s14112_s3 + $0xb8] sm:$0xff]   ;;  %vm14208_vm4 = vcmp.ge.s32.totalorder %v14329_v60, 1 }
 0x219   : > { %v9117_v14 = vadd.f32 %v9116_v59, %v9115_v39  ;;  %v5880_v59 = vcombine.high %v8684_v30, %v8684_v30  ;;  %9653 = vmatprep.subr.bf16.mxu0 %v12552_v13 }
 0x21a   : > { %v9118_v55 = vpop.f32.mrf.mxu1  ;;  %v9580_v20 = vpop.f32.mrf.mxu0 }
 0x21b   : > { %v4139_v19 = vadd.f32 %v9117_v14, %v12395_v27 }
 0x21c   : > { %v9119_v34 = vpop.f32.mrf.mxu1  ;;  %v12502_v47 = vpop.f32.mrf.mxu0 }
 0x21d   : > { %v9120_v15 = vadd.f32 %v9119_v34, %v9118_v55  ;;  %v12500_v63 = vadd.f32 %v9575_v29, %v4139_v19  ;;  %v12521_v19 = vrot.slane %v8684_v30, %v12517_v41 }
 0x21e   : > { %v9121_v52 = vpop.f32.mrf.mxu1  ;;  %v9169_v31 = vpop.f32.mrf.mxu0 }
 0x21f   : > { %14326 = vst [vmem:[#allocation14_spill] sm:$0xff] %v12500_v63  ;;  %v4142_v25 = vadd.f32 %v9120_v15, %v12405_v38  ;;  %v3081_v38 = vadd.f32 %v9018_v16, %v12341_v40  ;;  %v12532_v7 = vcombine.high %v12521_v19, %v12521_v19 }
 0x220   : > { %v9122_v24 = vpop.f32.mrf.mxu1  ;;  %v9170_v27 = vpop.f32.mrf.mxu0 }
 0x221   : > { %v9123_v43 = vadd.f32 %v9122_v24, %v9121_v52  ;;  %v12507_v10 = vadd.f32 %v9576_v44, %v4142_v25  ;;  %v9171_v28 = vadd.f32 %v9170_v27, %v9169_v31  ;;  %v12524_v52 = vrot.slane %v5880_v59, %v12517_v41 }
 0x222   : > { %v9124_v26 = vpop.f32.mrf.mxu1  ;;  %v9172_v61 = vpop.f32.mrf.mxu0 }
 0x223   : > { %14327 = vst [vmem:[#allocation13_spill] sm:$0xff] %v12507_v10  ;;  %v4147_v29 = vadd.f32 %v9123_v43, %v12413_v12  ;;  %v12534_v43 = vstv %s8685_s17  ;;  %s8931_s17 = sshll.u32 %s8288_s21, 7 }
 0x224   : > { %v9125_v36 = vpop.f32.mrf.mxu1  ;;  %v9173_v50 = vpop.f32.mrf.mxu0  ;;  %14332 = vst [vmem:[#allocation17_spill] sm:$0xff] %v12534_v43  ;;  %v12570_v59 = vadd.s32 3, %v12534_v43  ;;  %s14052_s10 = scalar_lea.hbm %s14114_s5, %s8931_s17 }
 0x225   : > { %v9126_v49 = vadd.f32 %v9125_v36, %v9124_v26  ;;  %v12511_v45 = vadd.f32 %v4274_v9, %v4147_v29  ;;  %v9174_v44 = vadd.f32 %v9173_v50, %v9172_v61  ;;  %v12538_v26 = vcombine.high %v12524_v52, %v12524_v52 }
 0x226   : > { %v9127_v53 = vpop.f32.mrf.mxu1  ;;  %v9175_v12 = vpop.f32.mrf.mxu0  ;;  %v12541_v29 = vadd.s32 2, %v12534_v43  ;;  %v12547_v61 = vadd.s32 1, %v12534_v43  ;;  %v4198_v36 = vadd.f32 %v12445_v4, %v12373_v21  ;;  %v12573_v21 = vadd.s32 4, %v12534_v43 }
 0x227   : > { %14328 = vst [vmem:[#allocation33_spill] sm:$0xff] %v12511_v45  ;;  %v4150_v37 = vadd.f32 %v9126_v49, %v3081_v38  ;;  %v12558_v38 = vadd.f32 %v12459_v3, %v12418_v46  ;;  %vm6099_vm14 = vcmp.ge.s32.totalorder %v12570_v59, 0  ;;  %vm6109_vm15 = vcmp.lt.s32.totalorder %v12570_v59, 16 }
 0x228   : > { %v9128_v39 = vpop.f32.mrf.mxu1  ;;  %v9176_v40 = vpop.f32.mrf.mxu0  ;;  %14333 = vst [vmem:[#allocation16_spill] sm:$0xff] %v12573_v21  ;;  %vm6098_vm2 = vcmp.ge.s32.totalorder %v12541_v29, 0  ;;  %vm6108_vm3 = vcmp.lt.s32.totalorder %v12541_v29, 16  ;;  %vm6097_vm5 = vcmp.ge.s32.totalorder %v12547_v61, 0  ;;  %vm6107_vm6 = vcmp.lt.s32.totalorder %v12547_v61, 16 }
 0x229   : > { %v9129_v14 = vadd.f32 %v9128_v39, %v9127_v53  ;;  %v9177_v20 = vadd.f32 %v9176_v40, %v9175_v12  ;;  %v12563_v53 = vadd.f32 %v12475_v56, %v12450_v1  ;;  %v12567_v12 = vadd.f32 %v12484_v32, %v12477_v42  ;;  %vm12725_vm8 = vmand %vm6098_vm2, %vm6108_vm3 }
 0x22a   : > { %v9130_v55 = vpop.f32.mrf.mxu1  ;;  %v9178_v34 = vpop.f32.mrf.mxu0  ;;  %v12580_v56 = vadd.f32 %v12495_v57, %v12497_v23  ;;  %v12583_v42 = vadd.f32 %v12502_v47, %v4150_v37  ;;  %vm12746_vm9 = vmand %vm12725_vm8, %vm14208_vm4 }
 0x22b   : > { %v4155_v9 = vadd.f32 %v9129_v14, %v12422_v35  ;;  %v12589_v14 = vadd.s32 6, %v12534_v43  ;;  %vm12766_vm10 = vmand %vm6097_vm5, %vm6107_vm6 }
 0x22c   : > { %v9131_v15 = vpop.f32.mrf.mxu1  ;;  %v9179_v31 = vpop.f32.mrf.mxu0  ;;  %14334 = vst [vmem:[#allocation18_spill] sm:$0xff] %v12580_v56  ;;  %14335 = vst [vmem:[#allocation21_spill] sm:$0xff] %v12583_v42 }
 0x22d   : > { %v12528_v25 = vadd.f32 %v9579_v51, %v4155_v9  ;;  %v9180_v24 = vadd.f32 %v9179_v31, %v9178_v34  ;;  %v12544_v51 = vadd.s32 16, %v14329_v60  ;;  %14337 = vst [vmem:[#allocation22_spill] sm:$0xff] %v12589_v14  ;;  %vm12805_vm12 = vmand %vm12766_vm10, %vm14208_vm4 }
 0x22e   : > { %v9599_v11 = vpop.f32.mrf.mxu1  ;;  %v9181_v16 = vpop.f32.mrf.mxu0  ;;  %vm14199_vm2 = vmpackc.low %vm12766_vm10, %vm12805_vm12 }
 0x22f   : > { %14331 = vst [vmem:[#allocation19_spill] sm:$0xff] %v12528_v25  ;;  %v5271_v35 = vadd.f32 %v9599_v11, %v9177_v20  ;;  %vm14206_vm7 = vcmp.le.s32.totalorder %v12544_v51, 16  ;;  %vm13012_vm3 = vmand %vm6099_vm14, %vm6109_vm15 }
 0x230   : > { %v5262_v27 = vpop.f32.mrf.mxu1  ;;  %v9182_v50 = vpop.f32.mrf.mxu0  ;;  %vm6170_vm11 = vmand %vm12725_vm8, %vm14206_vm7 }
 0x231   : > { %v5263_v49 = vadd.f32 %v9171_v28, %v5262_v27  ;;  %v5358_v30 = vadd.f32 %v5271_v35, %v12425_v2  ;;  %v12586_v28 = vadd.s32 5, %v12534_v43  ;;  %v12597_v47 = vadd.f32 %v9182_v50, %v9181_v16  ;;  %vm6167_vm13 = vmand %vm12766_vm10, %vm14206_vm7 }
 0x232   : > { %v9600_v39 = vpop.f32.mrf.mxu1  ;;  %v9184_v3 = vpop.f32.mrf.mxu0  ;;  %vm13036_vm5 = vmand %vm13012_vm3, %vm14208_vm4 }
 0x233   : > { %v5356_v46 = vadd.f32 %v5263_v49, %v12439_v48  ;;  %v5436_v2 = vcombine.high %v5358_v30, %v5358_v30  ;;  %v5443_v4 = vrot.slane %v5358_v30, %v12517_v41  ;;  %v5274_v1 = vadd.f32 %v9600_v39, %v9180_v24  ;;  %14336 = vst [vmem:[#allocation20_spill] sm:$0xff] %v12586_v28  ;;  %vm13053_vm6 = vmand %vm13012_vm3, %vm14206_vm7 }
 0x234   : > { %v5265_v32 = vpop.f32.mrf.mxu1  ;;  %v9185_v20 = vpop.f32.mrf.mxu0 }
 0x235   : > { %v5402_v48 = vcombine.high %v5356_v46, %v5356_v46  ;;  %v5409_v40 = vrot.slane %v5356_v46, %v12517_v41  ;;  %v5266_v55 = vadd.f32 %v9174_v44, %v5265_v32  ;;  %v5450_v9 = vrot.slane %v5436_v2, %v12517_v41 }
 0x236   : > { %v5451_v34 = vcombine.high %v5443_v4, %v5443_v4  ;;  %v12594_v57 = vadd.f32 %v12521_v19, %v5443_v4  ;;  %v5359_v23 = vadd.f32 %v5274_v1, %v12442_v5  ;;  %v12599_v37 = vpop.f32.mrf.mxu1  ;;  %v12603_v44 = vpop.f32.mrf.mxu0  ;;  %v12607_v39 = vadd.f32 %v9185_v20, %v9184_v3 }
 0x237   : > { %v5416_v15 = vrot.slane %v5402_v48, %v12517_v41  ;;  %v5417_v31 = vcombine.high %v5409_v40, %v5409_v40  ;;  %v5901_v11 = vadd.f32 %v12521_v19, %v5409_v40  ;;  %v5357_v35 = vadd.f32 %v5266_v55, %v4198_v36 }
 0x238   : > { %14338 = vst [vmem:[#allocation28_spill] sm:$0xff] %v12594_v57  ;;  %v5452_v24 = vcombine.high %v5450_v9, %v5450_v9  ;;  %v5910_v27 = vadd.f32 %v12521_v19, %v5451_v34  ;;  %v5911_v49 = vadd.f32 %v12532_v7, %v5450_v9  ;;  %v5278_v30 = vpop.f32.mrf.mxu1  ;;  %v9188_v2 = vpop.f32.mrf.mxu0  ;;  %v5453_v46 = vcombine.high %v5359_v23, %v5359_v23 }
 0x239   : > { %v5418_v5 = vcombine.high %v5416_v15, %v5416_v15  ;;  %v5902_v16 = vadd.f32 %v12532_v7, %v5417_v31  ;;  %v5903_v50 = vadd.f32 %v12524_v52, %v5416_v15  ;;  %v5991_v4 = vmax.f32 %v5901_v11, 0.0 }
 0x23a   : > { %v5419_v36 = vcombine.high %v5357_v35, %v5357_v35  ;;  %v5426_v1 = vrot.slane %v5357_v35, %v12517_v41  ;;  %v6000_v32 = vmax.f32 %v5910_v27, 0.0  ;;  %v12613_v48 = vpop.f32.mrf.mxu1  ;;  %v5912_v3 = vadd.f32 %v12524_v52, %v5452_v24  ;;  %v9190_v20 = vpop.f32.mrf.mxu0 }
 0x23b   : > { %v5904_v40 = vadd.f32 %v12538_v26, %v5418_v5  ;;  %v5992_v55 = vmax.f32 %v5902_v16, 0.0  ;;  %v6001_v9 = vmax.f32 %v5911_v49, 0.0  ;;  %v5993_v57 = vmax.f32 %v5903_v50, 0.0 }
 0x23c   : > { %v5433_v34 = vrot.slane %v5419_v36, %v12517_v41  ;;  %v5434_v15 = vcombine.high %v5426_v1, %v5426_v1  ;;  %v5905_v31 = vadd.f32 %v12521_v19, %v5426_v1  ;;  %v5281_v11 = vpop.f32.mrf.mxu1  ;;  %v5460_v27 = vrot.slane %v5359_v23, %v12517_v41  ;;  %v9191_v42 = vpop.f32.mrf.mxu0 }
 0x23d   : > { %v5994_v25 = vmax.f32 %v5904_v40, 0.0  ;;  %v6282_v35 = vcombine.low %v5991_v4, %v5992_v55  ;;  %v12622_v49 = vcombine.low %v6000_v32, %v6001_v9  ;;  %v5467_v50 = vrot.slane %v5453_v46, %v12517_v41 }
 0x23e   : > { %v5435_v43 = vcombine.high %v5433_v34, %v5433_v34  ;;  %v5906_v5 = vadd.f32 %v12532_v7, %v5434_v15  ;;  %v5907_v24 = vadd.f32 %v12524_v52, %v5433_v34  ;;  %v12624_v16 = vpop.f32.mrf.mxu1  ;;  %v5995_v45 = vmax.f32 %v5905_v31, 0.0  ;;  %v12628_v40 = vpop.f32.mrf.mxu0 }
 0x23f   : > { %v6283_v36 = vcombine.low %v5993_v57, %v5994_v25  ;;  %v6290_v1 = vrot.slane %v6282_v35, %v12517_v41  ;;  %v5468_v10 = vcombine.high %v5460_v27, %v5460_v27  ;;  %v5469_v9 = vcombine.high %v5467_v50, %v5467_v50 }
 0x240   : > { %v5908_v23 = vadd.f32 %v12538_v26, %v5435_v43  ;;  %v5996_v4 = vmax.f32 %v5906_v5, 0.0  ;;  %v5997_v55 = vmax.f32 %v5907_v24, 0.0  ;;  %v12631_v15 = vpop.f32.mrf.mxu1  ;;  %v5913_v34 = vadd.f32 %v12538_v26, %v5460_v27  ;;  %v12636_v57 = vpop.f32.mrf.mxu0 }
 0x241   : > { %v6297_v32 = vrot.slane %v6283_v36, %v12517_v41  ;;  %v5915_v25 = vadd.f32 %v12532_v7, %v5467_v50  ;;  %v5914_v35 = vadd.f32 %v12521_v19, %v5468_v10  ;;  %v6002_v63 = vmax.f32 %v5912_v3, 0.0 }
 0x242   : > { %v5998_v31 = vmax.f32 %v5908_v23, 0.0  ;;  %v6299_v46 = vcombine.low %v5995_v45, %v5996_v4  ;;  %v12639_v43 = vpop.f32.mrf.mxu1  ;;  %v6003_v24 = vmax.f32 %v5913_v34, 0.0  ;;  %v5279_v36 = vadd.f32 %v12597_v47, %v5278_v30  ;;  %v12644_v56 = vpop.f32.mrf.mxu0 }
 0x243   : > { %v6005_v14 = vmax.f32 %v5915_v25, 0.0  ;;  %v12646_v27 = vcombine.low %v6290_v1, %v6297_v32  ;;  %v6004_v18 = vmax.f32 %v5914_v35, 0.0  ;;  %v5916_v45 = vadd.f32 %v12524_v52, %v5469_v9 }
 0x244   : > { %v6300_v50 = vcombine.low %v5997_v55, %v5998_v31  ;;  %v12649_v23 = vpop.f32.mrf.mxu1  ;;  %v12651_v10 = vcombine.low %v6002_v63, %v6003_v24  ;;  %v5360_v3 = vadd.f32 %v5279_v36, %v12454_v33  ;;  %v5282_v4 = vadd.f32 %v12607_v39, %v5281_v11  ;;  %v12656_v25 = vpop.f32.mrf.mxu0 }
 0x245   : > { %14339 = vst [vmem:[#allocation27_spill] sm:$0xff] %v12646_v27  ;;  %v9189_v34 = vadd.f32 %v9188_v2, %v12603_v44  ;;  %v6307_v47 = vrot.slane %v6299_v46, %v12517_v41  ;;  %v6340_v1 = vcombine.low %v6004_v18, %v6005_v14  ;;  %v9192_v55 = vadd.f32 %v9191_v42, %v9190_v20 }
 0x246   : > { %v6314_v30 = vrot.slane %v6300_v50, %v12517_v41  ;;  %v12660_v32 = vpop.f32.mrf.mxu1  ;;  %v5470_v9 = vcombine.high %v5360_v3, %v5360_v3  ;;  %v5477_v63 = vrot.slane %v5360_v3, %v12517_v41  ;;  %v6006_v31 = vmax.f32 %v5916_v45, 0.0  ;;  %v12666_v44 = vpop.f32.mrf.mxu0 }
 0x247   : > { %v5361_v33 = vadd.f32 %v5282_v4, %v12558_v38  ;;  %v5287_v42 = vadd.f32 %v12599_v37, %v9189_v34  ;;  %v5290_v14 = vadd.f32 %v12613_v48, %v9192_v55  ;;  %v6348_v36 = vrot.slane %v6340_v1, %v12517_v41 }
 0x248   : > { %v12668_v39 = vcombine.low %v6307_v47, %v6314_v30  ;;  %v12674_v2 = vpop.f32.mrf.mxu1  ;;  %v5484_v20 = vrot.slane %v5470_v9, %v12517_v41  ;;  %v5485_v38 = vcombine.high %v5477_v63, %v5477_v63  ;;  %v5917_v11 = vadd.f32 %v12538_v26, %v5477_v63  ;;  %v12678_v35 = vpop.f32.mrf.mxu0 }
 0x249   : > { %v5487_v46 = vcombine.high %v5361_v33, %v5361_v33  ;;  %v5494_v50 = vrot.slane %v5361_v33, %v12517_v41  ;;  %v5362_v37 = vadd.f32 %v5287_v42, %v12452_v54  ;;  %v5363_v34 = vadd.f32 %v5290_v14, %v12457_v62 }
 0x24a   : > { %14340 = vst [vmem:[#allocation31_spill] sm:$0xff] %v12668_v39  ;;  %v12685_v48 = vpop.f32.mrf.mxu1  ;;  %v5486_v45 = vcombine.high %v5484_v20, %v5484_v20  ;;  %v5919_v3 = vadd.f32 %v12521_v19, %v5484_v20  ;;  %v6007_v4 = vmax.f32 %v5917_v11, 0.0  ;;  %v12689_v47 = vpop.f32.mrf.mxu0  ;;  %v12699_v63 = vadd.f32 %v12521_v19, %v5485_v38 }
 0x24b   : > { %14341 = vst [vmem:[#allocation24_spill] sm:$0xff] %v12685_v48  ;;  %v5501_v30 = vrot.slane %v5487_v46, %v12517_v41  ;;  %v5502_v55 = vcombine.high %v5494_v50, %v5494_v50  ;;  %v5921_v9 = vadd.f32 %v12524_v52, %v5494_v50  ;;  %v5504_v1 = vcombine.high %v5362_v37, %v5362_v37 }
 0x24c   : > { %v12696_v54 = vpop.f32.mrf.mxu1  ;;  %v5920_v62 = vadd.f32 %v12532_v7, %v5486_v45  ;;  %v6009_v33 = vmax.f32 %v5919_v3, 0.0  ;;  %v6341_v42 = vcombine.low %v6006_v31, %v6007_v4  ;;  %v12702_v14 = vpop.f32.mrf.mxu0  ;;  %v5511_v38 = vrot.slane %v5362_v37, %v12517_v41 }
 0x24d   : > { %v5503_v20 = vcombine.high %v5501_v30, %v5501_v30  ;;  %v5922_v11 = vadd.f32 %v12538_v26, %v5502_v55  ;;  %v5923_v46 = vadd.f32 %v12521_v19, %v5501_v30  ;;  %v6011_v50 = vmax.f32 %v5921_v9, 0.0 }
 0x24e   : > { %v12706_v24 = vpop.f32.mrf.mxu1  ;;  %v6010_v5 = vmax.f32 %v5920_v62, 0.0  ;;  %v6355_v18 = vrot.slane %v6341_v42, %v12517_v41  ;;  %v5518_v39 = vrot.slane %v5504_v1, %v12517_v41  ;;  %v12712_v31 = vpop.f32.mrf.mxu0  ;;  %v5521_v55 = vcombine.high %v5363_v34, %v5363_v34 }
 0x24f   : > { %14342 = vst [vmem:[#allocation23_spill] sm:$0xff] %v12706_v24  ;;  %v5924_v45 = vadd.f32 %v12532_v7, %v5503_v20  ;;  %v6012_v3 = vmax.f32 %v5922_v11, 0.0  ;;  %v6013_v4 = vmax.f32 %v5923_v46, 0.0  ;;  %v5519_v27 = vcombine.high %v5511_v38, %v5511_v38 }
 0x250   : > { %v12715_v30 = vpop.f32.mrf.mxu1  ;;  %v12717_v9 = vcombine.low %v6348_v36, %v6355_v18  ;;  %v6364_v62 = vcombine.low %v6009_v33, %v6010_v5  ;;  %v5520_v42 = vcombine.high %v5518_v39, %v5518_v39  ;;  %v12719_v24 = vpop.f32.mrf.mxu0  ;;  %v5925_v11 = vadd.f32 %v12524_v52, %v5511_v38 }
 0x251   : > { %14343 = vst [vmem:[#allocation26_spill] sm:$0xff] %v12715_v30  ;;  %v6014_v37 = vmax.f32 %v5924_v45, 0.0  ;;  %v6365_v20 = vcombine.low %v6011_v50, %v6012_v3  ;;  %v5927_v18 = vadd.f32 %v12521_v19, %v5518_v39  ;;  %v5926_v33 = vadd.f32 %v12538_v26, %v5519_v27 }
 0x252   : > { %v12731_v36 = vpop.f32.mrf.mxu1  ;;  %v6372_v5 = vrot.slane %v6364_v62, %v12517_v41  ;;  %v5928_v46 = vadd.f32 %v12521_v19, %v5520_v42  ;;  %v5528_v45 = vrot.slane %v5363_v34, %v12517_v41  ;;  %v12737_v29 = vpop.f32.mrf.mxu0  ;;  %v6015_v50 = vmax.f32 %v5925_v11, 0.0 }
 0x253   : > { %14346 = vst [vmem:[#allocation25_spill] sm:$0xff] %v12731_v36  ;;  %v6379_v28 = vrot.slane %v6365_v20, %v12517_v41  ;;  %v6381_v30 = vcombine.low %v6013_v4, %v6014_v37  ;;  %v6017_v3 = vmax.f32 %v5927_v18, 0.0  ;;  %v6016_v27 = vmax.f32 %v5926_v33, 0.0 }
 0x254   : > { %v12740_v38 = vpop.f32.mrf.mxu1  ;;  %v5535_v34 = vrot.slane %v5521_v55, %v12517_v41  ;;  %v5536_v62 = vcombine.high %v5528_v45, %v5528_v45  ;;  %v5929_v42 = vadd.f32 %v12532_v7, %v5528_v45  ;;  %v12752_v20 = vpop.f32.mrf.mxu0  ;;  %v6008_v4 = vmax.f32 %v12699_v63, 0.0 }
 0x255   : > { %14347 = vst [vmem:[#allocation38_spill] sm:$0xff] %v12740_v38  ;;  %v12755_v37 = vcombine.low %v6372_v5, %v6379_v28  ;;  %v6404_v11 = vrot.slane %v6017_v3, %v12517_v41  ;;  %v6018_v18 = vmax.f32 %v5928_v46, 0.0  ;;  %v6382_v38 = vcombine.low %v6015_v50, %v6016_v27 }
 0x256   : > { %v12758_v36 = vpop.f32.mrf.mxu1  ;;  %v5537_v21 = vcombine.high %v5535_v34, %v5535_v34  ;;  %v5930_v33 = vadd.f32 %v12524_v52, %v5536_v62  ;;  %v5931_v55 = vadd.f32 %v12538_v26, %v5535_v34  ;;  %v14351_v45 = vmov 0  ;;  %v12770_v28 = vpop.f32.mrf.mxu0 }
 0x257   : > { %14350 = vst [vmem:[#allocation37_spill] sm:$0xff] %v12758_v36  ;;  %v14352_v45 = vsel %vm12766_vm10, 4294967295, %v14351_v45  ;;  %v6389_v63 = vrot.slane %v6381_v30, %v12517_v41  ;;  %v6019_v46 = vmax.f32 %v5929_v42, 0.0  ;;  %v9195_v61 = vadd.f32 %v12636_v57, %v12628_v40 }
 0x258   : > { %14353 = vst [vmem:[#allocation30_spill] sm:$0xff] %v14352_v45  ;;  %v12782_v50 = vpop.f32.mrf.mxu1  ;;  %v6396_v3 = vrot.slane %v6382_v38, %v12517_v41  ;;  %v6020_v27 = vmax.f32 %v5930_v33, 0.0  ;;  %v6021_v34 = vmax.f32 %v5931_v55, 0.0  ;;  %v5932_v30 = vadd.f32 %v12521_v19, %v5537_v21  ;;  %v12786_v62 = vpop.f32.mrf.mxu0 }
 0x259   : > { %14354 = vst [vmem:[#allocation29_spill] sm:$0xff] %v12782_v50  ;;  %v12788_v5 = vcombine.low %v6018_v18, %v6019_v46  ;;  %v5295_v36 = vadd.f32 %v9195_v61, %v12631_v15  ;;  %v9198_v42 = vadd.f32 %v12656_v25, %v12644_v56  ;;  %v9201_v40 = vadd.f32 %v12678_v35, %v12666_v44 }
 0x25a   : > { %v9620_v57 = vpop.f32.mrf.mxu1  ;;  %v12795_v50 = vcombine.low %v6389_v63, %v6396_v3  ;;  %v12797_v38 = vsel %vm6170_vm11, %v6404_v11, 0.0  ;;  %v12799_v33 = vcombine.low %v6020_v27, %v6021_v34  ;;  %v14355_v21 = vmov 0  ;;  %v12815_v44 = vpop.f32.mrf.mxu0  ;;  %vm13074_vm11 = vmpackc.low %vm12725_vm8, %vm12746_vm9 }
 0x25b   : > { %v14356_v21 = vsel %vm12805_vm12, 4294967295, %v14355_v21  ;;  %v14358_v56 = vrot.slane %v12651_v10, %v12517_v41  ;;  %v14359_v15 = vrot.slane %v12622_v49, %v12517_v41  ;;  %v5364_v35 = vadd.f32 %v5295_v36, %v12466_v8 }
 0x25c   : > { %14357 = vst [vmem:[#allocation34_spill] sm:$0xff] %v14356_v21  ;;  %v6022_v11 = vmax.f32 %v5932_v30, 0.0  ;;  %v5298_v18 = vadd.f32 %v9198_v42, %v12649_v23  ;;  %v5303_v55 = vadd.f32 %v12624_v16, %v9201_v40  ;;  %v6363_v36 = vrot.slane %v6008_v4, %v12517_v41  ;;  %v12832_v23 = vpop.f32.mrf.mxu0 }
 0x25d   : > { %v6339_v25 = vcombine.low %v14359_v15, %v14358_v56  ;;  %v5538_v16 = vcombine.high %v5364_v35, %v5364_v35  ;;  %v5545_v63 = vrot.slane %v5364_v35, %v12517_v41  ;;  %v6726_v27 = vsel %vm12766_vm10, %v12717_v9, 0.0 }
 0x25e   : > { %v5365_v46 = vadd.f32 %v5298_v18, %v12563_v53  ;;  %v5366_v61 = vadd.f32 %v5303_v55, %v12462_v22  ;;  %v6727_v34 = vsel %vm6167_vm13, %v6363_v36, 0.0  ;;  %v12845_v4 = vpop.f32.mrf.mxu0  ;;  %v9204_v10 = vadd.f32 %v12702_v14, %v12689_v47  ;;  %vm13159_vm13 = vmpackc.low %vm13012_vm3, %vm13036_vm5 }
 0x25f   : > { %v6725_v3 = vsel %vm12805_vm12, %v6339_v25, 0.0  ;;  %v12843_v30 = vpack.c.bf16 %v12717_v9, %v6339_v25  ;;  %14360 = vst [vmem:[#allocation32_spill] sm:$0xff] %v12845_v4  ;;  %v5552_v42 = vrot.slane %v5538_v16, %v12517_v41  ;;  %v5553_v40 = vcombine.high %v5545_v63, %v5545_v63 }
 0x260   : > { %v5933_v53 = vadd.f32 %v12532_v7, %v5545_v63  ;;  %v5555_v57 = vcombine.high %v5365_v46, %v5365_v46  ;;  %v5562_v22 = vrot.slane %v5365_v46, %v12517_v41  ;;  %v5572_v56 = vcombine.high %v5366_v61, %v5366_v61  ;;  %v12853_v18 = vpop.f32.mrf.mxu0 }
 0x261   : > { %v5579_v15 = vrot.slane %v5366_v61, %v12517_v41  ;;  %v12851_v35 = vpack.c.bf16 %v6726_v27, %v6725_v3  ;;  %14361 = vst [vmem:[#allocation36_spill] sm:$0xff] %v12853_v18  ;;  %v5554_v55 = vcombine.high %v5552_v42, %v5552_v42  ;;  %v5934_v9 = vadd.f32 %v12524_v52, %v5553_v40 }
 0x262   : > { %v5935_v25 = vadd.f32 %v12538_v26, %v5552_v42  ;;  %v6023_v36 = vmax.f32 %v5933_v53, 0.0  ;;  %v5569_v16 = vrot.slane %v5555_v57, %v12517_v41  ;;  %v5570_v49 = vcombine.high %v5562_v22, %v5562_v22  ;;  %v12860_v8 = vpop.f32.mrf.mxu0 }
 0x263   : > { %v5937_v63 = vadd.f32 %v12521_v19, %v5562_v22  ;;  %v5586_v46 = vrot.slane %v5572_v56, %v12517_v41  ;;  %14362 = vst [vmem:[#allocation35_spill] sm:$0xff] %v12860_v8  ;;  %v6024_v61 = vmax.f32 %v5934_v9, 0.0  ;;  %v12865_v40 = vadd.f32 %v12521_v19, %v5554_v55 }
 0x264   : > { %v6025_v3 = vmax.f32 %v5935_v25, 0.0  ;;  %v6422_v27 = vcombine.low %v6022_v11, %v6023_v36  ;;  %v5571_v42 = vcombine.high %v5569_v16, %v5569_v16  ;;  %v5938_v53 = vadd.f32 %v12532_v7, %v5570_v49  ;;  %v12869_v0 = vpop.f32.mrf.mxu0 }
 0x265   : > { %v5939_v57 = vadd.f32 %v12524_v52, %v5569_v16  ;;  %14363 = vst [vmem:[#allocation40_spill] sm:$0xff] %v12869_v0  ;;  %v6027_v8 = vmax.f32 %v5937_v63, 0.0  ;;  %v5587_v9 = vcombine.high %v5579_v15, %v5579_v15  ;;  %v5588_v47 = vcombine.high %v5586_v46, %v5586_v46 }
 0x266   : > { %v6423_v22 = vcombine.low %v6024_v61, %v6025_v3  ;;  %v6430_v56 = vrot.slane %v6422_v27, %v12517_v41  ;;  %v5940_v11 = vadd.f32 %v12538_v26, %v5571_v42  ;;  %v6028_v25 = vmax.f32 %v5938_v53, 0.0  ;;  %v12873_v14 = vpop.f32.mrf.mxu0 }
 0x267   : > { %v6029_v36 = vmax.f32 %v5939_v57, 0.0  ;;  %14364 = vst [vmem:[#allocation39_spill] sm:$0xff] %v12873_v14  ;;  %v5941_v49 = vadd.f32 %v12521_v19, %v5579_v15  ;;  %v5942_v16 = vadd.f32 %v12532_v7, %v5587_v9  ;;  %v5943_v0 = vadd.f32 %v12524_v52, %v5586_v46 }
 0x268   : > { %v6437_v55 = vrot.slane %v6423_v22, %v12517_v41  ;;  %v6030_v61 = vmax.f32 %v5940_v11, 0.0  ;;  %v6446_v3 = vcombine.low %v6027_v8, %v6028_v25  ;;  %v5944_v63 = vadd.f32 %v12538_v26, %v5588_v47  ;;  %v12880_v18 = vpop.f32.mrf.mxu0 }
 0x269   : > { %v6755_v27 = vpack.c.bf16 %v6727_v34, %v6727_v34  ;;  %v6031_v57 = vmax.f32 %v5941_v49, 0.0  ;;  %v6032_v14 = vmax.f32 %v5942_v16, 0.0  ;;  %v6033_v4 = vmax.f32 %v5943_v0, 0.0 }
 0x26a   : > { %v12883_v53 = vcombine.low %v6430_v56, %v6437_v55  ;;  %v6447_v22 = vcombine.low %v6029_v36, %v6030_v61  ;;  %v6034_v15 = vmax.f32 %v5944_v63, 0.0  ;;  %v6895_v9 = vrot.slane %v12851_v35, 1  ;;  %v12886_v48 = vpop.f32.mrf.mxu0 }
 0x26b   : > { %v6454_v8 = vrot.slane %v6446_v3, %v12517_v41  ;;  %v6463_v46 = vcombine.low %v6031_v57, %v6032_v14  ;;  %v6896_v11 = vrot.slane %v6755_v27, 1  ;;  %v5306_v34 = vadd.f32 %v12639_v43, %v9204_v10 }
 0x26c   : > { %v6461_v25 = vrot.slane %v6447_v22, %v12517_v41  ;;  %v6464_v47 = vcombine.low %v6033_v4, %v6034_v15  ;;  %v6787_v56 = vshll.u32 %v12851_v35, 16  ;;  %v6792_v55 = vshll.u32 %v6755_v27, 16  ;;  %v12892_v49 = vpop.f32.mrf.mxu0 }
 0x26d   : > { %v12895_v0 = vsel %vm14207_vm0, %v6895_v9, %v6896_v11  ;;  %v5367_v36 = vadd.f32 %v5306_v34, %v12469_v17  ;;  %v6785_v16 = vshrl.u32 %v12851_v35, 16  ;;  %v9207_v14 = vadd.f32 %v12719_v24, %v12712_v31 }
 0x26e   : > { %v12901_v61 = vcombine.low %v6454_v8, %v6461_v25  ;;  %v6471_v43 = vrot.slane %v6463_v46, %v12517_v41  ;;  %v6478_v10 = vrot.slane %v6464_v47, %v12517_v41  ;;  %9637 = vmatprep.mubr.bf16.mxu0 %v12895_v0  ;;  %v6789_v4 = vrot.slane %v6787_v56, 1  ;;  %v12906_v3 = vpop.f32.mrf.mxu0  ;;  %v9890_v56 = vld [vmem:[%s14112_s3 + $0x70] sm:$0xff]  }
 0x26f   : > { %v5589_v63 = vcombine.high %v5367_v36, %v5367_v36  ;;  %v5596_v27 = vrot.slane %v5367_v36, %v12517_v41  ;;  %v5311_v17 = vadd.f32 %v9207_v14, %v12674_v2  ;;  %v14365_v24 = vsel %vm12746_vm9, %v12755_v37, 0.0 }
 0x270   : > { %v14366_v31 = vsel %vm12725_vm8, %v12795_v50, 0.0  ;;  %v6790_v57 = vor.u32 %v6789_v4, %v6785_v16  ;;  %v6794_v22 = vrot.slane %v6792_v55, 1  ;;  %v12922_v15 = vpack.c.bf16 %v12797_v38, %v12797_v38  ;;  %v12928_v2 = vpop.f32.mrf.mxu0 }
 0x271   : > { %v12918_v35 = vpack.c.bf16 %v14366_v31, %v14365_v24  ;;  %v9210_v9 = vadd.f32 %v12752_v20, %v12737_v29  ;;  %v5603_v8 = vrot.slane %v5589_v63, %v12517_v41  ;;  %v5604_v46 = vcombine.high %v5596_v27, %v5596_v27  ;;  %v9889_v29 = vld [vmem:[%s14112_s3 + $0x38] sm:$0xff]   ;;  %v9897_v24 = vld [vmem:[%s14112_s3 + $0xb0] sm:$0xff]  }
 0x272   : > { %v5945_v11 = vadd.f32 %v12521_v19, %v5596_v27  ;;  %v5368_v38 = vadd.f32 %v5311_v17, %v12479_v58  ;;  %v12941_v20 = vsel %vm14209_vm1, %v6790_v57, %v6794_v22  ;;  %v6899_v25 = vrot.slane %v12922_v15, 1  ;;  %v12949_v55 = vpop.f32.mrf.mxu0 }
 0x273   : > { %v6898_v34 = vrot.slane %v12918_v35, 1  ;;  %v5314_v47 = vadd.f32 %v9210_v9, %v12696_v54  ;;  %v5605_v58 = vcombine.high %v5603_v8, %v5603_v8  ;;  %v5946_v36 = vadd.f32 %v12521_v19, %v5604_v46  ;;  %7216 = vmatprep.mubr.bf16.mxu1 %v12941_v20 }
 0x274   : > { %v5947_v16 = vadd.f32 %v12532_v7, %v5603_v8  ;;  %v6035_v14 = vmax.f32 %v5945_v11, 0.0  ;;  %8760 = vmatmul.mubr.msk.bf16.vlgmr.msra.gmra.mxu1 %vm14199_vm2, %v12843_v30  ;;  %v5606_v54 = vcombine.high %v5368_v38, %v5368_v38  ;;  %v5613_v4 = vrot.slane %v5368_v38, %v12517_v41  ;;  %v12965_v17 = vpop.f32.mrf.mxu0  ;;  %v9891_v8 = vld [vmem:[%s14112_s3 + $0x30] sm:$0xff]  }
 0x275   : > { %v12962_v63 = vsel %vm14207_vm0, %v6898_v34, %v6899_v25  ;;  %v5369_v27 = vadd.f32 %v5314_v47, %v12567_v12  ;;  %v12970_v31 = vcombine.low %v6471_v43, %v6478_v10  ;;  %v6036_v57 = vmax.f32 %v5946_v36, 0.0  ;;  %9342 = vmatpush3.bf16.msra.mxu1 %v9889_v29  ;;  %v9892_v43 = vld [vmem:[%s14112_s3 + $0x68] sm:$0xff]  }
 0x276   : > { %v6037_v22 = vmax.f32 %v5947_v16, 0.0  ;;  %v5948_v9 = vadd.f32 %v12524_v52, %v5605_v58  ;;  %9638 = vmatmul.mubr.bf16.vlgmr.msra.gmra.mxu0 %v12962_v63  ;;  %v5620_v12 = vrot.slane %v5606_v54, %v12517_v41  ;;  %v5621_v46 = vcombine.high %v5613_v4, %v5613_v4  ;;  %9343 = vmatprep.subr.bf16.mxu1 %v9890_v56  ;;  %v12982_v10 = vpop.f32.mrf.mxu0 }
 0x277   : > { %v5949_v11 = vadd.f32 %v12538_v26, %v5613_v4  ;;  %v5623_v38 = vcombine.high %v5369_v27, %v5369_v27  ;;  %v12985_v34 = vrot.slane %v6035_v14, %v12517_v41  ;;  %v5630_v47 = vrot.slane %v5369_v27, %v12517_v41  ;;  %9654 = vmatpush3.bf16.msra.mxu0 %v12552_v13  ;;  %v9900_v14 = vld [vmem:[%s14112_s3 + $0xa8] sm:$0xff]  }
 0x278   : > { %v6487_v29 = vcombine.low %v6036_v57, %v6037_v22  ;;  %v6038_v25 = vmax.f32 %v5948_v9, 0.0  ;;  %v5622_v58 = vcombine.high %v5620_v12, %v5620_v12  ;;  %v5950_v36 = vadd.f32 %v12521_v19, %v5621_v46  ;;  %9655 = vmatprep.subr.bf16.mxu0 %v9897_v24  ;;  %v12991_v54 = vpop.f32.mrf.mxu0  ;;  %v9893_v22 = vld [vmem:[%s14112_s3 + $0x28] sm:$0xff]  }
 0x279   : > { %v5951_v56 = vadd.f32 %v12532_v7, %v5620_v12  ;;  %v6039_v16 = vmax.f32 %v5949_v11, 0.0  ;;  %v5637_v4 = vrot.slane %v5623_v38, %v12517_v41  ;;  %v5638_v57 = vcombine.high %v5630_v47, %v5630_v47  ;;  %9344 = vmatpush3.bf16.msra.mxu1 %v9891_v8  ;;  %v9894_v38 = vld [vmem:[%s14112_s3 + $0x60] sm:$0xff]  }
 0x27a   : > { %v5953_v27 = vadd.f32 %v12538_v26, %v5630_v47  ;;  %v6797_v13 = vshrl.u32 %v12918_v35, 16  ;;  %v5952_v9 = vadd.f32 %v12524_v52, %v5622_v58  ;;  %v6040_v12 = vmax.f32 %v5950_v36, 0.0  ;;  %9345 = vmatprep.subr.bf16.mxu1 %v9892_v43  ;;  %v9238_v42 = vpop.f32.mrf.mxu0 }
 0x27b   : > { %v6041_v46 = vmax.f32 %v5951_v56, 0.0  ;;  %v6488_v11 = vcombine.low %v6038_v25, %v6039_v16  ;;  %v6495_v47 = vrot.slane %v6487_v29, %v12517_v41  ;;  %v5639_v21 = vcombine.high %v5637_v4, %v5637_v4  ;;  %9656 = vmatpush3.bf16.msra.mxu0 %v9897_v24  ;;  %v9901_v29 = vld [vmem:[%s14112_s3 + $0xa0] sm:$0xff]  }
 0x27c   : > { %v5955_v8 = vadd.f32 %v12521_v19, %v5637_v4  ;;  %v6043_v45 = vmax.f32 %v5953_v27, 0.0  ;;  %v6042_v36 = vmax.f32 %v5952_v9, 0.0  ;;  %v6799_v42 = vshll.u32 %v12918_v35, 16  ;;  %9657 = vmatprep.subr.bf16.mxu0 %v9900_v14  ;;  %v9239_v56 = vpop.f32.mrf.mxu0  ;;  %v9895_v27 = vld [vmem:[%s14112_s3 + $0x20] sm:$0xff]  }
 0x27d   : > { %v6502_v43 = vrot.slane %v6488_v11, %v12517_v41  ;;  %v6504_v25 = vcombine.low %v6040_v12, %v6041_v46  ;;  %v13022_v16 = vadd.f32 %v12521_v19, %v5638_v57  ;;  %v5956_v59 = vadd.f32 %v12532_v7, %v5639_v21  ;;  %9346 = vmatpush3.bf16.msra.mxu1 %v9893_v22  ;;  %v14389_v21 = vld [vmem:[#allocation15_spill] sm:$0xff] }
 0x27e   : > { %v6045_v4 = vmax.f32 %v5955_v8, 0.0  ;;  %v6804_v24 = vshll.u32 %v12922_v15, 16  ;;  %v6505_v12 = vcombine.low %v6042_v36, %v6043_v45  ;;  %v6801_v46 = vrot.slane %v6799_v42, 1  ;;  %9347 = vmatprep.subr.bf16.mxu1 %v9894_v38  ;;  %v9898_v15 = vld [vmem:[%s14112_s3 + $0x58] sm:$0xff]  }
 0x27f   : > { %v13029_v35 = vcombine.low %v6495_v47, %v6502_v43  ;;  %v6512_v9 = vrot.slane %v6504_v25, %v12517_v41  ;;  %v6046_v57 = vmax.f32 %v5956_v59, 0.0  ;;  %v9213_v11 = vadd.f32 %v12786_v62, %v12770_v28  ;;  %9658 = vmatpush3.bf16.msra.mxu0 %v9900_v14 }
 0x280   : > { %v6806_v22 = vrot.slane %v6804_v24, 1  ;;  %v13047_v45 = vpack.c.bf16 %v12795_v50, %v12755_v37  ;;  %v6519_v38 = vrot.slane %v6505_v12, %v12517_v41  ;;  %v6802_v8 = vor.u32 %v6801_v46, %v6797_v13  ;;  %9659 = vmatprep.subr.bf16.mxu0 %v9901_v29  ;;  %v14378_v24 = vld [vmem:[#allocation24_spill] sm:$0xff] }
 0x281   : > { %v14373_v43 = vrot.slane %v12799_v33, %v12517_v41  ;;  %v14374_v28 = vrot.slane %v12788_v5, %v12517_v41  ;;  %v14375_v50 = vmax.f32 %v12865_v40, 0.0  ;;  %v13067_v25 = vcombine.low %v6045_v4, %v6046_v57  ;;  %9348 = vmatpush3.bf16.msra.mxu1 %v9895_v27  ;;  %v14380_v12 = vld [vmem:[#allocation36_spill] sm:$0xff]  ;;  %v14381_v57 = vld [vmem:[#allocation35_spill] sm:$0xff] }
 0x282   : > { %v5319_v36 = vadd.f32 %v12660_v32, %v9213_v11  ;;  %v6732_v5 = vsel %vm13012_vm3, %v12883_v53, 0.0  ;;  %v9216_v33 = vadd.f32 %v12832_v23, %v12815_v44  ;;  %v9899_v32 = vld [vmem:[%s14112_s3 + $0x18] sm:$0xff]   ;;  %v13086_v40 = vcombine.low %v6512_v9, %v6519_v38  ;;  %9349 = vmatprep.subr.bf16.mxu1 %v9898_v15  ;;  %v9902_v44 = vld [vmem:[%s14112_s3 + $0x50] sm:$0xff]   ;;  %v14379_v9 = vld [vmem:[#allocation32_spill] sm:$0xff] }
 0x283   : > { %v6421_v37 = vcombine.low %v14374_v28, %v14373_v43  ;;  %v6445_v62 = vrot.slane %v14375_v50, %v12517_v41  ;;  %v13089_v1 = vsel %vm14209_vm1, %v6802_v8, %v6806_v22  ;;  %v9904_v23 = vld [vmem:[%s14112_s3 + $0x98] sm:$0xff]   ;;  %v6044_v42 = vmax.f32 %v13022_v16, 0.0  ;;  %v14382_v22 = vld [vmem:[#allocation40_spill] sm:$0xff]  ;;  %9660 = vmatpush3.bf16.msra.mxu0 %v9901_v29  ;;  %v9903_v43 = vld [vmem:[%s14112_s3 + $0x10] sm:$0xff]  }
 0x284   : > { %7224 = vmatprep.mubr.bf16.mxu1 %v13089_v1  ;;  %v5370_v56 = vadd.f32 %v5319_v36, %v12482_v6  ;;  %v5322_v27 = vadd.f32 %v14378_v24, %v9216_v33  ;;  %v9219_v46 = vadd.f32 %v14380_v12, %v14379_v9  ;;  %v13115_v11 = vadd.f32 %v14382_v22, %v14381_v57  ;;  %v14384_v36 = vld [vmem:[#allocation16_spill] sm:$0xff]  ;;  %v9905_v29 = vld [vmem:[%s14112_s3 + $0x90] sm:$0xff]  }
 0x285   : > { %v6731_v39 = vsel %vm13036_vm5, %v6421_v37, 0.0  ;;  %v6733_v13 = vsel %vm13053_vm6, %v6445_v62, 0.0  ;;  %8763 = vmatmul.mubr.msk.bf16.gmra.mxu1 %vm13074_vm11, %v13047_v45  ;;  %v13111_v15 = vpack.c.bf16 %v12883_v53, %v6421_v37  ;;  %v6536_v28 = vrot.slane %v13067_v25, %v12517_v41  ;;  %v14383_v53 = vld [vmem:[#allocation42_spill] sm:$0xff]  ;;  %9661 = vmatprep.subr.bf16.mxu0 %v9904_v23  ;;  %v9907_v22 = vld [vmem:[%s14112_s3 + $0x8] sm:$0xff]  }
 0x286   : > { %v6758_v59 = vpack.c.bf16 %v6732_v5, %v6731_v39  ;;  %v6759_v4 = vpack.c.bf16 %v6733_v13, %v6733_v13  ;;  %v5640_v47 = vcombine.high %v5370_v56, %v5370_v56  ;;  %v5647_v6 = vrot.slane %v5370_v56, %v12517_v41  ;;  %9350 = vmatpush3.bf16.msra.mxu1 %v9899_v32  ;;  %v9906_v13 = vld [vmem:[%s14112_s3 + $0x48] sm:$0xff]  }
 0x287   : > { %v5371_v37 = vadd.f32 %v5322_v27, %v14383_v53  ;;  %vm6100_vm8 = vcmp.ge.s32.totalorder %v14384_v36, 0  ;;  %vm6110_vm9 = vcmp.lt.s32.totalorder %v14384_v36, 16  ;;  %9351 = vmatprep.subr.bf16.mxu1 %v9902_v44  ;;  %9662 = vmatpush3.bf16.msra.mxu0 %v9904_v23  ;;  %v14385_v23 = vld [vmem:[#allocation26_spill] sm:$0xff]  ;;  %v9231_v16 = vadd.f32 %v12928_v2, %v12906_v3 }
 0x288   : > { %v6901_v38 = vrot.slane %v6758_v59, 1  ;;  %v6902_v8 = vrot.slane %v6759_v4, 1  ;;  %v6811_v50 = vshll.u32 %v6758_v59, 16  ;;  %v6816_v62 = vshll.u32 %v6759_v4, 16  ;;  %9663 = vmatprep.subr.bf16.mxu0 %v9905_v29  ;;  %vm13205_vm3 = vmand %vm6100_vm8, %vm6110_vm9 }
 0x289   : > { %v5654_v5 = vrot.slane %v5640_v47, %v12517_v41  ;;  %v5655_v33 = vcombine.high %v5647_v6, %v5647_v6  ;;  %v5957_v32 = vadd.f32 %v12524_v52, %v5647_v6  ;;  %v5657_v44 = vcombine.high %v5371_v37, %v5371_v37  ;;  %vm13227_vm5 = vmand %vm13205_vm3, %vm14206_vm7 }
 0x28a   : > { %v13132_v39 = vsel %vm14207_vm0, %v6901_v38, %v6902_v8  ;;  %v5664_v56 = vrot.slane %v5371_v37, %v12517_v41  ;;  %v6809_v4 = vshrl.u32 %v6758_v59, 16  ;;  %v6813_v24 = vrot.slane %v6811_v50, 1  ;;  %9352 = vmatpush3.bf16.msra.mxu1 %v9903_v43  ;;  %v9908_v59 = vld [vmem:[%s14112_s3 + $0x88] sm:$0xff]   ;;  %vm13238_vm6 = vmand %vm13205_vm3, %vm14208_vm4 }
 0x28b   : > { %9641 = vmatprep.mubr.bf16.mxu0 %v13132_v39  ;;  %v5656_v27 = vcombine.high %v5654_v5, %v5654_v5  ;;  %v5958_v9 = vadd.f32 %v12538_v26, %v5655_v33  ;;  %v5959_v12 = vadd.f32 %v12521_v19, %v5654_v5  ;;  %v6818_v57 = vrot.slane %v6816_v62, 1  ;;  %9353 = vmatprep.subr.bf16.mxu1 %v9906_v13  ;;  %vm13321_vm2 = vmpackc.low %vm13205_vm3, %vm13238_vm6 }
 0x28c   : > { %v5671_v47 = vrot.slane %v5657_v44, %v12517_v41  ;;  %v5672_v6 = vcombine.high %v5664_v56, %v5664_v56  ;;  %v5961_v38 = vadd.f32 %v12524_v52, %v5664_v56  ;;  %v6814_v8 = vor.u32 %v6813_v24, %v6809_v4  ;;  %9664 = vmatpush3.bf16.msra.mxu0 %v9905_v29 }
 0x28d   : > { %v5960_v53 = vadd.f32 %v12532_v7, %v5656_v27  ;;  %v6047_v37 = vmax.f32 %v5957_v32, 0.0  ;;  %v6048_v43 = vmax.f32 %v5958_v9, 0.0  ;;  %v5327_v50 = vadd.f32 %v9219_v46, %v14385_v23  ;;  %v14388_v32 = vld [vmem:[#allocation20_spill] sm:$0xff]  ;;  %v9910_v46 = vld [vmem:[%s14112_s3 + $0x40] sm:$0xff]   ;;  %9665 = vmatprep.subr.bf16.mxu0 %v9908_v59  ;;  %v14391_v23 = vld [vmem:[#allocation18_spill] sm:$0xff] }
 0x28e   : > { %v6049_v62 = vmax.f32 %v5959_v12, 0.0  ;;  %v5673_v5 = vcombine.high %v5671_v47, %v5671_v47  ;;  %v5962_v33 = vadd.f32 %v12538_v26, %v5672_v6  ;;  %v13153_v44 = vadd.f32 %v12521_v19, %v5671_v47  ;;  %9354 = vmatpush3.bf16.msra.mxu1 %v9907_v22  ;;  %v14390_v47 = vld [vmem:[#allocation38_spill] sm:$0xff]  ;;  %v9911_v22 = vld [vmem:[%s14112_s3] sm:$0xff]  }
 0x28f   : > { %vm6101_vm14 = vcmp.ge.s32.totalorder %v14388_v32, 0  ;;  %vm6111_vm15 = vcmp.lt.s32.totalorder %v14388_v32, 16  ;;  %v6050_v13 = vmax.f32 %v5960_v53, 0.0  ;;  %v6529_v4 = vcombine.low %v6047_v37, %v6048_v43  ;;  %v9909_v53 = vld [vmem:[%s14112_s3 + $0x80] sm:$0xff]   ;;  %9355 = vmatprep.subr.bf16.mxu1 %v9910_v46 }
 0x290   : > { %v13169_v24 = vsel %vm14209_vm1, %v6814_v8, %v6818_v57  ;;  %v5372_v27 = vadd.f32 %v5327_v50, %v14389_v21  ;;  %v5964_v58 = vadd.f32 %v12521_v19, %v5673_v5  ;;  %v6051_v9 = vmax.f32 %v5961_v38, 0.0  ;;  %9666 = vmatpush3.bf16.msra.mxu0 %v9908_v59  ;;  %vm13255_vm8 = vmand %vm6101_vm14, %vm6111_vm15 }
 0x291   : > { %v6052_v12 = vmax.f32 %v5962_v33, 0.0  ;;  %7232 = vmatprep.mubr.bf16.mxu1 %v13169_v24  ;;  %v5330_v6 = vadd.f32 %v13115_v11, %v14390_v47  ;;  %v6543_v57 = vrot.slane %v6529_v4, %v12517_v41  ;;  %v6545_v8 = vcombine.low %v6049_v62, %v6050_v13  ;;  %v13192_v62 = vld [vmem:[%s14112_s3 + $0x238] sm:$0xff]   ;;  %9667 = vmatprep.subr.bf16.mxu0 %v9909_v53  ;;  %vm13283_vm9 = vmand %vm13255_vm8, %vm14208_vm4 }
 0x292   : > { %v5674_v37 = vcombine.high %v5372_v27, %v5372_v27  ;;  %v5681_v29 = vrot.slane %v5372_v27, %v12517_v41  ;;  %8766 = vmatmul.mubr.msk.bf16.gmra.mxu1 %vm13159_vm13, %v13111_v15  ;;  %v6054_v43 = vmax.f32 %v5964_v58, 0.0  ;;  %v9912_v58 = vld [vmem:[%s14112_s3 + $0x1f8] sm:$0xff]   ;;  %v6735_v59 = vsel %vm13205_vm3, %v12970_v31, 0.0  ;;  %vm6179_vm14 = vmand %vm13255_vm8, %vm14206_vm7 }
 0x293   : > { %v6546_v38 = vcombine.low %v6051_v9, %v6052_v12  ;;  %v5373_v50 = vadd.f32 %v5330_v6, %v14391_v23  ;;  %v13197_v5 = vcombine.low %v6536_v28, %v6543_v57  ;;  %v6553_v33 = vrot.slane %v6545_v8, %v12517_v41  ;;  %9356 = vmatpush3.bf16.msra.mxu1 %v9911_v22 }
 0x294   : > { %v5688_v13 = vrot.slane %v5674_v37, %v12517_v41  ;;  %v5689_v4 = vcombine.high %v5681_v29, %v5681_v29  ;;  %v5965_v25 = vadd.f32 %v12532_v7, %v5681_v29  ;;  %9685 = vmatprep.subr.bf16.mxu1 %v13192_v62  ;;  %9668 = vmatpush3.bf16.msra.mxu0 %v9909_v53  ;;  %v14400_v37 = vld [vmem:[#allocation39_spill] sm:$0xff] }
 0x295   : > { %v6560_v21 = vrot.slane %v6546_v38, %v12517_v41  ;;  %v5691_v28 = vcombine.high %v5373_v50, %v5373_v50  ;;  %v5698_v27 = vrot.slane %v5373_v50, %v12517_v41  ;;  %9421 = vmatprep.subr.bf16.mxu0 %v9912_v58 }
 0x296   : > { %v5690_v9 = vcombine.high %v5688_v13, %v5688_v13  ;;  %v5966_v36 = vadd.f32 %v12524_v52, %v5689_v4  ;;  %v5967_v12 = vadd.f32 %v12538_v26, %v5688_v13  ;;  %v6055_v6 = vmax.f32 %v5965_v25, 0.0 }
 0x297   : > { %v13220_v47 = vcombine.low %v6553_v33, %v6560_v21  ;;  %v5705_v57 = vrot.slane %v5691_v28, %v12517_v41  ;;  %v5706_v8 = vcombine.high %v5698_v27, %v5698_v27  ;;  %v5969_v23 = vadd.f32 %v12532_v7, %v5698_v27 }
 0x298   : > { %v5968_v29 = vadd.f32 %v12521_v19, %v5690_v9  ;;  %v6056_v38 = vmax.f32 %v5966_v36, 0.0  ;;  %v6057_v22 = vmax.f32 %v5967_v12, 0.0  ;;  %v13242_v33 = vcombine.low %v6054_v43, %v6055_v6 }
 0x299   : > { %v5707_v13 = vcombine.high %v5705_v57, %v5705_v57  ;;  %v5970_v4 = vadd.f32 %v12524_v52, %v5706_v8  ;;  %v5971_v21 = vadd.f32 %v12538_v26, %v5705_v57  ;;  %v6059_v27 = vmax.f32 %v5969_v23, 0.0 }
 0x29a   : > { %v13246_v25 = vcombine.low %v6056_v38, %v6057_v22  ;;  %v6058_v28 = vmax.f32 %v5968_v29, 0.0  ;;  %v6736_v9 = vsel %vm13227_vm5, %v12985_v34, 0.0  ;;  %v6734_v12 = vsel %vm13238_vm6, %v12901_v61, 0.0 }
 0x29b   : > { %v6060_v58 = vmax.f32 %v5970_v4, 0.0  ;;  %v6061_v36 = vmax.f32 %v5971_v21, 0.0  ;;  %v13265_v6 = vadd.f32 %v12521_v19, %v5707_v13  ;;  %v6760_v57 = vpack.c.bf16 %v6735_v59, %v6734_v12 }
 0x29c   : > { %v13267_v34 = vcombine.low %v6058_v28, %v6059_v27  ;;  %v6761_v32 = vpack.c.bf16 %v6736_v9, %v6736_v9  ;;  %v9225_v29 = vadd.f32 %v12880_v18, %v14400_v37  ;;  %v13275_v38 = vpack.c.bf16 %v12970_v31, %v12901_v61  ;;  %v14404_v61 = vld [vmem:[#allocation23_spill] sm:$0xff]  ;;  %v14406_v9 = vld [vmem:[#allocation25_spill] sm:$0xff] }
 0x29d   : > { %v9228_v22 = vadd.f32 %v12892_v49, %v12886_v48  ;;  %v13287_v23 = vcombine.low %v6060_v58, %v6061_v36  ;;  %v6904_v13 = vrot.slane %v6760_v57, 1  ;;  %v6821_v21 = vshrl.u32 %v6760_v57, 16  ;;  %v14405_v49 = vld [vmem:[#allocation22_spill] sm:$0xff] }
 0x29e   : > { %14401 = vst [vmem:[#allocation41_spill] sm:$0xff] %v13275_v38  ;;  %v6905_v4 = vrot.slane %v6761_v32, 1  ;;  %v5335_v31 = vadd.f32 %v14404_v61, %v9225_v29  ;;  %v6823_v28 = vshll.u32 %v6760_v57, 16  ;;  %v6828_v48 = vshll.u32 %v6761_v32, 16  ;;  %v14407_v57 = vld [vmem:[#allocation14_spill] sm:$0xff] }
 0x29f   : > { %vm6102_vm15 = vcmp.ge.s32.totalorder %v14405_v49, 0  ;;  %vm6112_vm5 = vcmp.lt.s32.totalorder %v14405_v49, 16  ;;  %v5338_v58 = vadd.f32 %v14406_v9, %v9228_v22  ;;  %v6527_v36 = vrot.slane %v6044_v42, %v12517_v41 }
 0x2a0   : > { %v13299_v27 = vsel %vm14207_vm0, %v6904_v13, %v6905_v4  ;;  %v6737_v12 = vsel %vm13283_vm9, %v13029_v35, 0.0  ;;  %v5374_v32 = vadd.f32 %v5335_v31, %v14407_v57  ;;  %v6825_v37 = vrot.slane %v6823_v28, 1  ;;  %v14408_v4 = vld [vmem:[#allocation13_spill] sm:$0xff]  ;;  %vm13351_vm3 = vmand %vm6102_vm15, %vm6112_vm5 }
 0x2a1   : > { %9642 = vmatmul.mubr.bf16.gmra.mxu0 %v13299_v27  ;;  %v6830_v29 = vrot.slane %v6828_v48, 1  ;;  %v6738_v13 = vsel %vm13255_vm8, %v13086_v40, 0.0  ;;  %v5375_v22 = vadd.f32 %v5338_v58, %v14408_v4  ;;  %v6739_v61 = vsel %vm6179_vm14, %v6527_v36, 0.0  ;;  %vm13368_vm6 = vmand %vm13351_vm3, %vm14208_vm4 }
 0x2a2   : > { %v6762_v9 = vpack.c.bf16 %v6738_v13, %v6737_v12  ;;  %v5708_v42 = vcombine.high %v5374_v32, %v5374_v32  ;;  %v5715_v18 = vrot.slane %v5374_v32, %v12517_v41  ;;  %v6826_v43 = vor.u32 %v6825_v37, %v6821_v21  ;;  %vm13378_vm14 = vmand %vm13351_vm3, %vm14206_vm7 }
 0x2a3   : > { %v6763_v8 = vpack.c.bf16 %v6739_v61, %v6739_v61  ;;  %v14409_v31 = vmov 0  ;;  %v5725_v28 = vcombine.high %v5375_v22, %v5375_v22  ;;  %v5732_v48 = vrot.slane %v5375_v22, %v12517_v41  ;;  %vm13388_vm15 = vmpackc.low %vm13255_vm8, %vm13283_vm9 }
 0x2a4   : > { %v14410_v31 = vsel %vm13321_vm2, 4294967295, %v14409_v31  ;;  %v6907_v58 = vrot.slane %v6762_v9, 1  ;;  %v6833_v36 = vshrl.u32 %v6762_v9, 16  ;;  %v5722_v3 = vrot.slane %v5708_v42, %v12517_v41 }
 0x2a5   : > { %14411 = vst [vmem:[#allocation12_spill] sm:$0xff] %v14410_v31  ;;  %v5723_v2 = vcombine.high %v5715_v18, %v5715_v18  ;;  %v5973_v12 = vadd.f32 %v12521_v19, %v5715_v18  ;;  %v13329_v21 = vsel %vm14209_vm1, %v6826_v43, %v6830_v29  ;;  %v5739_v46 = vrot.slane %v5725_v28, %v12517_v41 }
 0x2a6   : > { %14412 = vst [vmem:[#allocation45_spill] sm:$0xff] %v13329_v21  ;;  %7240 = vmatprep.mubr.bf16.mxu1 %v13329_v21  ;;  %v5740_v50 = vcombine.high %v5732_v48, %v5732_v48  ;;  %v5977_v57 = vadd.f32 %v12521_v19, %v5732_v48  ;;  %v6908_v32 = vrot.slane %v6763_v8, 1  ;;  %v5724_v37 = vcombine.high %v5722_v3, %v5722_v3 }
 0x2a7   : > { %v5974_v13 = vadd.f32 %v12532_v7, %v5723_v2  ;;  %v5975_v4 = vadd.f32 %v12524_v52, %v5722_v3  ;;  %v6063_v22 = vmax.f32 %v5973_v12, 0.0  ;;  %8769 = vmatmul.mubr.msk.bf16.gmra.mxu1 %vm13321_vm2, %v13275_v38  ;;  %v5741_v43 = vcombine.high %v5739_v46, %v5739_v46  ;;  %v14416_v38 = vld [vmem:[#allocation33_spill] sm:$0xff] }
 0x2a8   : > { %v5978_v18 = vadd.f32 %v12532_v7, %v5740_v50  ;;  %v5979_v29 = vadd.f32 %v12524_v52, %v5739_v46  ;;  %v6067_v61 = vmax.f32 %v5977_v57, 0.0  ;;  %v5976_v42 = vadd.f32 %v12538_v26, %v5724_v37  ;;  %v14442_v46 = vld [vmem:[#allocation28_spill] sm:$0xff] }
 0x2a9   : > { %v6064_v28 = vmax.f32 %v5974_v13, 0.0  ;;  %v6065_v48 = vmax.f32 %v5975_v4, 0.0  ;;  %v13343_v11 = vsel %vm14207_vm0, %v6907_v58, %v6908_v32  ;;  %v5980_v3 = vadd.f32 %v12538_v26, %v5741_v43  ;;  %v14415_v58 = vld [vmem:[#allocation29_spill] sm:$0xff] }
 0x2aa   : > { %v6068_v2 = vmax.f32 %v5978_v18, 0.0  ;;  %v6069_v12 = vmax.f32 %v5979_v29, 0.0  ;;  %9645 = vmatprep.mubr.bf16.mxu0 %v13343_v11  ;;  %v6835_v31 = vshll.u32 %v6762_v9, 16  ;;  %v6066_v50 = vmax.f32 %v5976_v42, 0.0  ;;  %v5345_v42 = vpop.f32.mrf.mxu1 }
 0x2ab   : > { %v6610_v57 = vcombine.low %v6063_v22, %v6064_v28  ;;  %v6840_v37 = vshll.u32 %v6763_v8, 16  ;;  %v5343_v32 = vadd.f32 %v9231_v16, %v14415_v58  ;;  %v6070_v13 = vmax.f32 %v5980_v3, 0.0 }
 0x2ac   : > { %v6627_v4 = vcombine.low %v6067_v61, %v6068_v2  ;;  %v6837_v43 = vrot.slane %v6835_v31, 1  ;;  %v13358_v18 = vpack.c.bf16 %v13086_v40, %v13029_v35  ;;  %v6601_v9 = vrot.slane %v13287_v23, %v12517_v41 }
 0x2ad   : > { %v6611_v49 = vcombine.low %v6065_v48, %v6066_v50  ;;  %v6618_v29 = vrot.slane %v6610_v57, %v12517_v41  ;;  %v5376_v21 = vadd.f32 %v5343_v32, %v14416_v38  ;;  %v6628_v16 = vcombine.low %v6069_v12, %v6070_v13  ;;  %v14424_v12 = vld [vmem:[#allocation17_spill] sm:$0xff] }
 0x2ae   : > { %v6838_v35 = vor.u32 %v6837_v43, %v6833_v36  ;;  %v6842_v40 = vrot.slane %v6840_v37, 1  ;;  %v9234_v31 = vadd.f32 %v12965_v17, %v12949_v55  ;;  %v14421_v36 = vmov 0  ;;  %v14425_v37 = vld [vmem:[#allocation21_spill] sm:$0xff] }
 0x2af   : > { %v6625_v22 = vrot.slane %v6611_v49, %v12517_v41  ;;  %v5742_v61 = vcombine.high %v5376_v21, %v5376_v21  ;;  %v5749_v28 = vrot.slane %v5376_v21, %v12517_v41  ;;  %v14422_v36 = vsel %vm13388_vm15, 4294967295, %v14421_v36 }
 0x2b0   : > { %v14423_v55 = vmax.f32 %v13153_v44, 0.0  ;;  %v6635_v48 = vrot.slane %v6627_v4, %v12517_v41  ;;  %v6642_v3 = vrot.slane %v6628_v16, %v12517_v41  ;;  %v13398_v2 = vsel %vm14209_vm1, %v6838_v35, %v6842_v40 }
 0x2b1   : > { %v5346_v21 = vadd.f32 %v9234_v31, %v5345_v42  ;;  %vm6096_vm5 = vcmp.ge.s32.totalorder %v14424_v12, 0  ;;  %vm6106_vm7 = vcmp.lt.s32.totalorder %v14424_v12, 16  ;;  %7248 = vmatprep.mubr.bf16.mxu1 %v13398_v2  ;;  %v5756_v53 = vrot.slane %v5742_v61, %v12517_v41 }
 0x2b2   : > { %v6568_v17 = vrot.slane %v14423_v55, %v12517_v41  ;;  %v5757_v59 = vcombine.high %v5749_v28, %v5749_v28  ;;  %v5981_v44 = vadd.f32 %v12521_v19, %v5749_v28  ;;  %v6740_v50 = vsel %vm13368_vm6, %v13197_v5, 0.0  ;;  %8772 = vmatmul.mubr.msk.bf16.gmra.mxu1 %vm13388_vm15, %v13358_v18  ;;  %vm13450_vm8 = vmand %vm6096_vm5, %vm6106_vm7 }
 0x2b3   : > { %v13408_v57 = vcombine.low %v6618_v29, %v6625_v22  ;;  %v5377_v58 = vadd.f32 %v5346_v21, %v14425_v37  ;;  %v6741_v32 = vsel %vm13351_vm3, %v13220_v47, 0.0  ;;  %v13419_v4 = vcombine.low %v6635_v48, %v6642_v3  ;;  %vm13476_vm7 = vmand %vm13450_vm8, %vm14208_vm4 }
 0x2b4   : > { %v6742_v13 = vsel %vm13378_vm14, %v6568_v17, 0.0  ;;  %v5758_v43 = vcombine.high %v5756_v53, %v5756_v53  ;;  %v5982_v49 = vadd.f32 %v12521_v19, %v5757_v59  ;;  %v5983_v29 = vadd.f32 %v12532_v7, %v5756_v53 }
 0x2b5   : > { %v5759_v42 = vcombine.high %v5377_v58, %v5377_v58  ;;  %v5766_v16 = vrot.slane %v5377_v58, %v12517_v41  ;;  %v6764_v35 = vpack.c.bf16 %v6741_v32, %v6740_v50  ;;  %v6765_v40 = vpack.c.bf16 %v6742_v13, %v6742_v13 }
 0x2b6   : > { %v5984_v31 = vadd.f32 %v12524_v52, %v5758_v43  ;;  %v6071_v22 = vmax.f32 %v5981_v44, 0.0  ;;  %v6072_v61 = vmax.f32 %v5982_v49, 0.0  ;;  %v6073_v28 = vmax.f32 %v5983_v29, 0.0  ;;  %v14426_v49 = vld [vmem:[#allocation37_spill] sm:$0xff] }
 0x2b7   : > { %v5773_v38 = vrot.slane %v5759_v42, %v12517_v41  ;;  %v5774_v55 = vcombine.high %v5766_v16, %v5766_v16  ;;  %v5985_v17 = vadd.f32 %v12538_v26, %v5766_v16  ;;  %v6910_v48 = vrot.slane %v6764_v35, 1 }
 0x2b8   : > { %v6651_v3 = vcombine.low %v6072_v61, %v6073_v28  ;;  %v6074_v21 = vmax.f32 %v5984_v31, 0.0  ;;  %v6911_v59 = vrot.slane %v6765_v40, 1  ;;  %v9237_v53 = vadd.f32 %v12991_v54, %v12982_v10  ;;  %v14427_v31 = vld [vmem:[#allocation19_spill] sm:$0xff] }
 0x2b9   : > { %v5775_v37 = vcombine.high %v5773_v38, %v5773_v38  ;;  %v5986_v50 = vadd.f32 %v12521_v19, %v5774_v55  ;;  %v5987_v58 = vadd.f32 %v12532_v7, %v5773_v38  ;;  %v6075_v44 = vmax.f32 %v5985_v17, 0.0 }
 0x2ba   : > { %v13432_v32 = vrot.slane %v6071_v22, %v12517_v41  ;;  %v6659_v13 = vrot.slane %v6651_v3, %v12517_v41  ;;  %v13436_v43 = vsel %vm14207_vm0, %v6910_v48, %v6911_v59  ;;  %v5351_v29 = vadd.f32 %v14426_v49, %v9237_v53  ;;  %vm13493_vm0 = vmpackc.low %vm13351_vm3, %vm13368_vm6 }
 0x2bb   : > { %v5988_v42 = vadd.f32 %v12524_v52, %v5775_v37  ;;  %v6076_v16 = vmax.f32 %v5986_v50, 0.0  ;;  %v6077_v10 = vmax.f32 %v5987_v58, 0.0  ;;  %v6652_v54 = vcombine.low %v6074_v21, %v6075_v44  ;;  %9646 = vmatmul.mubr.bf16.gmra.mxu0 %v13436_v43  ;;  %v9921_v58 = vld [vmem:[%s14112_s3 + $0x230] sm:$0xff]  }
 0x2bc   : > { %v5378_v7 = vadd.f32 %v5351_v29, %v14427_v31  ;;  %v6847_v61 = vshll.u32 %v6764_v35, 16  ;;  %v6852_v28 = vshll.u32 %v6765_v40, 16  ;;  %v13444_v22 = vpack.c.bf16 %v13220_v47, %v13197_v5 }
 0x2bd   : > { %v6078_v52 = vmax.f32 %v5988_v42, 0.0  ;;  %v6666_v55 = vrot.slane %v6652_v54, %v12517_v41  ;;  %v6845_v17 = vshrl.u32 %v6764_v35, 16  ;;  %v6062_v48 = vmax.f32 %v13265_v6, 0.0 }
 0x2be   : > { %v6668_v3 = vcombine.low %v6076_v16, %v6077_v10  ;;  %v5782_v40 = vrot.slane %v5378_v7, %v12517_v41  ;;  %v6849_v21 = vrot.slane %v6847_v61, 1  ;;  %v6093_v5 = vadd.s32 7, %v14424_v12 }
 0x2bf   : > { %v13458_v47 = vcombine.low %v6659_v13, %v6666_v55  ;;  %v6854_v59 = vrot.slane %v6852_v28, 1  ;;  %v14430_v53 = vrot.slane %v13246_v25, %v12517_v41  ;;  %v14431_v37 = vrot.slane %v13242_v33, %v12517_v41  ;;  %v14448_v28 = vld [vmem:[#allocation27_spill] sm:$0xff] }
 0x2c0   : > { %v14432_v6 = vrot.slane %v13267_v34, %v12517_v41  ;;  %v5783_v25 = vcombine.high %v5782_v40, %v5782_v40  ;;  %v5989_v44 = vadd.f32 %v12538_v26, %v5782_v40  ;;  %v6850_v33 = vor.u32 %v6849_v21, %v6845_v17  ;;  %v14449_v17 = vld [vmem:[#allocation31_spill] sm:$0xff] }
 0x2c1   : > { %v6585_v50 = vcombine.low %v14431_v37, %v14430_v53  ;;  %vm6103_vm9 = vcmp.ge.s32.totalorder %v6093_v5, 0  ;;  %vm14435_vm14 = vcmp.le.s32.totalorder %v12544_v51, 16  ;;  %vm6113_vm4 = vcmp.lt.s32.totalorder %v6093_v5, 16 }
 0x2c2   : > { %v6602_v35 = vcombine.low %v14432_v6, %v6601_v9  ;;  %vm13485_vm5 = vmand %vm13450_vm8, %vm14435_vm14  ;;  %v6609_v26 = vrot.slane %v6062_v48, %v12517_v41  ;;  %v6094_v13 = vadd.s32 8, %v14424_v12  ;;  %v6676_v49 = vrot.slane %v6668_v3, %v12517_v41 }
 0x2c3   : > { %v6079_v29 = vmax.f32 %v5989_v44, 0.0  ;;  %v13503_v42 = vsel %vm14209_vm1, %v6850_v33, %v6854_v59  ;;  %vm13505_vm14 = vmand %vm6103_vm9, %vm6113_vm4  ;;  %v14443_v16 = vmax.f32 %v14442_v46, 0.0  ;;  %v13513_v54 = vadd.f32 %v12521_v19, %v5783_v25 }
 0x2c4   : > { %v13498_v9 = vpack.c.bf16 %v6602_v35, %v6585_v50  ;;  %7256 = vmatprep.mubr.bf16.mxu1 %v13503_v42  ;;  %vm14444_vm3 = vcmp.ge.s32.totalorder %v14329_v60, 1  ;;  %v6744_v7 = vsel %vm13505_vm14, %v6602_v35, 0.0  ;;  %vm6104_vm4 = vcmp.ge.s32.totalorder %v6094_v13, 0 }
 0x2c5   : > { %v6322_v10 = vrot.slane %v14443_v16, %v12517_v41  ;;  %vm13520_vm6 = vmand %vm13505_vm14, %vm14444_vm3  ;;  %vm6114_vm9 = vcmp.lt.s32.totalorder %v6094_v13, 16  ;;  %v6669_v61 = vcombine.low %v6078_v52, %v6079_v29  ;;  %8775 = vmatmul.mubr.msk.bf16.gmra.mxu1 %vm13493_vm0, %v13444_v22  ;;  %vm14447_vm1 = vcmp.le.s32.totalorder %v12544_v51, 16 }
 0x2c6   : > { %vm6185_vm15 = vmand %vm13505_vm14, %vm14447_vm1  ;;  %v6743_v19 = vsel %vm13520_vm6, %v6585_v50, 0.0  ;;  %v6722_v55 = vsel %vm13476_vm7, %v14448_v28, 0.0  ;;  %v6723_v52 = vsel %vm13450_vm8, %v14449_v17, 0.0  ;;  %v13550_v50 = vpack.c.bf16 %v13419_v4, %v13408_v57 }
 0x2c7   : > { %v6745_v48 = vsel %vm6185_vm15, %v6609_v26, 0.0  ;;  %v6766_v3 = vpack.c.bf16 %v6744_v7, %v6743_v19  ;;  %v6724_v40 = vsel %vm13485_vm5, %v6322_v10, 0.0  ;;  %v6752_v21 = vpack.c.bf16 %v6723_v52, %v6722_v55  ;;  %vm13544_vm1 = vmand %vm6104_vm4, %vm6114_vm9 }
 0x2c8   : > { %v6683_v5 = vrot.slane %v6669_v61, %v12517_v41  ;;  %v6767_v59 = vpack.c.bf16 %v6745_v48, %v6745_v48  ;;  %v6753_v37 = vpack.c.bf16 %v6724_v40, %v6724_v40  ;;  %vm14452_vm15 = vmmov %vm14444_vm3  ;;  %v6747_v33 = vsel %vm13544_vm1, %v13419_v4, 0.0 }
 0x2c9   : > { %v6913_v6 = vrot.slane %v6766_v3, 1  ;;  %v6857_v35 = vshrl.u32 %v6766_v3, 16  ;;  %v6859_v25 = vshll.u32 %v6766_v3, 16  ;;  %vm13556_vm5 = vmand %vm13544_vm1, %vm14452_vm15  ;;  %vm14455_vm3 = vcmp.le.s32.totalorder %v12544_v51, 16 }
 0x2ca   : > { %v13563_v34 = vcombine.low %v6676_v49, %v6683_v5  ;;  %v6914_v26 = vrot.slane %v6767_v59, 1  ;;  %v6864_v13 = vshll.u32 %v6767_v59, 16  ;;  %vm6188_vm4 = vmand %vm13544_vm1, %vm14455_vm3  ;;  %v6746_v29 = vsel %vm13556_vm5, %v13408_v57, 0.0 }
 0x2cb   : > { %v6861_v46 = vrot.slane %v6859_v25, 1  ;;  %v6748_v16 = vsel %vm6188_vm4, %v13432_v32, 0.0  ;;  %v6768_v10 = vpack.c.bf16 %v6747_v33, %v6746_v29  ;;  %v6892_v7 = vrot.slane %v6752_v21, 1  ;;  %vm13582_vm15 = vmpackc.low %vm13505_vm14, %vm13520_vm6 }
 0x2cc   : > { %v6080_v4 = vmax.f32 %v13513_v54, 0.0  ;;  %vm14456_vm9 = vcmask 1046528   ;;  %v6769_v61 = vpack.c.bf16 %v6748_v16, %v6748_v16  ;;  %v6893_v19 = vrot.slane %v6753_v37, 1 }
 0x2cd   : > { %v13575_v49 = vsel %vm14456_vm9, %v6913_v6, %v6914_v26  ;;  %v6862_v55 = vor.u32 %v6861_v46, %v6857_v35  ;;  %v6866_v52 = vrot.slane %v6864_v13, 1  ;;  %v6987_v48 = vrot.slane %v6768_v10, 1  ;;  %vm14459_vm3 = vmmov %vm14456_vm9 }
 0x2ce   : > { %9649 = vmatprep.mubr.bf16.mxu0 %v13575_v49  ;;  %v6975_v3 = vshll.u32 %v6768_v10, 16  ;;  %v14457_v57 = vmov 0  ;;  %v6988_v32 = vrot.slane %v6769_v61, 1  ;;  %v6894_v54 = vsel %vm14459_vm3, %v6892_v7, %v6893_v19  ;;  %vm14461_vm9 = vmmov %vm14459_vm3 }
 0x2cf   : > { %v14458_v57 = vsel %vm13582_vm15, 4294967295, %v14457_v57  ;;  %v6973_v40 = vshrl.u32 %v6768_v10, 16  ;;  %v6980_v5 = vshll.u32 %v6769_v61, 16  ;;  %vm14460_vm4 = vsmask.f32 7424 }
 0x2d0   : > { %v13588_v59 = vsel %vm14460_vm4, %v6862_v55, %v6866_v52  ;;  %v6977_v6 = vrot.slane %v6975_v3, 1  ;;  %v6775_v35 = vshll.u32 %v6752_v21, 16  ;;  %v6780_v25 = vshll.u32 %v6753_v37, 16  ;;  %vm14462_vm3 = vmmov %vm14460_vm4  ;;  %v9913_v55 = vld [vmem:[%s14112_s3 + $0x1b8] sm:$0xff]  }
 0x2d1   : > { %7264 = vmatprep.mubr.bf16.mxu1 %v13588_v59  ;;  %v13592_v31 = vsel %vm14461_vm9, %v6987_v48, %v6988_v32  ;;  %v6773_v8 = vshrl.u32 %v6752_v21, 16  ;;  %v6095_v33 = vadd.s32 9, %v14424_v12  ;;  %v6982_v13 = vrot.slane %v6980_v5, 1 }
 0x2d2   : > { %8778 = vmatmul.mubr.msk.bf16.gmra.mxu1 %vm13582_vm15, %v13498_v9  ;;  %9650 = vmatmul.mubr.bf16.gmra.mxu0 %v13592_v31  ;;  %v6978_v26 = vor.u32 %v6977_v6, %v6973_v40  ;;  %v6777_v29 = vrot.slane %v6775_v35, 1  ;;  %v8924_v37 = vpack.c.bf16 %v13563_v34, %v13458_v47  ;;  %v6691_v46 = vrot.slane %v6080_v4, %v12517_v41  ;;  %v9915_v6 = vld [vmem:[%s14112_s3 + $0x1b0] sm:$0xff]  }
 0x2d3   : > { %9669 = vmatprep.mubr.bf16.mxu0 %v6894_v54  ;;  %vm6105_vm14 = vcmp.ge.s32.totalorder %v6095_v33, 0  ;;  %vm6115_vm6 = vcmp.lt.s32.totalorder %v6095_v33, 16  ;;  %v6782_v16 = vrot.slane %v6780_v25, 1  ;;  %vm14465_vm9 = vcmp.ge.s32.totalorder %v14329_v60, 1 }
 0x2d4   : > { %v13603_v21 = vsel %vm14462_vm3, %v6978_v26, %v6982_v13  ;;  %v6778_v12 = vor.u32 %v6777_v29, %v6773_v8  ;;  %vm13605_vm4 = vmand %vm6105_vm14, %vm6115_vm6  ;;  %vm14468_vm14 = vcmp.le.s32.totalorder %v12544_v51, 16  ;;  %v9914_v51 = vld [vmem:[%s14112_s3 + $0x1f0] sm:$0xff]   ;;  %v9918_v26 = vld [vmem:[%s14112_s3 + $0x1a8] sm:$0xff]   ;;  %v14471_v38 = vpack.c.bf16 %v14449_v17, %v14448_v28 }
 0x2d5   : > { %7272 = vmatprep.mubr.bf16.mxu1 %v13603_v21  ;;  %vm13614_vm15 = vmand %vm13605_vm4, %vm14465_vm9  ;;  %v6750_v41 = vsel %vm13605_vm4, %v13563_v34, 0.0  ;;  %v9919_v13 = vld [vmem:[%s14112_s3 + $0x1e0] sm:$0xff]   ;;  %v9922_v28 = vld [vmem:[%s14112_s3 + $0x1d8] sm:$0xff]  }
 0x2d6   : > { %v6783_v4 = vsel %vm14462_vm3, %v6778_v12, %v6782_v16  ;;  %vm6191_vm6 = vmand %vm13605_vm4, %vm14468_vm14  ;;  %v6749_v60 = vsel %vm13614_vm15, %v13458_v47, 0.0  ;;  %vm14469_vm3 = vcmask 1046528   ;;  %v9920_v29 = vld [vmem:[%s14112_s3 + $0x1a0] sm:$0xff]  }
 0x2d7   : > { %vm8779_vm9 = vmpackc.low %vm13544_vm1, %vm13556_vm5  ;;  %v6751_v61 = vsel %vm6191_vm6, %v6691_v46, 0.0  ;;  %v6770_v19 = vpack.c.bf16 %v6750_v41, %v6749_v60  ;;  %vm14470_vm6 = vsmask.f32 7424  ;;  %v9926_v46 = vld [vmem:[%s14112_s3 + $0x228] sm:$0xff]   ;;  %v9931_v17 = vld [vmem:[%s14112_s3 + $0x220] sm:$0xff]  }
 0x2d8   : > { %v6771_v52 = vpack.c.bf16 %v6751_v61, %v6751_v61  ;;  %vm8806_vm14 = vmpackc.low %vm13450_vm8, %vm13476_vm7  ;;  %v9925_v41 = vld [vmem:[%s14112_s3 + $0x190] sm:$0xff]   ;;  %v9928_v60 = vld [vmem:[%s14112_s3 + $0x188] sm:$0xff]  }
 0x2d9   : > { %v7719_v48 = vshll.u32 %v6770_v19, 16  ;;  %v7731_v3 = vrot.slane %v6770_v19, 1  ;;  %v7717_v40 = vshrl.u32 %v6770_v19, 16  ;;  %vm14474_vm8 = vmpackc.low %vm12766_vm10, %vm12805_vm12  ;;  %v9929_v61 = vld [vmem:[%s14112_s3 + $0x1c0] sm:$0xff]   ;;  %v9933_v19 = vld [vmem:[%s14112_s3 + $0x210] sm:$0xff]   ;;  %vm14478_vm10 = vnez %v14422_v36 }
 0x2da   : > { %8781 = vmatmul.mubr.msk.bf16.gmra.mxu1 %vm8779_vm9, %v13550_v50  ;;  %9670 = vmatmul.mubr.bf16.vlgmr.msra.gmra.mxu0 %v12895_v0  ;;  %v7724_v32 = vshll.u32 %v6771_v52, 16  ;;  %v7732_v54 = vrot.slane %v6771_v52, 1  ;;  %v9917_v0 = vld [vmem:[%s14112_s3 + $0x1e8] sm:$0xff]   ;;  %vm14479_vm12 = vnez %v14458_v57 }
 0x2db   : > { %7554 = vmatprep.mubr.bf16.mxu1 %v6783_v4  ;;  %9673 = vmatprep.mubr.bf16.mxu0 %v12962_v63  ;;  %v7721_v5 = vrot.slane %v7719_v48, 1  ;;  %v9927_v4 = vld [vmem:[%s14112_s3 + $0x1c8] sm:$0xff]   ;;  %v14476_v48 = vld [vmem:[#allocation41_spill] sm:$0xff] }
 0x2dc   : > { %9422 = vmatpush3.bf16.msra.mxu0 %v9913_v55  ;;  %v13651_v35 = vsel %vm14469_vm3, %v7731_v3, %v7732_v54  ;;  %v7726_v8 = vrot.slane %v7724_v32, 1  ;;  %v9930_v55 = vld [vmem:[%s14112_s3 + $0x180] sm:$0xff]   ;;  %v9934_v52 = vld [vmem:[%s14112_s3 + $0x208] sm:$0xff]  }
 0x2dd   : > { %9423 = vmatprep.subr.bf16.mxu0 %v9914_v51  ;;  %v7722_v25 = vor.u32 %v7721_v5, %v7717_v40  ;;  %v9935_v51 = vld [vmem:[%s14112_s3 + $0x200] sm:$0xff]  }
 0x2df   : > { %v13661_v33 = vsel %vm14470_vm6, %v7722_v25, %v7726_v8 }
 0x2e0   : > { %9424 = vmatpush3.bf16.msra.mxu0 %v9915_v6 }
 0x2e1   : > { %9425 = vmatprep.subr.bf16.mxu0 %v9917_v0 }
 0x2e2   : > { %8808 = vmatmul.mubr.msk.bf16.vlgmr.msra.gmra.mxu1 %vm8806_vm14, %v14471_v38  ;;  %9674 = vmatmul.mubr.bf16.gmra.mxu0 %v13132_v39 }
 0x2e3   : > { %7562 = vmatprep.mubr.bf16.mxu1 %v12941_v20  ;;  %9686 = vmatpush3.bf16.msra.mxu1 %v13192_v62  ;;  %v9923_v20 = vld [vmem:[%s14112_s3 + $0x198] sm:$0xff]   ;;  %v9924_v62 = vld [vmem:[%s14112_s3 + $0x1d0] sm:$0xff]  }
 0x2e4   : > { %9677 = vmatprep.mubr.bf16.mxu0 %v13299_v27  ;;  %9426 = vmatpush3.bf16.msra.mxu0 %v9918_v26 }
 0x2e5   : > { %9427 = vmatprep.subr.bf16.mxu0 %v9919_v13  ;;  %9687 = vmatprep.subr.bf16.mxu1 %v9921_v58 }
 0x2e7   : > { %9688 = vmatpush3.bf16.msra.mxu1 %v9921_v58 }
 0x2e8   : > { %9428 = vmatpush3.bf16.msra.mxu0 %v9920_v29  ;;  %9689 = vmatprep.subr.bf16.mxu1 %v9926_v46 }
 0x2e9   : > { %9429 = vmatprep.subr.bf16.mxu0 %v9922_v28 }
 0x2ea   : > { %8811 = vmatmul.mubr.msk.bf16.gmra.mxu1 %vm14474_vm8, %v12843_v30  ;;  %9678 = vmatmul.mubr.bf16.gmra.mxu0 %v13343_v11  ;;  %v9932_v30 = vld [vmem:[%s14112_s3 + $0x218] sm:$0xff]  }
 0x2eb   : > { %7570 = vmatprep.mubr.bf16.mxu1 %v13089_v1  ;;  %9681 = vmatprep.mubr.bf16.mxu0 %v13436_v43 }
 0x2ec   : > { %9430 = vmatpush3.bf16.msra.mxu0 %v9923_v20  ;;  %9690 = vmatpush3.bf16.msra.mxu1 %v9926_v46 }
 0x2ed   : > { %9431 = vmatprep.subr.bf16.mxu0 %v9924_v62  ;;  %9691 = vmatprep.subr.bf16.mxu1 %v9931_v17 }
 0x2f0   : > { %9432 = vmatpush3.bf16.msra.mxu0 %v9925_v41  ;;  %9692 = vmatpush3.bf16.msra.mxu1 %v9931_v17 }
 0x2f1   : > { %9433 = vmatprep.subr.bf16.mxu0 %v9927_v4  ;;  %9693 = vmatprep.subr.bf16.mxu1 %v9932_v30 }
 0x2f2   : > { %8814 = vmatmul.mubr.msk.bf16.gmra.mxu1 %vm13074_vm11, %v13047_v45  ;;  %9682 = vmatmul.mubr.bf16.gmra.mxu0 %v13575_v49 }
 0x2f3   : > { %7578 = vmatprep.mubr.bf16.mxu1 %v13169_v24  ;;  %7960 = vmatprep.mubr.bf16.mxu0 %v13089_v1  ;;  %v14475_v1 = vld [vmem:[#allocation45_spill] sm:$0xff] }
 0x2f4   : > { %9434 = vmatpush3.bf16.msra.mxu0 %v9928_v60  ;;  %9694 = vmatpush3.bf16.msra.mxu1 %v9932_v30 }
 0x2f5   : > { %9435 = vmatprep.subr.bf16.mxu0 %v9929_v61  ;;  %9695 = vmatprep.subr.bf16.mxu1 %v9933_v19 }
 0x2f8   : > { %9436 = vmatpush3.bf16.msra.mxu0 %v9930_v55  ;;  %9696 = vmatpush3.bf16.msra.mxu1 %v9933_v19 }
 0x2f9   : > { %9697 = vmatprep.subr.bf16.mxu1 %v9934_v52 }
 0x2fa   : > { %8817 = vmatmul.mubr.msk.bf16.gmra.mxu1 %vm13159_vm13, %v13111_v15 }
 0x2fb   : > { %7586 = vmatprep.mubr.bf16.mxu1 %v14475_v1  ;;  %8904 = vmatmul.mubr.msk.bf16.vlgmr.msra.gmra.mxu0 %vm13074_vm11, %v13047_v45 }
 0x2fc   : > { %7968 = vmatprep.mubr.bf16.mxu0 %v13169_v24  ;;  %9698 = vmatpush3.bf16.msra.mxu1 %v9934_v52 }
 0x2fd   : > { %9699 = vmatprep.subr.bf16.mxu1 %v9935_v51 }
 0x300   : > { %9700 = vmatpush3.bf16.msra.mxu1 %v9935_v51 }
 0x302   : > { %8820 = vmatmul.mubr.msk.bf16.gmra.mxu1 %vm13321_vm2, %v14476_v48 }
 0x303   : > { %7594 = vmatprep.mubr.bf16.mxu1 %v13398_v2  ;;  %8907 = vmatmul.mubr.msk.bf16.gmra.mxu0 %vm13159_vm13, %v13111_v15 }
 0x304   : > { %7976 = vmatprep.mubr.bf16.mxu0 %v14475_v1 }
 0x30a   : > { %8823 = vmatmul.mubr.msk.bf16.gmra.mxu1 %vm14478_vm10, %v13358_v18 }
 0x30b   : > { %7602 = vmatprep.mubr.bf16.mxu1 %v13503_v42  ;;  %8910 = vmatmul.mubr.msk.bf16.gmra.mxu0 %vm13321_vm2, %v14476_v48  ;;  %vm8177_vm2 = vcmask 1041408  }
 0x30c   : > { %7984 = vmatprep.mubr.bf16.mxu0 %v13398_v2 }
 0x312   : > { %8826 = vmatmul.mubr.msk.bf16.gmra.mxu1 %vm13493_vm0, %v13444_v22 }
 0x313   : > { %7610 = vmatprep.mubr.bf16.mxu1 %v13588_v59  ;;  %8913 = vmatmul.mubr.msk.bf16.gmra.mxu0 %vm14478_vm10, %v13358_v18 }
 0x314   : > { %7992 = vmatprep.mubr.bf16.mxu0 %v13503_v42 }
 0x31a   : > { %8829 = vmatmul.mubr.msk.bf16.gmra.mxu1 %vm14479_vm12, %v13498_v9 }
 0x31b   : > { %9701 = vmatprep.mubr.bf16.mxu1 %v12962_v63  ;;  %8916 = vmatmul.mubr.msk.bf16.gmra.mxu0 %vm13493_vm0, %v13444_v22  ;;  %vm8923_vm0 = vmpackc.low %vm13605_vm4, %vm13614_vm15 }
 0x31c   : > { %8000 = vmatprep.mubr.bf16.mxu0 %v13588_v59 }
 0x322   : > { %9702 = vmatmul.mubr.bf16.vlgmr.msra.gmra.mxu1 %v13132_v39 }
 0x323   : > { %9705 = vmatprep.mubr.bf16.mxu1 %v13299_v27  ;;  %8919 = vmatmul.mubr.msk.bf16.gmra.mxu0 %vm14479_vm12, %v13498_v9 }
 0x324   : > { %8008 = vmatprep.mubr.bf16.mxu0 %v13603_v21 }
 0x32a   : > { %9706 = vmatmul.mubr.bf16.gmra.mxu1 %v13343_v11 }
 0x32b   : > { %9709 = vmatprep.mubr.bf16.mxu1 %v13436_v43  ;;  %8922 = vmatmul.mubr.msk.bf16.gmra.mxu0 %vm8779_vm9, %v13550_v50 }
 0x32c   : > { %8016 = vmatprep.mubr.bf16.mxu0 %v13661_v33 }
 0x332   : > { %9710 = vmatmul.mubr.bf16.gmra.mxu1 %v13575_v49 }
 0x333   : > { %9713 = vmatprep.mubr.bf16.mxu1 %v13592_v31  ;;  %8925 = vmatmul.mubr.msk.bf16.gmra.mxu0 %vm8923_vm0, %v8924_v37 }
 0x334   : > { %v9277_v63 = vpop.f32.mrf.mxu1 }
 0x336   : > { %v9639_v45 = vpop.f32.mrf.mxu0  ;;  %v9278_v14 = vpop.f32.mrf.mxu1 }
 0x337   : > { %v9279_v15 = vadd.f32 %v9278_v14, %v9277_v63 }
 0x338   : > { %v7315_v39 = vpop.f32.mrf.mxu0  ;;  %v9280_v56 = vpop.f32.mrf.mxu1 }
 0x339   : > { %v13804_v24 = vadd.f32 %v9279_v15, %v7315_v39 }
 0x33a   : > { %9714 = vmatmul.mubr.bf16.gmra.mxu1 %v13651_v35  ;;  %v9640_v11 = vpop.f32.mrf.mxu0  ;;  %v9281_v27 = vpop.f32.mrf.mxu1 }
 0x33b   : > { %v9282_v18 = vadd.f32 %v9281_v27, %v9280_v56 }
 0x33c   : > { %v7318_v36 = vpop.f32.mrf.mxu0 }
 0x33d   : > { %v13806_v2 = vadd.f32 %v9282_v18, %v7318_v36 }
 0x345   : > { %v9283_v43 = vpop.f32.mrf.mxu1 }
 0x347   : > { %v9284_v22 = vpop.f32.mrf.mxu1 }
 0x348   : > { %v9285_v47 = vadd.f32 %v9284_v22, %v9283_v43 }
 0x349   : > { %v9286_v23 = vpop.f32.mrf.mxu1 }
 0x34a   : > { %v13808_v9 = vadd.f32 %v9639_v45, %v9285_v47 }
 0x34b   : > { %v9287_v42 = vpop.f32.mrf.mxu1 }
 0x34c   : > { %v9288_v53 = vadd.f32 %v9287_v42, %v9286_v23 }
 0x34e   : > { %v13810_v50 = vadd.f32 %v9640_v11, %v9288_v53 }
 0x352   : > { %v9289_v44 = vpop.f32.mrf.mxu1 }
 0x354   : > { %v9290_v34 = vpop.f32.mrf.mxu1 }
 0x355   : > { %v9291_v49 = vadd.f32 %v9290_v34, %v9289_v44 }
 0x356   : > { %v9292_v57 = vpop.f32.mrf.mxu1 }
 0x358   : > { %v9293_v59 = vpop.f32.mrf.mxu1 }
 0x359   : > { %v9294_v31 = vadd.f32 %v9293_v59, %v9292_v57 }
 0x361   : > { %v9643_v37 = vpop.f32.mrf.mxu0 }
 0x363   : > { %v7331_v21 = vpop.f32.mrf.mxu0 }
 0x364   : > { %v13812_v10 = vadd.f32 %v9291_v49, %v7331_v21 }
 0x365   : > { %v9644_v7 = vpop.f32.mrf.mxu0 }
 0x367   : > { %v9295_v32 = vpop.f32.mrf.mxu1  ;;  %v7334_v54 = vpop.f32.mrf.mxu0 }
 0x368   : > { %v13814_v40 = vadd.f32 %v9294_v31, %v7334_v54 }
 0x369   : > { %v9296_v5 = vpop.f32.mrf.mxu1 }
 0x36a   : > { %v9297_v6 = vadd.f32 %v9296_v5, %v9295_v32 }
 0x36b   : > { %v9298_v35 = vpop.f32.mrf.mxu1 }
 0x36c   : > { %v13816_v0 = vadd.f32 %v9643_v37, %v9297_v6 }
 0x36d   : > { %v9299_v25 = vpop.f32.mrf.mxu1 }
 0x36e   : > { %v9300_v8 = vadd.f32 %v9299_v25, %v9298_v35 }
 0x370   : > { %v13818_v33 = vadd.f32 %v9644_v7, %v9300_v8 }
 0x372   : > { %v9301_v26 = vpop.f32.mrf.mxu1 }
 0x374   : > { %v9302_v13 = vpop.f32.mrf.mxu1 }
 0x375   : > { %v9303_v58 = vadd.f32 %v9302_v13, %v9301_v26 }
 0x376   : > { %v9304_v38 = vpop.f32.mrf.mxu1 }
 0x378   : > { %v9305_v29 = vpop.f32.mrf.mxu1 }
 0x379   : > { %v9306_v46 = vadd.f32 %v9305_v29, %v9304_v38 }
 0x37b   : > { %v9647_v28 = vpop.f32.mrf.mxu0 }
 0x37d   : > { %v7347_v20 = vpop.f32.mrf.mxu0 }
 0x37e   : > { %v13820_v62 = vadd.f32 %v9303_v58, %v7347_v20 }
 0x37f   : > { %v9648_v17 = vpop.f32.mrf.mxu0 }
 0x381   : > { %v7350_v12 = vpop.f32.mrf.mxu0 }
 0x382   : > { %v13822_v16 = vadd.f32 %v9306_v46, %v7350_v12 }
 0x385   : > { %v9307_v41 = vpop.f32.mrf.mxu1 }
 0x387   : > { %v9308_v4 = vpop.f32.mrf.mxu1 }
 0x388   : > { %v9309_v30 = vadd.f32 %v9308_v4, %v9307_v41 }
 0x389   : > { %v9310_v60 = vpop.f32.mrf.mxu1 }
 0x38a   : > { %v13824_v61 = vadd.f32 %v9647_v28, %v9309_v30 }
 0x38b   : > { %v9311_v19 = vpop.f32.mrf.mxu1 }
 0x38c   : > { %v9312_v55 = vadd.f32 %v9311_v19, %v9310_v60 }
 0x38e   : > { %v13826_v52 = vadd.f32 %v9648_v17, %v9312_v55 }
 0x392   : > { %v9313_v51 = vpop.f32.mrf.mxu1  ;;  %v9651_v1 = vpop.f32.mrf.mxu0 }
 0x394   : > { %v9314_v48 = vpop.f32.mrf.mxu1  ;;  %v7363_v3 = vpop.f32.mrf.mxu0 }
 0x395   : > { %v9315_v63 = vadd.f32 %v9314_v48, %v9313_v51 }
 0x396   : > { %v9316_v45 = vpop.f32.mrf.mxu1  ;;  %v9652_v14 = vpop.f32.mrf.mxu0 }
 0x397   : > { %v13828_v15 = vadd.f32 %v9315_v63, %v7363_v3 }
 0x398   : > { %v9317_v39 = vpop.f32.mrf.mxu1  ;;  %v7366_v56 = vpop.f32.mrf.mxu0 }
 0x399   : > { %v9318_v11 = vadd.f32 %v9317_v39, %v9316_v45 }
 0x39a   : > { %v9319_v27 = vpop.f32.mrf.mxu1  ;;  %v9671_v18 = vpop.f32.mrf.mxu0 }
 0x39b   : > { %v13830_v36 = vadd.f32 %v9318_v11, %v7366_v56 }
 0x39c   : > { %v9320_v43 = vpop.f32.mrf.mxu1  ;;  %v7653_v22 = vpop.f32.mrf.mxu0 }
 0x39d   : > { %v9321_v47 = vadd.f32 %v9320_v43, %v9319_v27 }
 0x39e   : > { %v9322_v23 = vpop.f32.mrf.mxu1  ;;  %v9672_v42 = vpop.f32.mrf.mxu0 }
 0x39f   : > { %v13832_v53 = vadd.f32 %v9651_v1, %v9321_v47 }
 0x3a0   : > { %v9323_v44 = vpop.f32.mrf.mxu1  ;;  %v7656_v34 = vpop.f32.mrf.mxu0 }
 0x3a1   : > { %v9324_v49 = vadd.f32 %v9323_v44, %v9322_v23 }
 0x3a2   : > { %v9357_v57 = vpop.f32.mrf.mxu1  ;;  %v9675_v59 = vpop.f32.mrf.mxu0 }
 0x3a3   : > { %v13834_v31 = vadd.f32 %v9652_v14, %v9324_v49 }
 0x3a4   : > { %v9358_v37 = vpop.f32.mrf.mxu1  ;;  %v7669_v21 = vpop.f32.mrf.mxu0 }
 0x3a5   : > { %v9359_v7 = vadd.f32 %v9358_v37, %v9357_v57 }
 0x3a6   : > { %v9360_v32 = vpop.f32.mrf.mxu1  ;;  %v9676_v54 = vpop.f32.mrf.mxu0 }
 0x3a7   : > { %v7557_v5 = vadd.f32 %v9359_v7, %v13804_v24 }
 0x3a8   : > { %v9361_v6 = vpop.f32.mrf.mxu1  ;;  %v7672_v35 = vpop.f32.mrf.mxu0 }
 0x3a9   : > { %v9362_v25 = vadd.f32 %v9361_v6, %v9360_v32  ;;  %v13837_v8 = vadd.f32 %v7653_v22, %v7557_v5 }
 0x3aa   : > { %v9363_v26 = vpop.f32.mrf.mxu1  ;;  %v13839_v13 = vpop.f32.mrf.mxu0 }
 0x3ab   : > { %v7560_v58 = vadd.f32 %v9362_v25, %v13806_v2 }
 0x3ac   : > { %v9364_v38 = vpop.f32.mrf.mxu1  ;;  %v7685_v29 = vpop.f32.mrf.mxu0 }
 0x3ad   : > { %v9365_v46 = vadd.f32 %v9364_v38, %v9363_v26  ;;  %v13842_v28 = vadd.f32 %v7656_v34, %v7560_v58 }
 0x3ae   : > { %v9366_v20 = vpop.f32.mrf.mxu1  ;;  %v13844_v17 = vpop.f32.mrf.mxu0 }
 0x3af   : > { %v7565_v24 = vadd.f32 %v9365_v46, %v13808_v9 }
 0x3b0   : > { %v9367_v12 = vpop.f32.mrf.mxu1  ;;  %v7688_v41 = vpop.f32.mrf.mxu0 }
 0x3b1   : > { %v9368_v4 = vadd.f32 %v9367_v12, %v9366_v20  ;;  %v13847_v30 = vadd.f32 %v9671_v18, %v7565_v24 }
 0x3b2   : > { %v9369_v60 = vpop.f32.mrf.mxu1  ;;  %v13849_v19 = vpop.f32.mrf.mxu0 }
 0x3b3   : > { %v7568_v2 = vadd.f32 %v9368_v4, %v13810_v50 }
 0x3b4   : > { %v9370_v55 = vpop.f32.mrf.mxu1  ;;  %v13852_v51 = vpop.f32.mrf.mxu0 }
 0x3b5   : > { %v9371_v1 = vadd.f32 %v9370_v55, %v9369_v60  ;;  %v13854_v48 = vadd.f32 %v9672_v42, %v7568_v2 }
 0x3b6   : > { %v9372_v3 = vpop.f32.mrf.mxu1  ;;  %v13856_v63 = vpop.f32.mrf.mxu0 }
 0x3b7   : > { %v7573_v9 = vadd.f32 %v9371_v1, %v13812_v10 }
 0x3b8   : > { %v9373_v45 = vpop.f32.mrf.mxu1  ;;  %v13859_v14 = vpop.f32.mrf.mxu0 }
 0x3b9   : > { %v9374_v39 = vadd.f32 %v9373_v45, %v9372_v3  ;;  %v13861_v56 = vadd.f32 %v7669_v21, %v7573_v9 }
 0x3ba   : > { %v9375_v11 = vpop.f32.mrf.mxu1 }
 0x3bb   : > { %v7576_v50 = vadd.f32 %v9374_v39, %v13814_v40  ;;  %v13864_v27 = vpop.f32.mrf.mxu0 }
 0x3bc   : > { %v9376_v18 = vpop.f32.mrf.mxu1 }
 0x3bd   : > { %v9377_v43 = vadd.f32 %v9376_v18, %v9375_v11  ;;  %v13866_v22 = vpop.f32.mrf.mxu0  ;;  %v13868_v47 = vadd.f32 %v7672_v35, %v7576_v50 }
 0x3be   : > { %v9378_v23 = vpop.f32.mrf.mxu1 }
 0x3bf   : > { %v7581_v10 = vadd.f32 %v9377_v43, %v13816_v0  ;;  %v13871_v42 = vpop.f32.mrf.mxu0 }
 0x3c0   : > { %v9379_v44 = vpop.f32.mrf.mxu1 }
 0x3c1   : > { %v9380_v34 = vadd.f32 %v9379_v44, %v9378_v23  ;;  %v13873_v49 = vpop.f32.mrf.mxu0  ;;  %v13875_v57 = vadd.f32 %v9675_v59, %v7581_v10 }
 0x3c2   : > { %v9381_v40 = vpop.f32.mrf.mxu1 }
 0x3c3   : > { %v7584_v37 = vadd.f32 %v9380_v34, %v13818_v33  ;;  %v9443_v21 = vpop.f32.mrf.mxu0 }
 0x3c4   : > { %v9382_v7 = vpop.f32.mrf.mxu1 }
 0x3c5   : > { %v9383_v32 = vadd.f32 %v9382_v7, %v9381_v40  ;;  %v9444_v5 = vpop.f32.mrf.mxu0  ;;  %v13878_v6 = vadd.f32 %v9676_v54, %v7584_v37 }
 0x3c6   : > { %v9384_v35 = vpop.f32.mrf.mxu1 }
 0x3c7   : > { %v7589_v0 = vadd.f32 %v9383_v32, %v13820_v62  ;;  %v9446_v25 = vpop.f32.mrf.mxu0 }
 0x3c8   : > { %v9385_v26 = vpop.f32.mrf.mxu1 }
 0x3c9   : > { %v9386_v58 = vadd.f32 %v9385_v26, %v9384_v35  ;;  %v9447_v38 = vpop.f32.mrf.mxu0  ;;  %v13881_v46 = vadd.f32 %v7685_v29, %v7589_v0 }
 0x3ca   : > { %v9387_v59 = vpop.f32.mrf.mxu1 }
 0x3cb   : > { %v7592_v20 = vadd.f32 %v9386_v58, %v13822_v16  ;;  %v13884_v24 = vpop.f32.mrf.mxu0 }
 0x3cc   : > { %v9388_v33 = vpop.f32.mrf.mxu1 }
 0x3cd   : > { %v9389_v12 = vadd.f32 %v9388_v33, %v9387_v59  ;;  %v9450_v4 = vpop.f32.mrf.mxu0  ;;  %v13886_v60 = vadd.f32 %v7688_v41, %v7592_v20  ;;  %v9439_v33 = vadd.f32 %v13866_v22, %v13864_v27 }
 0x3ce   : > { %v9390_v54 = vpop.f32.mrf.mxu1 }
 0x3cf   : > { %v7597_v2 = vadd.f32 %v9389_v12, %v13824_v61  ;;  %v13889_v62 = vpop.f32.mrf.mxu0 }
 0x3d0   : > { %v9391_v55 = vpop.f32.mrf.mxu1 }
 0x3d1   : > { %v9392_v1 = vadd.f32 %v9391_v55, %v9390_v54  ;;  %v13891_v3 = vpop.f32.mrf.mxu0  ;;  %v13894_v29 = vadd.f32 %v13839_v13, %v7597_v2 }
 0x3d2   : > { %v9393_v16 = vpop.f32.mrf.mxu1 }
 0x3d3   : > { %v7600_v9 = vadd.f32 %v9392_v1, %v13826_v52  ;;  %v9455_v45 = vpop.f32.mrf.mxu0 }
 0x3d4   : > { %v9394_v39 = vpop.f32.mrf.mxu1 }
 0x3d5   : > { %v9395_v11 = vadd.f32 %v9394_v39, %v9393_v16  ;;  %v9456_v41 = vpop.f32.mrf.mxu0  ;;  %v13898_v50 = vadd.f32 %v13844_v17, %v7600_v9 }
 0x3d6   : > { %v9396_v61 = vpop.f32.mrf.mxu1 }
 0x3d7   : > { %v7605_v18 = vadd.f32 %v9395_v11, %v13828_v15  ;;  %v13901_v43 = vpop.f32.mrf.mxu0 }
 0x3d8   : > { %v9397_v23 = vpop.f32.mrf.mxu1 }
 0x3d9   : > { %v9398_v10 = vadd.f32 %v9397_v23, %v9396_v61  ;;  %v9459_v44 = vpop.f32.mrf.mxu0  ;;  %v13904_v13 = vadd.f32 %v13852_v51, %v7605_v18  ;;  %v9445_v51 = vadd.f32 %v9444_v5, %v9443_v21  ;;  %v9448_v5 = vadd.f32 %v9447_v38, %v9446_v25  ;;  %v9937_v23 = vld [vmem:[%s10218_s15 + $0x48] sm:$0xff] }
 0x3da   : > { %v9399_v34 = vpop.f32.mrf.mxu1  ;;  %v9451_v18 = vadd.f32 %v9450_v4, %v13884_v24 }
 0x3db   : > { %v7608_v52 = vadd.f32 %v9398_v10, %v13830_v36  ;;  %v13907_v40 = vpop.f32.mrf.mxu0 }
 0x3dc   : > { %v9400_v37 = vpop.f32.mrf.mxu1 }
 0x3dd   : > { %v9401_v7 = vadd.f32 %v9400_v37, %v9399_v34  ;;  %v13909_v17 = vpop.f32.mrf.mxu0  ;;  %v13912_v32 = vadd.f32 %v13859_v14, %v7608_v52 }
 0x3de   : > { %v9402_v15 = vpop.f32.mrf.mxu1 }
 0x3df   : > { %v7613_v35 = vadd.f32 %v9401_v7, %v13832_v53  ;;  %v13915_v0 = vpop.f32.mrf.mxu0  ;;  %v13928_v53 = vld [vmem:[%s14113_s4] ss:$0 sm:$0xff] }
 0x3e0   : > { %v9403_v26 = vpop.f32.mrf.mxu1 }
 0x3e1   : > { %v9404_v58 = vadd.f32 %v9403_v26, %v9402_v15  ;;  %v13917_v59 = vpop.f32.mrf.mxu0  ;;  %v13920_v36 = vadd.f32 %v13849_v19, %v7613_v35  ;;  %v9938_v15 = vld [vmem:[%s10218_s15 + $0x30] sm:$0xff]  ;;  %v9460_v26 = vadd.f32 %v9459_v44, %v13901_v43 }
 0x3e2   : > { %v9703_v20 = vpop.f32.mrf.mxu1 }
 0x3e3   : > { %v7616_v14 = vadd.f32 %v9404_v58, %v13834_v31  ;;  %v8068_v12 = vadd.f32 %v9703_v20, %v9445_v51  ;;  %v9467_v54 = vpop.f32.mrf.mxu0  ;;  %v9442_v31 = vadd.f32 %v13873_v49, %v13871_v42  ;;  %v9457_v42 = vadd.f32 %v9456_v41, %v9455_v45 }
 0x3e4   : > { %v8059_v21 = vpop.f32.mrf.mxu1 }
 0x3e5   : > { %v8124_v2 = vadd.f32 %v8068_v12, %v13847_v30  ;;  %v8060_v55 = vadd.f32 %v9439_v33, %v8059_v21  ;;  %v9468_v19 = vpop.f32.mrf.mxu0  ;;  %v13932_v1 = vadd.f32 %v13856_v63, %v7616_v14  ;;  %v9939_v33 = vld [vmem:[%s10218_s15 + $0x58] sm:$0xf] }
 0x3e6   : > { %v9704_v27 = vpop.f32.mrf.mxu1  ;;  %v9469_v43 = vadd.f32 %v9468_v19, %v9467_v54 }
 0x3e7   : > { %v8147_v22 = vadd.f32 %v13928_v53, %v8124_v2  ;;  %v8122_v16 = vadd.f32 %v8060_v55, %v13837_v8  ;;  %v8071_v9 = vadd.f32 %v9704_v27, %v9448_v5  ;;  %v13938_v39 = vpop.f32.mrf.mxu0  ;;  %v9941_v27 = vld [vmem:[%s10218_s15 + $0x40] sm:$0xf] }
 0x3e8   : > { %v8062_v25 = vpop.f32.mrf.mxu1 }
 0x3e9   : > { %v8181_v38 = vrot.slane %v8147_v22, 6  ;;  %v8145_v30 = vadd.f32 %v13928_v53, %v8122_v16  ;;  %v8125_v63 = vadd.f32 %v8071_v9, %v13854_v48  ;;  %v8063_v11 = vadd.f32 %v9442_v31, %v8062_v25  ;;  %v9471_v61 = vpop.f32.mrf.mxu0  ;;  %v9942_v9 = vld [vmem:[%s10218_s15 + $0x38] sm:$0xff] }
 0x3ea   : > { %v9707_v49 = vpop.f32.mrf.mxu1 }
 0x3eb   : > { %v8229_v10 = vadd.f32 %v9937_v23, %v8181_v38  ;;  %v8178_v8 = vrot.slane %v8145_v30, 6  ;;  %v8148_v34 = vadd.f32 %v13928_v53, %v8125_v63  ;;  %v8123_v52 = vadd.f32 %v8063_v11, %v13842_v28  ;;  %v13946_v37 = vpop.f32.mrf.mxu0 }
 0x3ec   : > { %v8084_v48 = vadd.f32 %v9707_v49, %v9457_v42  ;;  %v8075_v7 = vpop.f32.mrf.mxu1  ;;  %v9454_v28 = vadd.f32 %v13891_v3, %v13889_v62  ;;  %v9940_v62 = vld [vmem:[%s10218_s15 + $0x50] sm:$0xff]  ;;  %v9463_v30 = vadd.f32 %v13909_v17, %v13907_v40  ;;  %v9943_v49 = vld [vmem:[%s10218_s15 + $0x78] sm:$0xff] }
 0x3ed   : > { %8253 = vst [vmem:[%s10171_s27 + $0xe] sm:$0xfc] %v8229_v10  ;;  %v8226_v35 = vadd.f32 %v9938_v15, %v8178_v8  ;;  %v8182_v24 = vrot.slane %v8148_v34, 6  ;;  %v8146_v4 = vadd.f32 %v13928_v53, %v8123_v52  ;;  %v8076_v45 = vadd.f32 %v9451_v18, %v8075_v7  ;;  %v13951_v41 = vpop.f32.mrf.mxu0  ;;  %v9944_v34 = vld [vmem:[%s10218_s15 + $0x60] sm:$0xff] }
 0x3ee   : > { %v8128_v51 = vadd.f32 %v8084_v48, %v13875_v57  ;;  %v9708_v58 = vpop.f32.mrf.mxu1  ;;  %v9472_v10 = vadd.f32 %v9471_v61, %v13938_v39 }
 0x3ef   : > { %8250 = vst [vmem:[%s10171_s27 - $0x2] sm:$0xfc] %v8226_v35  ;;  %v8183_v20 = vsel %vm8177_vm2, %v8181_v38, %v8182_v24  ;;  %v8231_v14 = vadd.f32 %v9939_v33, %v8182_v24  ;;  %v8179_v12 = vrot.slane %v8146_v4, 6  ;;  %v8126_v21 = vadd.f32 %v8076_v45, %v13861_v56  ;;  %v13961_v5 = vpop.f32.mrf.mxu0 }
 0x3f0   : > { %v8230_v3 = vadd.f32 %v9940_v62, %v8183_v20  ;;  %v8151_v44 = vadd.f32 %v13928_v53, %v8128_v51  ;;  %v8087_v57 = vadd.f32 %v9708_v58, %v9460_v26  ;;  %v8078_v2 = vpop.f32.mrf.mxu1  ;;  %v9945_v26 = vld [vmem:[%s10218_s15 + $0x88] sm:$0xf]  ;;  %v9946_v20 = vld [vmem:[%s10218_s15 + $0x80] sm:$0xff] }
 0x3f1   : > { %8255 = vst [vmem:[%s10171_s27 + $0x1e] sm:$0x3] %v8231_v14  ;;  %v8180_v55 = vsel %vm8177_vm2, %v8178_v8, %v8179_v12  ;;  %v8228_v31 = vadd.f32 %v9941_v27, %v8179_v12  ;;  %v8149_v22 = vadd.f32 %v13928_v53, %v8126_v21  ;;  %v8079_v56 = vadd.f32 %v9454_v28, %v8078_v2  ;;  %v13969_v16 = vpop.f32.mrf.mxu0  ;;  %v9947_v12 = vld [vmem:[%s10218_s15 + $0x70] sm:$0xf] }
 0x3f2   : > { %8254 = vst [vmem:[%s10171_s27 + $0x16] sm:$0xff] %v8230_v3  ;;  %v8227_v54 = vadd.f32 %v9942_v9, %v8180_v55  ;;  %v8187_v19 = vrot.slane %v8151_v44, 6  ;;  %v8129_v25 = vadd.f32 %v8087_v57, %v13878_v6  ;;  %v9711_v38 = vpop.f32.mrf.mxu1  ;;  %v9948_v3 = vld [vmem:[%s10218_s15 + $0x68] sm:$0xff]  ;;  %v9475_v2 = vadd.f32 %v13951_v41, %v13946_v37  ;;  %v9950_v37 = vld [vmem:[%s10218_s15 + $0x90] sm:$0xff] }
 0x3f3   : > { %8252 = vst [vmem:[%s10171_s27 + $0xe] sm:$0x3] %v8228_v31  ;;  %v8184_v63 = vrot.slane %v8149_v22, 6  ;;  %v8127_v11 = vadd.f32 %v8079_v56, %v13868_v47  ;;  %v8100_v18 = vadd.f32 %v9711_v38, %v9469_v43  ;;  %v9479_v42 = vpop.f32.mrf.mxu0  ;;  %v9949_v55 = vld [vmem:[%s10218_s15 + $0xa8] sm:$0xff] }
 0x3f4   : > { %8251 = vst [vmem:[%s10171_s27 + $0x6] sm:$0xff] %v8227_v54  ;;  %v8235_v23 = vadd.f32 %v9943_v49, %v8187_v19  ;;  %v8152_v8 = vadd.f32 %v13928_v53, %v8129_v25  ;;  %v8091_v6 = vpop.f32.mrf.mxu1  ;;  %v9951_v49 = vld [vmem:[%s10218_s15 + $0xb8] sm:$0xf] }
 0x3f5   : > { %v8232_v52 = vadd.f32 %v9944_v34, %v8184_v63  ;;  %v8150_v40 = vadd.f32 %v13928_v53, %v8127_v11  ;;  %v8132_v17 = vadd.f32 %v8100_v18, %v13894_v29  ;;  %v8092_v48 = vadd.f32 %v9463_v30, %v8091_v6  ;;  %v9480_v47 = vpop.f32.mrf.mxu0  ;;  %v9952_v6 = vld [vmem:[%s10218_s15 + $0xb0] sm:$0xff] }
 0x3f6   : > { %8259 = vst [vmem:[%s10171_s27 + $0x2e] sm:$0xfc] %v8235_v23  ;;  %v8188_v7 = vrot.slane %v8152_v8, 6  ;;  %v9712_v15 = vpop.f32.mrf.mxu1  ;;  %v9481_v35 = vadd.f32 %v9480_v47, %v9479_v42  ;;  %v9466_v29 = vadd.f32 %v13917_v59, %v13915_v0  ;;  %v9478_v42 = vadd.f32 %v13969_v16, %v13961_v5  ;;  %v9954_v47 = vld [vmem:[%s10218_s15 + $0x98] sm:$0xff] }
 0x3f7   : > { %8256 = vst [vmem:[%s10171_s27 + $0x1e] sm:$0xfc] %v8232_v52  ;;  %v8185_v39 = vrot.slane %v8150_v40, 6  ;;  %v8155_v61 = vadd.f32 %v13928_v53, %v8132_v17  ;;  %v8130_v24 = vadd.f32 %v8092_v48, %v13881_v46  ;;  %v8103_v4 = vadd.f32 %v9712_v15, %v9472_v10  ;;  %v9482_v45 = vpop.f32.mrf.mxu0  ;;  %v9953_v40 = vld [vmem:[%s10218_s15 + $0xa0] sm:$0xf]  ;;  %v9955_v15 = vld [vmem:[%s10218_s15 + $0xd8] sm:$0xff] }
 0x3f8   : > { %v8189_v28 = vsel %vm8177_vm2, %v8187_v19, %v8188_v7  ;;  %v8237_v51 = vadd.f32 %v9945_v26, %v8188_v7  ;;  %v8094_v58 = vpop.f32.mrf.mxu1  ;;  %v9957_v26 = vld [vmem:[%s10218_s15 + $0xe8] sm:$0xf] }
 0x3f9   : > { %v8236_v33 = vadd.f32 %v9946_v20, %v8189_v28  ;;  %v8186_v14 = vsel %vm8177_vm2, %v8184_v63, %v8185_v39  ;;  %v8234_v46 = vadd.f32 %v9947_v12, %v8185_v39  ;;  %v8193_v21 = vrot.slane %v8155_v61, 6  ;;  %v9483_v62 = vpop.f32.mrf.mxu0  ;;  %v9960_v12 = vld [vmem:[%s10218_s15 + $0xc8] sm:$0xff] }
 0x3fa   : > { %8261 = vst [vmem:[%s10171_s27 + $0x3e] sm:$0x3] %v8237_v51  ;;  %v8233_v0 = vadd.f32 %v9948_v3, %v8186_v14  ;;  %v8153_v59 = vadd.f32 %v13928_v53, %v8130_v24  ;;  %v8133_v43 = vadd.f32 %v8103_v4, %v13898_v50  ;;  %v8095_v44 = vadd.f32 %v9466_v29, %v8094_v58  ;;  %v9715_v57 = vpop.f32.mrf.mxu1  ;;  %v9956_v24 = vld [vmem:[%s10218_s15 + $0xc0] sm:$0xff] }
 0x3fb   : > { %8260 = vst [vmem:[%s10171_s27 + $0x36] sm:$0xff] %v8236_v33  ;;  %8258 = vst [vmem:[%s10171_s27 + $0x2e] sm:$0x3] %v8234_v46  ;;  %v8241_v27 = vadd.f32 %v9949_v55, %v8193_v21  ;;  %v8116_v31 = vadd.f32 %v9715_v57, %v9481_v35  ;;  %v9484_v22 = vadd.f32 %v9483_v62, %v9482_v45 }
 0x3fc   : > { %8257 = vst [vmem:[%s10171_s27 + $0x26] sm:$0xff] %v8233_v0  ;;  %v8190_v56 = vrot.slane %v8153_v59, 6  ;;  %v8156_v9 = vadd.f32 %v13928_v53, %v8133_v43  ;;  %v8131_v54 = vadd.f32 %v8095_v44, %v13886_v60  ;;  %v8107_v50 = vpop.f32.mrf.mxu1 }
 0x3fd   : > { %8265 = vst [vmem:[%s10171_s27 + $0x4e] sm:$0xfc] %v8241_v27  ;;  %v8136_v19 = vadd.f32 %v8116_v31, %v13920_v36  ;;  %v8108_v25 = vadd.f32 %v9475_v2, %v8107_v50 }
 0x3fe   : > { %v8238_v41 = vadd.f32 %v9950_v37, %v8190_v56  ;;  %v8194_v38 = vrot.slane %v8156_v9, 6  ;;  %v8154_v30 = vadd.f32 %v13928_v53, %v8131_v54  ;;  %v9716_v63 = vpop.f32.mrf.mxu1 }
 0x3ff   : > { %v8159_v11 = vadd.f32 %v13928_v53, %v8136_v19  ;;  %v8134_v18 = vadd.f32 %v8108_v25, %v13904_v13  ;;  %v8119_v60 = vadd.f32 %v9716_v63, %v9484_v22 }
 0x400   : > { %8262 = vst [vmem:[%s10171_s27 + $0x3e] sm:$0xfc] %v8238_v41  ;;  %v8195_v36 = vsel %vm8177_vm2, %v8193_v21, %v8194_v38  ;;  %v8243_v23 = vadd.f32 %v9951_v49, %v8194_v38  ;;  %v8191_v10 = vrot.slane %v8154_v30, 6  ;;  %v8110_v8 = vpop.f32.mrf.mxu1 }
 0x401   : > { %v8242_v34 = vadd.f32 %v9952_v6, %v8195_v36  ;;  %v8199_v13 = vrot.slane %v8159_v11, 6  ;;  %v8157_v52 = vadd.f32 %v13928_v53, %v8134_v18  ;;  %v8137_v5 = vadd.f32 %v8119_v60, %v13932_v1 }
 0x402   : > { %8267 = vst [vmem:[%s10171_s27 + $0x5e] sm:$0x3] %v8243_v23  ;;  %v8192_v16 = vsel %vm8177_vm2, %v8190_v56, %v8191_v10  ;;  %v8240_v17 = vadd.f32 %v9953_v40, %v8191_v10  ;;  %v8111_v48 = vadd.f32 %v9478_v42, %v8110_v8 }
 0x403   : > { %8266 = vst [vmem:[%s10171_s27 + $0x56] sm:$0xff] %v8242_v34  ;;  %v8239_v7 = vadd.f32 %v9954_v47, %v8192_v16  ;;  %v8247_v35 = vadd.f32 %v9955_v15, %v8199_v13  ;;  %v8196_v1 = vrot.slane %v8157_v52, 6  ;;  %v8160_v39 = vadd.f32 %v13928_v53, %v8137_v5 }
 0x404   : > { %8264 = vst [vmem:[%s10171_s27 + $0x4e] sm:$0x3] %v8240_v17  ;;  %v8135_v61 = vadd.f32 %v8111_v48, %v13912_v32  ;;  %v9958_v32 = vld [vmem:[%s10218_s15 + $0xe0] sm:$0xff] }
 0x405   : > { %8263 = vst [vmem:[%s10171_s27 + $0x46] sm:$0xff] %v8239_v7  ;;  %8271 = vst [vmem:[%s10171_s27 + $0x6e] sm:$0xfc] %v8247_v35  ;;  %v8244_v4 = vadd.f32 %v9956_v24, %v8196_v1  ;;  %v8200_v45 = vrot.slane %v8160_v39, 6 }
 0x406   : > { %v8158_v29 = vadd.f32 %v13928_v53, %v8135_v61  ;;  %v9959_v53 = vld [vmem:[%s10218_s15 + $0xd0] sm:$0xf]  ;;  %s9967_s15 = scalar_lea.vmem %s9966_s30, 4096 }
 0x407   : > { %8268 = vst [vmem:[%s10171_s27 + $0x5e] sm:$0xfc] %v8244_v4  ;;  %v8201_v28 = vsel %vm8177_vm2, %v8199_v13, %v8200_v45  ;;  %v8249_v51 = vadd.f32 %v9957_v26, %v8200_v45  ;;  %p9969_p7 = scmp.lt.s32.totalorder %s9967_s15, %s9961_s16 }
 0x408   : > { %v8248_v58 = vadd.f32 %v9958_v32, %v8201_v28  ;;  %v8197_v20 = vrot.slane %v8158_v29, 6 }
 0x409   : > { %8273 = vst [vmem:[%s10171_s27 + $0x7e] sm:$0x3] %v8249_v51  ;;  %p9970_p9 = por %p9969_p7, %p9968_p6 }
 0x40a   : > { %8272 = vst [vmem:[%s10171_s27 + $0x76] sm:$0xff] %v8248_v58  ;;  %v8198_v33 = vsel %vm8177_vm2, %v8196_v1, %v8197_v20  ;;  %v8246_v14 = vadd.f32 %v9959_v53, %v8197_v20 }
 0x40b   : > { %v8245_v46 = vadd.f32 %v9960_v12, %v8198_v33  ;;  %p9971_p10 = pnand %p9970_p9, %p9964_p5 }
 0x40c   : > { %8270 = vst [vmem:[%s10171_s27 + $0x6e] sm:$0x3] %v8246_v14 }
 0x40d   : > { %8269 = vst [vmem:[%s10171_s27 + $0x66] sm:$0xff] %v8245_v46 }
 0x40e   : > { %9974 = shalt.err (!%p9971_p10)
}
 0x40f   : > { %s9975_s27 = scalar_lea.hbm %s14052_s10, 2048  ;;  %s9979_s21 = scalar_lea.hbm %s14114_s5, 8192 }
 0x410   : > { %p9976_p11 = scmp.ne.s32.totalorder %s14052_s10, %s9975_s27  ;;  %p9980_p0 = scmp.lt.s32.totalorder %s14052_s10, %s14114_s5 }
 0x411   : > { %p9981_p1 = scmp.lt.s32.totalorder %s9979_s21, %s9975_s27 }
 0x412   : > { %p9977_p12 = pnand %p9976_p11, %p10143_p3 }
 0x413   : > { %p9982_p2 = por %p9981_p1, %p9980_p0 }
 0x414   : > { %p9978_p13 = pneg %p9977_p12 }
 0x416   : > { %p9983_p4 = pnand %p9982_p2, %p9978_p13 }
 0x418   : > { %9986 = shalt.err (!%p9983_p4)
}
 0x419   : > { %s10060_s9 = smov 128   ;;  %s10061_s14 = smov 8  }
 0x41a   : > { %9717 = dma.vmem_to_hbm [thread:$0]  (%p10143_p3), %s14046_s22, 2048, %s14052_s10, %s14058_s29, %s10060_s9, %s10060_s9, %s10061_s14  }
 0x41b PF: > { %p9723_p5 = scmp.ge.s32.totalorder %s10055_s25, 2  ;;  %s8306_s16 = sand.u32 1, %s10027_s18  }
 0x41c   : > { %s8307_s26 = scalar_lea.sflag [#allocation5], %s8306_s16 }
 0x41d   : > { %p9720_p6 = pnand %p9723_p5, %p10152_p8 }
 0x41f   : > { %p9721_p7 = pneg %p9720_p6 }
 0x421   : > { %10022 = dma.done.wait (%p9721_p7), %s8307_s26, 2048  }
 0x422   : > { %10024 = vsyncadd (%p9721_p7), %s8307_s26, 4294965248  ;;  %s18_s25 = sadd.s32 1, %s10055_s25   ;;  %s14481_s6 = sld [smem:[#allocation10_spill]] }
 0x423   : > { %p15_p9 = scmp.ge.s32.totalorder %s18_s25, 6   ;;  %s14482_s18 = smov %s10031_s19 }
 0x424   : > { %s14483_s19 = smov %s10035_s20  ;;  %s14484_s20 = smov %s10161_s11 }
 0x425   : > { %s14485_s21 = smov %s10047_s23  ;;  %s14486_s22 = smov %s10051_s24 }
 0x426   : > { %s14487_s23 = smov %s14490_s28  ;;  %17 = sbr.rel (!%p15_p9) target bundleno = 5 (0x5), region = 189 }
 0x428   : > { %s14488_s24 = smov %s14481_s6 }
 0x42b   :  { %8312 = vsyncpa [#allocation5], 1 }
 0x42c   :  { %8314 = vsyncpa [#allocation5 + $0x1], 1 }
 0x42d   :  { %8315 = vsyncmov [#allocation3] }
 0x430   :  { %s8316_s7 = vpop.sfrf %8315 }
 0x431   :  { %p8934_p3 = scmp.ne.s32.totalorder %s8316_s7, 0 }
 0x433   :  { %8320 = shalt.err (%p8934_p3)  }
 0x434   :  { %8322 = vsyncmov [#allocation3 + $0x1] }
 0x437   :  { %s8323_s10 = vpop.sfrf %8322 }
 0x438   :  { %p8935_p8 = scmp.ne.s32.totalorder %s8323_s10, 0 }
 0x43a   :  { %8327 = shalt.err (%p8935_p8)  }

</bundles_post_ra>
